<compile_context>
chip_gen: v5e
topology: v5e:2x2
jax: 0.10.0
libtpu: 0.0.40
codegen_flags: <defaults>
</compile_context>

<pallas_src>
import math

import numpy as np
import jax
import jax.numpy as jnp
from jax.experimental import pallas as pl
from jax.experimental.pallas import tpu as pltpu

EPS = 1e-5
BN_SCALE = 1.0 / math.sqrt(1.0 + EPS)          # folded eval-mode BN scale
NEG_LARGE = float(np.finfo(np.float32).min)    # maxpool padding value


def round_up(x, m):
    return (x + m - 1) // m * m


# ----------------------------------------------------------------------------
# NASBench-101 graph plumbing (ported from the reference, numpy only)
# ----------------------------------------------------------------------------
def compute_vertex_channels(in_channels, out_channels, matrix):
    num_vertices = np.shape(matrix)[0]
    vertex_channels = [0] * num_vertices
    vertex_channels[0] = in_channels
    vertex_channels[num_vertices - 1] = out_channels
    if num_vertices == 2:
        return vertex_channels
    in_degree = np.sum(matrix[1:], axis=0)
    interior_channels = out_channels // in_degree[num_vertices - 1]
    correction = out_channels % in_degree[num_vertices - 1]
    for v in range(1, num_vertices - 1):
        if matrix[v, num_vertices - 1]:
            vertex_channels[v] = interior_channels
            if correction:
                vertex_channels[v] += 1
                correction -= 1
    for v in range(num_vertices - 3, 0, -1):
        if not matrix[v, num_vertices - 1]:
            for dst in range(v + 1, num_vertices - 1):
                if matrix[v, dst]:
                    vertex_channels[v] = max(vertex_channels[v],
                                             vertex_channels[dst])
        assert vertex_channels[v] > 0
    final_fan_in = 0
    for v in range(1, num_vertices - 1):
        if matrix[v, num_vertices - 1]:
            final_fan_in += vertex_channels[v]
        for dst in range(v + 1, num_vertices - 1):
            if matrix[v, dst]:
                assert vertex_channels[v] >= vertex_channels[dst]
    assert final_fan_in == out_channels or num_vertices == 2
    return [int(v) for v in vertex_channels]


# ----------------------------------------------------------------------------
# Parameter construction (torch init distributions, BN folded, GEMM form)
# ----------------------------------------------------------------------------
def init_conv_weight(key, cin, cout, k):
    n = k * k * cout
    std = math.sqrt(2.0 / n)
    w = std * jax.random.normal(key, (k, k, cin, cout), jnp.float32)
    w = w * BN_SCALE                       # fold eval-mode BN (bias is zero)
    if k == 1:
        return w.reshape(cin, cout)
    return w.reshape(k * k * cin, cout)    # im2col GEMM form: rows = (kh,kw,cin)


def build_cell(key, matrix, ops, in_channels, out_channels, weights):
    nv = matrix.shape[0]
    vc = compute_vertex_channels(in_channels, out_channels, matrix)
    keys = jax.random.split(key, 2 * nv)

    # Batch every 1x1 input projection fed by the cell input into one GEMM.
    proj_targets = [t for t in range(1, nv) if matrix[0, t]]
    proj_slices = {}
    proj_w_idx = None
    if proj_targets:
        ws, off = [], 0
        for t in proj_targets:
            w = init_conv_weight(keys[t], in_channels, vc[t], 1)   # (cin, vc[t])
            ws.append(w)
            proj_slices[t] = (off, vc[t])
            off += vc[t]
        proj_w_idx = len(weights)
        weights.append(jnp.concatenate(ws, axis=-1))               # (cin, sum)

    vertex_ops = {}
    for t in range(1, nv - 1):
        op = ops[t]
        if op == "conv3x3-bn-relu":
            vertex_ops[t] = ("conv", 3, len(weights))
            weights.append(init_conv_weight(keys[nv + t], vc[t], vc[t], 3))
        elif op == "conv1x1-bn-relu":
            vertex_ops[t] = ("conv", 1, len(weights))
            weights.append(init_conv_weight(keys[nv + t], vc[t], vc[t], 1))
        elif op == "maxpool3x3":
            vertex_ops[t] = ("maxpool3x3", None, None)
        else:
            raise ValueError(f"unknown op {op}")
    return {"matrix": matrix, "vc": vc, "proj_w_idx": proj_w_idx,
            "proj_slices": proj_slices, "vertex_ops": vertex_ops}


def pack_weights(weights):
    """Pack all weight matrices into one (rows, cmax) f32 slab, rows 8-aligned."""
    cmax = max(int(w.shape[1]) for w in weights)
    metas, off = [], 0
    for w in weights:
        r, c = int(w.shape[0]), int(w.shape[1])
        metas.append((off, r, c))
        off += round_up(r, 8)
    packed = np.zeros((round_up(off, 8), cmax), np.float32)
    for w, (o, r, c) in zip(weights, metas):
        packed[o:o + r, :c] = np.asarray(w)
    return jnp.asarray(packed), metas


def build_network(key, spec, num_labels=10, in_channels=3,
                  stem_out_channels=16, num_stacks=2, num_modules_per_stack=1):
    matrix, ops = spec
    matrix = np.asarray(matrix)
    n_cells = num_stacks * num_modules_per_stack
    keys = jax.random.split(key, n_cells + 2)
    weights, layers = [], []
    ki = 0

    out_channels = stem_out_channels
    stem_idx = len(weights)
    weights.append(init_conv_weight(keys[ki], in_channels, out_channels, 3))
    ki += 1
    layers.append(("conv3x3", stem_idx))
    in_ch = out_channels

    for stack in range(num_stacks):
        if stack > 0:
            layers.append(("maxpool2x2", None))
            out_channels *= 2
        for _ in range(num_modules_per_stack):
            layers.append(("cell", build_cell(keys[ki], matrix, ops,
                                              in_ch, out_channels, weights)))
            ki += 1
            in_ch = out_channels

    # TODO(synk): classifier init (0.01*normal, zero bias) differs from
    #             nn.Linear's Kaiming-uniform default; forward math is identical.
    cls_w_idx = len(weights)
    weights.append(0.01 * jax.random.normal(
        keys[ki], (out_channels, num_labels), jnp.float32))
    cls_b_idx = len(weights)
    weights.append(jnp.zeros((1, num_labels), jnp.float32))

    packed, metas = pack_weights(weights)
    return {"layers": layers, "packed": packed, "metas": metas,
            "num_labels": num_labels, "cls_w_idx": cls_w_idx,
            "cls_b_idx": cls_b_idx}


# ----------------------------------------------------------------------------
# Scratch planning: distinct padded buffers, keyed by interior shape and kind
# (conv -> zero border, maxpool3x3 -> -FLT_MAX border; never shared).
# ----------------------------------------------------------------------------
def padded_shape(key):
    n, h, w, c = key
    return (n, h + 2, round_up(w + 2, 8), c)   # W padded up to a multiple of 8


def plan_scratch(net, N, H, W, C_img):
    conv_keys, pool_keys = [], []

    def need(lst, k):
        if k not in lst:
            lst.append(k)

    h, w, c = H, W, C_img
    for kind, p in net["layers"]:
        if kind == "conv3x3":                       # stem
            need(conv_keys, (N, h, w, c))
            c = net["metas"][p][2]
        elif kind == "maxpool2x2":
            h //= 2
            w //= 2
        else:                                       # cell
            cell = p
            vc = cell["vc"]
            nv = cell["matrix"].shape[0]
            for t in range(1, nv - 1):
                k_kind, kk, _ = cell["vertex_ops"][t]
                if k_kind == "conv" and kk == 3:
                    need(conv_keys, (N, h, w, vc[t]))
                elif k_kind == "maxpool3x3":
                    need(pool_keys, (N, h, w, vc[t]))
            c = vc[nv - 1]
    return conv_keys, pool_keys


# ----------------------------------------------------------------------------
# Fused forward pass: one pallas_call for the whole network
# ----------------------------------------------------------------------------
def make_forward(net, N, H, W, C_img):
    layers = net["layers"]
    metas = net["metas"]
    packed = net["packed"]
    num_labels = net["num_labels"]
    conv_keys, pool_keys = plan_scratch(net, N, H, W, C_img)
    conv_idx = {k: i for i, k in enumerate(conv_keys)}
    pool_idx = {k: len(conv_keys) + i for i, k in enumerate(pool_keys)}

    def kernel(x_ref, w_ref, out_ref, *scratch):
        # ---- one-time buffer init: borders keep these values forever --------
        for k in conv_keys:
            buf = scratch[conv_idx[k]]
            buf[...] = jnp.zeros_like(buf)                       # zero border
        for k in pool_keys:
            buf = scratch[pool_idx[k]]
            buf[...] = jnp.full(buf.shape, NEG_LARGE, jnp.float32)

        def wmat(idx):
            off, r, c = metas[idx]
            return w_ref[off:off + r, :c]                        # static slice

        def conv_relu(x, k, widx):
            n, h, w, cin = x.shape
            cout = metas[widx][2]
            if k == 1:
                y = jnp.dot(x.reshape(n * h * w, cin), wmat(widx),
                            preferred_element_type=jnp.float32)
            else:
                buf = scratch[conv_idx[(n, h, w, cin)]]
                buf[:, 1:1 + h, 1:1 + w, :] = x                  # interior only
                xp = buf[...]
                # im2col: 9 shifted taps along the contraction dim -> one GEMM.
                patches = [xp[:, kh:kh + h, kw:kw + w, :].reshape(n * h * w, cin)
                           for kh in range(3) for kw in range(3)]
                y = jnp.dot(jnp.concatenate(patches, axis=-1), wmat(widx),
                            preferred_element_type=jnp.float32)
            return jnp.maximum(y, 0.0).reshape(n, h, w, cout)

        def maxpool3x3(x):
            n, h, w, c = x.shape
            buf = scratch[pool_idx[(n, h, w, c)]]
            buf[:, 1:1 + h, 1:1 + w, :] = x                      # interior only
            xp = buf[...]
            out = xp[:, 0:h, 0:w, :]
            for kh in range(3):
                for kw in range(3):
                    if kh == 0 and kw == 0:
                        continue
                    out = jnp.maximum(out, xp[:, kh:kh + h, kw:kw + w, :])
            return out

        def maxpool2x2s2(x):
            # Pure register reduction: no scratch, no per-pixel loads/stores.
            n, h, w, c = x.shape
            xh = x.reshape(n, h // 2, 2, w, c)        # major-dim split (cheap)
            hmax = jnp.maximum(xh[:, :, 0], xh[:, :, 1])
            xw = hmax.reshape(n, h // 2, w // 2, 2, c)  # W-pair split
            return jnp.maximum(xw[:, :, :, 0], xw[:, :, :, 1])

        def truncate(t, c):
            cur = t.shape[-1]
            if cur < c:
                raise ValueError("input channel < output channels for truncate")
            if cur == c:
                return t
            assert cur - c == 1
            return t[..., :c]

        def cell_forward(x, cell):
            matrix, vc = cell["matrix"], cell["vc"]
            nv = matrix.shape[0]
            n, h, w, cin = x.shape
            # One fused GEMM for all 1x1 projections of the cell input.
            proj = {}
            if cell["proj_w_idx"] is not None:
                y = jnp.dot(x.reshape(n * h * w, cin), wmat(cell["proj_w_idx"]),
                            preferred_element_type=jnp.float32)
                y = jnp.maximum(y, 0.0)            # relu(concat) == concat(relu)
                for t, (off, size) in cell["proj_slices"].items():
                    proj[t] = y[:, off:off + size].reshape(n, h, w, size)

            tensors = [x]
            out_concat = []
            for t in range(1, nv - 1):
                fan_in = []
                for src in range(1, t):
                    if matrix[src, t]:
                        fan_in.append(truncate(tensors[src], vc[t]))
                if matrix[0, t]:
                    fan_in.append(proj[t])
                v_in = fan_in[0]
                for val in fan_in[1:]:
                    v_in = v_in + val                              # fused adds
                kind, k, widx = cell["vertex_ops"][t]
                if kind == "conv":
                    v_out = conv_relu(v_in, k, widx)
                else:
                    v_out = maxpool3x3(v_in)
                tensors.append(v_out)
                if matrix[t, nv - 1]:
                    out_concat.append(v_out)

            if not out_concat:
                outputs = proj[nv - 1]
            else:
                outputs = (out_concat[0] if len(out_concat) == 1
                           else jnp.concatenate(out_concat, axis=-1))
                if matrix[0, nv - 1]:
                    outputs = outputs + proj[nv - 1]
            return outputs

        # --------------------- whole network, VMEM/vreg resident -------------
        x = x_ref[...]
        for kind, p in layers:
            if kind == "conv3x3":
                x = conv_relu(x, 3, p)
            elif kind == "maxpool2x2":
                x = maxpool2x2s2(x)
            else:
                x = cell_forward(x, p)

        n, h, w, c = x.shape
        pooled = jnp.mean(x.reshape(n, h * w, c), axis=1)          # GAP
        logits = jnp.dot(pooled, wmat(net["cls_w_idx"]),
                         preferred_element_type=jnp.float32)
        logits = logits + wmat(net["cls_b_idx"])
        out_ref[...] = logits

    vmem = pl.BlockSpec(memory_space=pltpu.MemorySpace.VMEM)
    fwd = pl.pallas_call(
        kernel,
        out_shape=jax.ShapeDtypeStruct((N, num_labels), jnp.float32),
        in_specs=[vmem, vmem],
        out_specs=vmem,
        scratch_shapes=[pltpu.VMEM(padded_shape(k), jnp.float32)
                        for k in conv_keys]
                     + [pltpu.VMEM(padded_shape(k), jnp.float32)
                        for k in pool_keys],
        compiler_params=pltpu.CompilerParams(
            vmem_limit_bytes=32 * 1024 * 1024),
    )

    def run(x_nhwc):
        return fwd(x_nhwc, packed)

    return run


# ----------------------------------------------------------------------------
if __name__ == "__main__":
    # 5-vertex NASBench-101 spec exercising every op type + input/output proj.
    matrix = np.array([[0, 1, 1, 0, 1],
                       [0, 0, 0, 1, 0],
                       [0, 0, 0, 1, 0],
                       [0, 0, 0, 0, 1],
                       [0, 0, 0, 0, 0]], dtype=np.int32)
    ops = ["input", "conv3x3-bn-relu", "conv1x1-bn-relu", "maxpool3x3", "output"]

    key = jax.random.PRNGKey(0)
    k_net, k_x = jax.random.split(key)
    net = build_network(k_net, (matrix, ops), num_labels=10, in_channels=3,
                        stem_out_channels=16, num_stacks=2,
                        num_modules_per_stack=1)

    N, C, H, W = 2, 3, 8, 8
    x_nchw = jax.random.normal(k_x, (N, C, H, W), jnp.float32)   # PyTorch layout
    x = jnp.transpose(x_nchw, (0, 2, 3, 1))                      # -> NHWC

    forward = make_forward(net, N, H, W, C)
    logits = forward(x)
    logits = jax.block_until_ready(logits)
    assert logits.shape == (N, 10), logits.shape
    assert bool(jnp.all(jnp.isfinite(logits)))
    print("KERNEL_OK")
</pallas_src>

<mosaic_0001>
module attributes {stable_mosaic.version = 11 : i64} {
  func.func @kernel(%arg0: memref<2x8x8x3xf32, #tpu.memory_space<vmem>>, %arg1: memref<584x96xf32, #tpu.memory_space<vmem>>, %arg2: memref<2x10xf32, #tpu.memory_space<vmem>>, %arg3: memref<2x10x16x3xf32, #tpu.memory_space<vmem>>, %arg4: memref<2x10x16x16xf32, #tpu.memory_space<vmem>>, %arg5: memref<2x6x8x32xf32, #tpu.memory_space<vmem>>, %arg6: memref<2x10x16x16xf32, #tpu.memory_space<vmem>>, %arg7: memref<2x6x8x32xf32, #tpu.memory_space<vmem>>) attributes {dimension_semantics = [], scalar_prefetch = 0 : i64, scratch_operands = 5 : i64, tpu.core_type = #tpu.core_type<tc>} {
    %cst = arith.constant 0.000000e+00 : f32
    %0 = vector.broadcast %cst : f32 to vector<2x10x16x3xf32>
    %c0 = arith.constant 0 : index
    %c0_0 = arith.constant 0 : index
    %c0_1 = arith.constant 0 : index
    %c0_2 = arith.constant 0 : index
    %1 = vector.load %arg3[%c0, %c0_0, %c0_1, %c0_2] : memref<2x10x16x3xf32, #tpu.memory_space<vmem>>, vector<2x10x16x3xf32>
    tpu.vector_store %arg3[%c0, %c0_0, %c0_1, %c0_2], %0 {strides = array<i32>} : memref<2x10x16x3xf32, #tpu.memory_space<vmem>>, vector<2x10x16x3xf32>,
    %cst_3 = arith.constant 0.000000e+00 : f32
    %2 = vector.broadcast %cst_3 : f32 to vector<2x10x16x16xf32>
    %c0_4 = arith.constant 0 : index
    %c0_5 = arith.constant 0 : index
    %c0_6 = arith.constant 0 : index
    %c0_7 = arith.constant 0 : index
    %3 = vector.load %arg4[%c0_4, %c0_5, %c0_6, %c0_7] : memref<2x10x16x16xf32, #tpu.memory_space<vmem>>, vector<2x10x16x16xf32>
    tpu.vector_store %arg4[%c0_4, %c0_5, %c0_6, %c0_7], %2 {strides = array<i32>} : memref<2x10x16x16xf32, #tpu.memory_space<vmem>>, vector<2x10x16x16xf32>,
    %cst_8 = arith.constant 0.000000e+00 : f32
    %4 = vector.broadcast %cst_8 : f32 to vector<2x6x8x32xf32>
    %c0_9 = arith.constant 0 : index
    %c0_10 = arith.constant 0 : index
    %c0_11 = arith.constant 0 : index
    %c0_12 = arith.constant 0 : index
    %5 = vector.load %arg5[%c0_9, %c0_10, %c0_11, %c0_12] : memref<2x6x8x32xf32, #tpu.memory_space<vmem>>, vector<2x6x8x32xf32>
    tpu.vector_store %arg5[%c0_9, %c0_10, %c0_11, %c0_12], %4 {strides = array<i32>} : memref<2x6x8x32xf32, #tpu.memory_space<vmem>>, vector<2x6x8x32xf32>,
    %cst_13 = arith.constant -3.40282347E+38 : f32
    %6 = vector.broadcast %cst_13 : f32 to vector<2x10x16x16xf32>
    %c0_14 = arith.constant 0 : index
    %c0_15 = arith.constant 0 : index
    %c0_16 = arith.constant 0 : index
    %c0_17 = arith.constant 0 : index
    %7 = vector.load %arg6[%c0_14, %c0_15, %c0_16, %c0_17] : memref<2x10x16x16xf32, #tpu.memory_space<vmem>>, vector<2x10x16x16xf32>
    tpu.vector_store %arg6[%c0_14, %c0_15, %c0_16, %c0_17], %6 {strides = array<i32>} : memref<2x10x16x16xf32, #tpu.memory_space<vmem>>, vector<2x10x16x16xf32>,
    %cst_18 = arith.constant -3.40282347E+38 : f32
    %8 = vector.broadcast %cst_18 : f32 to vector<2x6x8x32xf32>
    %c0_19 = arith.constant 0 : index
    %c0_20 = arith.constant 0 : index
    %c0_21 = arith.constant 0 : index
    %c0_22 = arith.constant 0 : index
    %9 = vector.load %arg7[%c0_19, %c0_20, %c0_21, %c0_22] : memref<2x6x8x32xf32, #tpu.memory_space<vmem>>, vector<2x6x8x32xf32>
    tpu.vector_store %arg7[%c0_19, %c0_20, %c0_21, %c0_22], %8 {strides = array<i32>} : memref<2x6x8x32xf32, #tpu.memory_space<vmem>>, vector<2x6x8x32xf32>,
    %c0_23 = arith.constant 0 : index
    %c0_24 = arith.constant 0 : index
    %c0_25 = arith.constant 0 : index
    %c0_26 = arith.constant 0 : index
    %10 = vector.load %arg0[%c0_23, %c0_24, %c0_25, %c0_26] : memref<2x8x8x3xf32, #tpu.memory_space<vmem>>, vector<2x8x8x3xf32>
    %c0_27 = arith.constant 0 : index
    %c1 = arith.constant 1 : index
    %c1_28 = arith.constant 1 : index
    %c0_29 = arith.constant 0 : index
    %11 = vector.load %arg3[%c0_27, %c1, %c1_28, %c0_29] : memref<2x10x16x3xf32, #tpu.memory_space<vmem>>, vector<2x8x8x3xf32>
    tpu.vector_store %arg3[%c0_27, %c1, %c1_28, %c0_29], %10 {strides = array<i32>} : memref<2x10x16x3xf32, #tpu.memory_space<vmem>>, vector<2x8x8x3xf32>,
    %c0_30 = arith.constant 0 : index
    %c0_31 = arith.constant 0 : index
    %c0_32 = arith.constant 0 : index
    %c0_33 = arith.constant 0 : index
    %12 = vector.load %arg3[%c0_30, %c0_31, %c0_32, %c0_33] : memref<2x10x16x3xf32, #tpu.memory_space<vmem>>, vector<2x10x16x3xf32>
    %13 = vector.extract_strided_slice %12 {offsets = [0, 0, 0, 0], sizes = [2, 8, 8, 3], strides = [1, 1, 1, 1]} : vector<2x10x16x3xf32> to vector<2x8x8x3xf32>
    %14 = vector.shape_cast %13 : vector<2x8x8x3xf32> to vector<128x3xf32>
    %15 = vector.extract_strided_slice %12 {offsets = [0, 0, 1, 0], sizes = [2, 8, 8, 3], strides = [1, 1, 1, 1]} : vector<2x10x16x3xf32> to vector<2x8x8x3xf32>
    %16 = vector.shape_cast %15 : vector<2x8x8x3xf32> to vector<128x3xf32>
    %17 = vector.extract_strided_slice %12 {offsets = [0, 0, 2, 0], sizes = [2, 8, 8, 3], strides = [1, 1, 1, 1]} : vector<2x10x16x3xf32> to vector<2x8x8x3xf32>
    %18 = vector.shape_cast %17 : vector<2x8x8x3xf32> to vector<128x3xf32>
    %19 = vector.extract_strided_slice %12 {offsets = [0, 1, 0, 0], sizes = [2, 8, 8, 3], strides = [1, 1, 1, 1]} : vector<2x10x16x3xf32> to vector<2x8x8x3xf32>
    %20 = vector.shape_cast %19 : vector<2x8x8x3xf32> to vector<128x3xf32>
    %21 = vector.extract_strided_slice %12 {offsets = [0, 1, 1, 0], sizes = [2, 8, 8, 3], strides = [1, 1, 1, 1]} : vector<2x10x16x3xf32> to vector<2x8x8x3xf32>
    %22 = vector.shape_cast %21 : vector<2x8x8x3xf32> to vector<128x3xf32>
    %23 = vector.extract_strided_slice %12 {offsets = [0, 1, 2, 0], sizes = [2, 8, 8, 3], strides = [1, 1, 1, 1]} : vector<2x10x16x3xf32> to vector<2x8x8x3xf32>
    %24 = vector.shape_cast %23 : vector<2x8x8x3xf32> to vector<128x3xf32>
    %25 = vector.extract_strided_slice %12 {offsets = [0, 2, 0, 0], sizes = [2, 8, 8, 3], strides = [1, 1, 1, 1]} : vector<2x10x16x3xf32> to vector<2x8x8x3xf32>
    %26 = vector.shape_cast %25 : vector<2x8x8x3xf32> to vector<128x3xf32>
    %27 = vector.extract_strided_slice %12 {offsets = [0, 2, 1, 0], sizes = [2, 8, 8, 3], strides = [1, 1, 1, 1]} : vector<2x10x16x3xf32> to vector<2x8x8x3xf32>
    %28 = vector.shape_cast %27 : vector<2x8x8x3xf32> to vector<128x3xf32>
    %29 = vector.extract_strided_slice %12 {offsets = [0, 2, 2, 0], sizes = [2, 8, 8, 3], strides = [1, 1, 1, 1]} : vector<2x10x16x3xf32> to vector<2x8x8x3xf32>
    %30 = vector.shape_cast %29 : vector<2x8x8x3xf32> to vector<128x3xf32>
    %31 = tpu.concatenate %14, %16, %18, %20, %22, %24, %26, %28, %30 in 1 : vector<128x3xf32>, vector<128x3xf32>, vector<128x3xf32>, vector<128x3xf32>, vector<128x3xf32>, vector<128x3xf32>, vector<128x3xf32>, vector<128x3xf32>, vector<128x3xf32> -> vector<128x27xf32>
    %c0_34 = arith.constant 0 : index
    %c0_35 = arith.constant 0 : index
    %32 = vector.load %arg1[%c0_34, %c0_35] : memref<584x96xf32, #tpu.memory_space<vmem>>, vector<27x16xf32>
    %cst_36 = arith.constant dense<0.000000e+00> : vector<128x16xf32>
    %33 = tpu.matmul %31, %32, %cst_36 {dimension_numbers = #tpu.dot_dimension_numbers<[1], [0], [0], [1], [0, 0, 1, 1], [], []>} : vector<128x27xf32>, vector<27x16xf32>, vector<128x16xf32> -> vector<128x16xf32>
    %cst_37 = arith.constant 0.000000e+00 : f32
    %34 = vector.broadcast %cst_37 : f32 to vector<128x16xf32>
    %35 = arith.maximumf %33, %34 : vector<128x16xf32>
    %36 = vector.shape_cast %35 : vector<128x16xf32> to vector<2x8x8x16xf32>
    %37 = vector.shape_cast %36 : vector<2x8x8x16xf32> to vector<128x16xf32>
    %c32 = arith.constant 32 : index
    %c0_38 = arith.constant 0 : index
    %38 = vector.load %arg1[%c32, %c0_38] : memref<584x96xf32, #tpu.memory_space<vmem>>, vector<16x48xf32>
    %cst_39 = arith.constant dense<0.000000e+00> : vector<128x48xf32>
    %39 = tpu.matmul %37, %38, %cst_39 {dimension_numbers = #tpu.dot_dimension_numbers<[1], [0], [0], [1], [0, 0, 1, 1], [], []>} : vector<128x16xf32>, vector<16x48xf32>, vector<128x48xf32> -> vector<128x48xf32>
    %cst_40 = arith.constant 0.000000e+00 : f32
    %40 = vector.broadcast %cst_40 : f32 to vector<128x48xf32>
    %41 = arith.maximumf %39, %40 : vector<128x48xf32>
    %42 = vector.extract_strided_slice %41 {offsets = [0, 0], sizes = [128, 16], strides = [1, 1]} : vector<128x48xf32> to vector<128x16xf32>
    %43 = vector.shape_cast %42 : vector<128x16xf32> to vector<2x8x8x16xf32>
    %44 = vector.extract_strided_slice %41 {offsets = [0, 16], sizes = [128, 16], strides = [1, 1]} : vector<128x48xf32> to vector<128x16xf32>
    %45 = vector.shape_cast %44 : vector<128x16xf32> to vector<2x8x8x16xf32>
    %46 = vector.extract_strided_slice %41 {offsets = [0, 32], sizes = [128, 16], strides = [1, 1]} : vector<128x48xf32> to vector<128x16xf32>
    %47 = vector.shape_cast %46 : vector<128x16xf32> to vector<2x8x8x16xf32>
    %c0_41 = arith.constant 0 : index
    %c1_42 = arith.constant 1 : index
    %c1_43 = arith.constant 1 : index
    %c0_44 = arith.constant 0 : index
    %48 = vector.load %arg4[%c0_41, %c1_42, %c1_43, %c0_44] : memref<2x10x16x16xf32, #tpu.memory_space<vmem>>, vector<2x8x8x16xf32>
    tpu.vector_store %arg4[%c0_41, %c1_42, %c1_43, %c0_44], %43 {strides = array<i32>} : memref<2x10x16x16xf32, #tpu.memory_space<vmem>>, vector<2x8x8x16xf32>,
    %c0_45 = arith.constant 0 : index
    %c0_46 = arith.constant 0 : index
    %c0_47 = arith.constant 0 : index
    %c0_48 = arith.constant 0 : index
    %49 = vector.load %arg4[%c0_45, %c0_46, %c0_47, %c0_48] : memref<2x10x16x16xf32, #tpu.memory_space<vmem>>, vector<2x10x16x16xf32>
    %50 = vector.extract_strided_slice %49 {offsets = [0, 0, 0, 0], sizes = [2, 8, 8, 16], strides = [1, 1, 1, 1]} : vector<2x10x16x16xf32> to vector<2x8x8x16xf32>
    %51 = vector.shape_cast %50 : vector<2x8x8x16xf32> to vector<128x16xf32>
    %52 = vector.extract_strided_slice %49 {offsets = [0, 0, 1, 0], sizes = [2, 8, 8, 16], strides = [1, 1, 1, 1]} : vector<2x10x16x16xf32> to vector<2x8x8x16xf32>
    %53 = vector.shape_cast %52 : vector<2x8x8x16xf32> to vector<128x16xf32>
    %54 = vector.extract_strided_slice %49 {offsets = [0, 0, 2, 0], sizes = [2, 8, 8, 16], strides = [1, 1, 1, 1]} : vector<2x10x16x16xf32> to vector<2x8x8x16xf32>
    %55 = vector.shape_cast %54 : vector<2x8x8x16xf32> to vector<128x16xf32>
    %56 = vector.extract_strided_slice %49 {offsets = [0, 1, 0, 0], sizes = [2, 8, 8, 16], strides = [1, 1, 1, 1]} : vector<2x10x16x16xf32> to vector<2x8x8x16xf32>
    %57 = vector.shape_cast %56 : vector<2x8x8x16xf32> to vector<128x16xf32>
    %58 = vector.extract_strided_slice %49 {offsets = [0, 1, 1, 0], sizes = [2, 8, 8, 16], strides = [1, 1, 1, 1]} : vector<2x10x16x16xf32> to vector<2x8x8x16xf32>
    %59 = vector.shape_cast %58 : vector<2x8x8x16xf32> to vector<128x16xf32>
    %60 = vector.extract_strided_slice %49 {offsets = [0, 1, 2, 0], sizes = [2, 8, 8, 16], strides = [1, 1, 1, 1]} : vector<2x10x16x16xf32> to vector<2x8x8x16xf32>
    %61 = vector.shape_cast %60 : vector<2x8x8x16xf32> to vector<128x16xf32>
    %62 = vector.extract_strided_slice %49 {offsets = [0, 2, 0, 0], sizes = [2, 8, 8, 16], strides = [1, 1, 1, 1]} : vector<2x10x16x16xf32> to vector<2x8x8x16xf32>
    %63 = vector.shape_cast %62 : vector<2x8x8x16xf32> to vector<128x16xf32>
    %64 = vector.extract_strided_slice %49 {offsets = [0, 2, 1, 0], sizes = [2, 8, 8, 16], strides = [1, 1, 1, 1]} : vector<2x10x16x16xf32> to vector<2x8x8x16xf32>
    %65 = vector.shape_cast %64 : vector<2x8x8x16xf32> to vector<128x16xf32>
    %66 = vector.extract_strided_slice %49 {offsets = [0, 2, 2, 0], sizes = [2, 8, 8, 16], strides = [1, 1, 1, 1]} : vector<2x10x16x16xf32> to vector<2x8x8x16xf32>
    %67 = vector.shape_cast %66 : vector<2x8x8x16xf32> to vector<128x16xf32>
    %68 = tpu.concatenate %51, %53, %55, %57, %59, %61, %63, %65, %67 in 1 : vector<128x16xf32>, vector<128x16xf32>, vector<128x16xf32>, vector<128x16xf32>, vector<128x16xf32>, vector<128x16xf32>, vector<128x16xf32>, vector<128x16xf32>, vector<128x16xf32> -> vector<128x144xf32>
    %c48 = arith.constant 48 : index
    %c0_49 = arith.constant 0 : index
    %69 = vector.load %arg1[%c48, %c0_49] : memref<584x96xf32, #tpu.memory_space<vmem>>, vector<144x16xf32>
    %cst_50 = arith.constant dense<0.000000e+00> : vector<128x16xf32>
    %70 = tpu.matmul %68, %69, %cst_50 {dimension_numbers = #tpu.dot_dimension_numbers<[1], [0], [0], [1], [0, 0, 1, 1], [], []>} : vector<128x144xf32>, vector<144x16xf32>, vector<128x16xf32> -> vector<128x16xf32>
    %cst_51 = arith.constant 0.000000e+00 : f32
    %71 = vector.broadcast %cst_51 : f32 to vector<128x16xf32>
    %72 = arith.maximumf %70, %71 : vector<128x16xf32>
    %73 = vector.shape_cast %72 : vector<128x16xf32> to vector<2x8x8x16xf32>
    %74 = vector.shape_cast %45 : vector<2x8x8x16xf32> to vector<128x16xf32>
    %c192 = arith.constant 192 : index
    %c0_52 = arith.constant 0 : index
    %75 = vector.load %arg1[%c192, %c0_52] : memref<584x96xf32, #tpu.memory_space<vmem>>, vector<16x16xf32>
    %cst_53 = arith.constant dense<0.000000e+00> : vector<128x16xf32>
    %76 = tpu.matmul %74, %75, %cst_53 {dimension_numbers = #tpu.dot_dimension_numbers<[1], [0], [0], [1], [0, 0, 1, 1], [], []>} : vector<128x16xf32>, vector<16x16xf32>, vector<128x16xf32> -> vector<128x16xf32>
    %cst_54 = arith.constant 0.000000e+00 : f32
    %77 = vector.broadcast %cst_54 : f32 to vector<128x16xf32>
    %78 = arith.maximumf %76, %77 : vector<128x16xf32>
    %79 = vector.shape_cast %78 : vector<128x16xf32> to vector<2x8x8x16xf32>
    %80 = arith.addf %73, %79 : vector<2x8x8x16xf32>
    %c0_55 = arith.constant 0 : index
    %c1_56 = arith.constant 1 : index
    %c1_57 = arith.constant 1 : index
    %c0_58 = arith.constant 0 : index
    %81 = vector.load %arg6[%c0_55, %c1_56, %c1_57, %c0_58] : memref<2x10x16x16xf32, #tpu.memory_space<vmem>>, vector<2x8x8x16xf32>
    tpu.vector_store %arg6[%c0_55, %c1_56, %c1_57, %c0_58], %80 {strides = array<i32>} : memref<2x10x16x16xf32, #tpu.memory_space<vmem>>, vector<2x8x8x16xf32>,
    %c0_59 = arith.constant 0 : index
    %c0_60 = arith.constant 0 : index
    %c0_61 = arith.constant 0 : index
    %c0_62 = arith.constant 0 : index
    %82 = vector.load %arg6[%c0_59, %c0_60, %c0_61, %c0_62] : memref<2x10x16x16xf32, #tpu.memory_space<vmem>>, vector<2x10x16x16xf32>
    %83 = vector.extract_strided_slice %82 {offsets = [0, 0, 0, 0], sizes = [2, 8, 8, 16], strides = [1, 1, 1, 1]} : vector<2x10x16x16xf32> to vector<2x8x8x16xf32>
    %84 = vector.extract_strided_slice %82 {offsets = [0, 0, 1, 0], sizes = [2, 8, 8, 16], strides = [1, 1, 1, 1]} : vector<2x10x16x16xf32> to vector<2x8x8x16xf32>
    %85 = arith.maximumf %83, %84 : vector<2x8x8x16xf32>
    %86 = vector.extract_strided_slice %82 {offsets = [0, 0, 2, 0], sizes = [2, 8, 8, 16], strides = [1, 1, 1, 1]} : vector<2x10x16x16xf32> to vector<2x8x8x16xf32>
    %87 = arith.maximumf %85, %86 : vector<2x8x8x16xf32>
    %88 = vector.extract_strided_slice %82 {offsets = [0, 1, 0, 0], sizes = [2, 8, 8, 16], strides = [1, 1, 1, 1]} : vector<2x10x16x16xf32> to vector<2x8x8x16xf32>
    %89 = arith.maximumf %87, %88 : vector<2x8x8x16xf32>
    %90 = vector.extract_strided_slice %82 {offsets = [0, 1, 1, 0], sizes = [2, 8, 8, 16], strides = [1, 1, 1, 1]} : vector<2x10x16x16xf32> to vector<2x8x8x16xf32>
    %91 = arith.maximumf %89, %90 : vector<2x8x8x16xf32>
    %92 = vector.extract_strided_slice %82 {offsets = [0, 1, 2, 0], sizes = [2, 8, 8, 16], strides = [1, 1, 1, 1]} : vector<2x10x16x16xf32> to vector<2x8x8x16xf32>
    %93 = arith.maximumf %91, %92 : vector<2x8x8x16xf32>
    %94 = vector.extract_strided_slice %82 {offsets = [0, 2, 0, 0], sizes = [2, 8, 8, 16], strides = [1, 1, 1, 1]} : vector<2x10x16x16xf32> to vector<2x8x8x16xf32>
    %95 = arith.maximumf %93, %94 : vector<2x8x8x16xf32>
    %96 = vector.extract_strided_slice %82 {offsets = [0, 2, 1, 0], sizes = [2, 8, 8, 16], strides = [1, 1, 1, 1]} : vector<2x10x16x16xf32> to vector<2x8x8x16xf32>
    %97 = arith.maximumf %95, %96 : vector<2x8x8x16xf32>
    %98 = vector.extract_strided_slice %82 {offsets = [0, 2, 2, 0], sizes = [2, 8, 8, 16], strides = [1, 1, 1, 1]} : vector<2x10x16x16xf32> to vector<2x8x8x16xf32>
    %99 = arith.maximumf %97, %98 : vector<2x8x8x16xf32>
    %100 = arith.addf %99, %47 : vector<2x8x8x16xf32>
    %101 = vector.shape_cast %100 : vector<2x8x8x16xf32> to vector<2x4x2x8x16xf32>
    %102 = vector.extract_strided_slice %101 {offsets = [0, 0, 0, 0, 0], sizes = [2, 4, 1, 8, 16], strides = [1, 1, 1, 1, 1]} : vector<2x4x2x8x16xf32> to vector<2x4x1x8x16xf32>
    %103 = vector.shape_cast %102 : vector<2x4x1x8x16xf32> to vector<2x4x8x16xf32>
    %104 = vector.extract_strided_slice %101 {offsets = [0, 0, 1, 0, 0], sizes = [2, 4, 1, 8, 16], strides = [1, 1, 1, 1, 1]} : vector<2x4x2x8x16xf32> to vector<2x4x1x8x16xf32>
    %105 = vector.shape_cast %104 : vector<2x4x1x8x16xf32> to vector<2x4x8x16xf32>
    %106 = arith.maximumf %103, %105 : vector<2x4x8x16xf32>
    %107 = vector.shape_cast %106 : vector<2x4x8x16xf32> to vector<2x4x4x2x16xf32>
    %108 = vector.extract_strided_slice %107 {offsets = [0, 0, 0, 0, 0], sizes = [2, 4, 4, 1, 16], strides = [1, 1, 1, 1, 1]} : vector<2x4x4x2x16xf32> to vector<2x4x4x1x16xf32>
    %109 = vector.shape_cast %108 : vector<2x4x4x1x16xf32> to vector<2x4x4x16xf32>
    %110 = vector.extract_strided_slice %107 {offsets = [0, 0, 0, 1, 0], sizes = [2, 4, 4, 1, 16], strides = [1, 1, 1, 1, 1]} : vector<2x4x4x2x16xf32> to vector<2x4x4x1x16xf32>
    %111 = vector.shape_cast %110 : vector<2x4x4x1x16xf32> to vector<2x4x4x16xf32>
    %112 = arith.maximumf %109, %111 : vector<2x4x4x16xf32>
    %113 = vector.shape_cast %112 : vector<2x4x4x16xf32> to vector<32x16xf32>
    %c208 = arith.constant 208 : index
    %c0_63 = arith.constant 0 : index
    %114 = vector.load %arg1[%c208, %c0_63] : memref<584x96xf32, #tpu.memory_space<vmem>>, vector<16x96xf32>
    %cst_64 = arith.constant dense<0.000000e+00> : vector<32x96xf32>
    %115 = tpu.matmul %113, %114, %cst_64 {dimension_numbers = #tpu.dot_dimension_numbers<[1], [0], [0], [1], [0, 0, 1, 1], [], []>} : vector<32x16xf32>, vector<16x96xf32>, vector<32x96xf32> -> vector<32x96xf32>
    %cst_65 = arith.constant 0.000000e+00 : f32
    %116 = vector.broadcast %cst_65 : f32 to vector<32x96xf32>
    %117 = arith.maximumf %115, %116 : vector<32x96xf32>
    %118 = vector.extract_strided_slice %117 {offsets = [0, 0], sizes = [32, 32], strides = [1, 1]} : vector<32x96xf32> to vector<32x32xf32>
    %119 = vector.shape_cast %118 : vector<32x32xf32> to vector<2x4x4x32xf32>
    %120 = vector.extract_strided_slice %117 {offsets = [0, 32], sizes = [32, 32], strides = [1, 1]} : vector<32x96xf32> to vector<32x32xf32>
    %121 = vector.shape_cast %120 : vector<32x32xf32> to vector<2x4x4x32xf32>
    %122 = vector.extract_strided_slice %117 {offsets = [0, 64], sizes = [32, 32], strides = [1, 1]} : vector<32x96xf32> to vector<32x32xf32>
    %123 = vector.shape_cast %122 : vector<32x32xf32> to vector<2x4x4x32xf32>
    %c0_66 = arith.constant 0 : index
    %c1_67 = arith.constant 1 : index
    %c1_68 = arith.constant 1 : index
    %c0_69 = arith.constant 0 : index
    %124 = vector.load %arg5[%c0_66, %c1_67, %c1_68, %c0_69] : memref<2x6x8x32xf32, #tpu.memory_space<vmem>>, vector<2x4x4x32xf32>
    tpu.vector_store %arg5[%c0_66, %c1_67, %c1_68, %c0_69], %119 {strides = array<i32>} : memref<2x6x8x32xf32, #tpu.memory_space<vmem>>, vector<2x4x4x32xf32>,
    %c0_70 = arith.constant 0 : index
    %c0_71 = arith.constant 0 : index
    %c0_72 = arith.constant 0 : index
    %c0_73 = arith.constant 0 : index
    %125 = vector.load %arg5[%c0_70, %c0_71, %c0_72, %c0_73] : memref<2x6x8x32xf32, #tpu.memory_space<vmem>>, vector<2x6x8x32xf32>
    %126 = vector.extract_strided_slice %125 {offsets = [0, 0, 0, 0], sizes = [2, 4, 4, 32], strides = [1, 1, 1, 1]} : vector<2x6x8x32xf32> to vector<2x4x4x32xf32>
    %127 = vector.shape_cast %126 : vector<2x4x4x32xf32> to vector<32x32xf32>
    %128 = vector.extract_strided_slice %125 {offsets = [0, 0, 1, 0], sizes = [2, 4, 4, 32], strides = [1, 1, 1, 1]} : vector<2x6x8x32xf32> to vector<2x4x4x32xf32>
    %129 = vector.shape_cast %128 : vector<2x4x4x32xf32> to vector<32x32xf32>
    %130 = vector.extract_strided_slice %125 {offsets = [0, 0, 2, 0], sizes = [2, 4, 4, 32], strides = [1, 1, 1, 1]} : vector<2x6x8x32xf32> to vector<2x4x4x32xf32>
    %131 = vector.shape_cast %130 : vector<2x4x4x32xf32> to vector<32x32xf32>
    %132 = vector.extract_strided_slice %125 {offsets = [0, 1, 0, 0], sizes = [2, 4, 4, 32], strides = [1, 1, 1, 1]} : vector<2x6x8x32xf32> to vector<2x4x4x32xf32>
    %133 = vector.shape_cast %132 : vector<2x4x4x32xf32> to vector<32x32xf32>
    %134 = vector.extract_strided_slice %125 {offsets = [0, 1, 1, 0], sizes = [2, 4, 4, 32], strides = [1, 1, 1, 1]} : vector<2x6x8x32xf32> to vector<2x4x4x32xf32>
    %135 = vector.shape_cast %134 : vector<2x4x4x32xf32> to vector<32x32xf32>
    %136 = vector.extract_strided_slice %125 {offsets = [0, 1, 2, 0], sizes = [2, 4, 4, 32], strides = [1, 1, 1, 1]} : vector<2x6x8x32xf32> to vector<2x4x4x32xf32>
    %137 = vector.shape_cast %136 : vector<2x4x4x32xf32> to vector<32x32xf32>
    %138 = vector.extract_strided_slice %125 {offsets = [0, 2, 0, 0], sizes = [2, 4, 4, 32], strides = [1, 1, 1, 1]} : vector<2x6x8x32xf32> to vector<2x4x4x32xf32>
    %139 = vector.shape_cast %138 : vector<2x4x4x32xf32> to vector<32x32xf32>
    %140 = vector.extract_strided_slice %125 {offsets = [0, 2, 1, 0], sizes = [2, 4, 4, 32], strides = [1, 1, 1, 1]} : vector<2x6x8x32xf32> to vector<2x4x4x32xf32>
    %141 = vector.shape_cast %140 : vector<2x4x4x32xf32> to vector<32x32xf32>
    %142 = vector.extract_strided_slice %125 {offsets = [0, 2, 2, 0], sizes = [2, 4, 4, 32], strides = [1, 1, 1, 1]} : vector<2x6x8x32xf32> to vector<2x4x4x32xf32>
    %143 = vector.shape_cast %142 : vector<2x4x4x32xf32> to vector<32x32xf32>
    %144 = tpu.concatenate %127, %129, %131, %133, %135, %137, %139, %141, %143 in 1 : vector<32x32xf32>, vector<32x32xf32>, vector<32x32xf32>, vector<32x32xf32>, vector<32x32xf32>, vector<32x32xf32>, vector<32x32xf32>, vector<32x32xf32>, vector<32x32xf32> -> vector<32x288xf32>
    %c224 = arith.constant 224 : index
    %c0_74 = arith.constant 0 : index
    %145 = vector.load %arg1[%c224, %c0_74] : memref<584x96xf32, #tpu.memory_space<vmem>>, vector<288x32xf32>
    %cst_75 = arith.constant dense<0.000000e+00> : vector<32x32xf32>
    %146 = tpu.matmul %144, %145, %cst_75 {dimension_numbers = #tpu.dot_dimension_numbers<[1], [0], [0], [1], [0, 0, 1, 1], [], []>} : vector<32x288xf32>, vector<288x32xf32>, vector<32x32xf32> -> vector<32x32xf32>
    %cst_76 = arith.constant 0.000000e+00 : f32
    %147 = vector.broadcast %cst_76 : f32 to vector<32x32xf32>
    %148 = arith.maximumf %146, %147 : vector<32x32xf32>
    %149 = vector.shape_cast %148 : vector<32x32xf32> to vector<2x4x4x32xf32>
    %150 = vector.shape_cast %121 : vector<2x4x4x32xf32> to vector<32x32xf32>
    %c512 = arith.constant 512 : index
    %c0_77 = arith.constant 0 : index
    %151 = vector.load %arg1[%c512, %c0_77] : memref<584x96xf32, #tpu.memory_space<vmem>>, vector<32x32xf32>
    %cst_78 = arith.constant dense<0.000000e+00> : vector<32x32xf32>
    %152 = tpu.matmul %150, %151, %cst_78 {dimension_numbers = #tpu.dot_dimension_numbers<[1], [0], [0], [1], [0, 0, 1, 1], [], []>} : vector<32x32xf32>, vector<32x32xf32>, vector<32x32xf32> -> vector<32x32xf32>
    %cst_79 = arith.constant 0.000000e+00 : f32
    %153 = vector.broadcast %cst_79 : f32 to vector<32x32xf32>
    %154 = arith.maximumf %152, %153 : vector<32x32xf32>
    %155 = vector.shape_cast %154 : vector<32x32xf32> to vector<2x4x4x32xf32>
    %156 = arith.addf %149, %155 : vector<2x4x4x32xf32>
    %c0_80 = arith.constant 0 : index
    %c1_81 = arith.constant 1 : index
    %c1_82 = arith.constant 1 : index
    %c0_83 = arith.constant 0 : index
    %157 = vector.load %arg7[%c0_80, %c1_81, %c1_82, %c0_83] : memref<2x6x8x32xf32, #tpu.memory_space<vmem>>, vector<2x4x4x32xf32>
    tpu.vector_store %arg7[%c0_80, %c1_81, %c1_82, %c0_83], %156 {strides = array<i32>} : memref<2x6x8x32xf32, #tpu.memory_space<vmem>>, vector<2x4x4x32xf32>,
    %c0_84 = arith.constant 0 : index
    %c0_85 = arith.constant 0 : index
    %c0_86 = arith.constant 0 : index
    %c0_87 = arith.constant 0 : index
    %158 = vector.load %arg7[%c0_84, %c0_85, %c0_86, %c0_87] : memref<2x6x8x32xf32, #tpu.memory_space<vmem>>, vector<2x6x8x32xf32>
    %159 = vector.extract_strided_slice %158 {offsets = [0, 0, 0, 0], sizes = [2, 4, 4, 32], strides = [1, 1, 1, 1]} : vector<2x6x8x32xf32> to vector<2x4x4x32xf32>
    %160 = vector.extract_strided_slice %158 {offsets = [0, 0, 1, 0], sizes = [2, 4, 4, 32], strides = [1, 1, 1, 1]} : vector<2x6x8x32xf32> to vector<2x4x4x32xf32>
    %161 = arith.maximumf %159, %160 : vector<2x4x4x32xf32>
    %162 = vector.extract_strided_slice %158 {offsets = [0, 0, 2, 0], sizes = [2, 4, 4, 32], strides = [1, 1, 1, 1]} : vector<2x6x8x32xf32> to vector<2x4x4x32xf32>
    %163 = arith.maximumf %161, %162 : vector<2x4x4x32xf32>
    %164 = vector.extract_strided_slice %158 {offsets = [0, 1, 0, 0], sizes = [2, 4, 4, 32], strides = [1, 1, 1, 1]} : vector<2x6x8x32xf32> to vector<2x4x4x32xf32>
    %165 = arith.maximumf %163, %164 : vector<2x4x4x32xf32>
    %166 = vector.extract_strided_slice %158 {offsets = [0, 1, 1, 0], sizes = [2, 4, 4, 32], strides = [1, 1, 1, 1]} : vector<2x6x8x32xf32> to vector<2x4x4x32xf32>
    %167 = arith.maximumf %165, %166 : vector<2x4x4x32xf32>
    %168 = vector.extract_strided_slice %158 {offsets = [0, 1, 2, 0], sizes = [2, 4, 4, 32], strides = [1, 1, 1, 1]} : vector<2x6x8x32xf32> to vector<2x4x4x32xf32>
    %169 = arith.maximumf %167, %168 : vector<2x4x4x32xf32>
    %170 = vector.extract_strided_slice %158 {offsets = [0, 2, 0, 0], sizes = [2, 4, 4, 32], strides = [1, 1, 1, 1]} : vector<2x6x8x32xf32> to vector<2x4x4x32xf32>
    %171 = arith.maximumf %169, %170 : vector<2x4x4x32xf32>
    %172 = vector.extract_strided_slice %158 {offsets = [0, 2, 1, 0], sizes = [2, 4, 4, 32], strides = [1, 1, 1, 1]} : vector<2x6x8x32xf32> to vector<2x4x4x32xf32>
    %173 = arith.maximumf %171, %172 : vector<2x4x4x32xf32>
    %174 = vector.extract_strided_slice %158 {offsets = [0, 2, 2, 0], sizes = [2, 4, 4, 32], strides = [1, 1, 1, 1]} : vector<2x6x8x32xf32> to vector<2x4x4x32xf32>
    %175 = arith.maximumf %173, %174 : vector<2x4x4x32xf32>
    %176 = arith.addf %175, %123 : vector<2x4x4x32xf32>
    %177 = vector.shape_cast %176 : vector<2x4x4x32xf32> to vector<2x16x32xf32>
    %cst_88 = arith.constant dense<0.000000e+00> : vector<2x32xf32>
    %178 = vector.multi_reduction <add>, %177, %cst_88 [1] : vector<2x16x32xf32> to vector<2x32xf32>
    %cst_89 = arith.constant 1.600000e+01 : f32
    %179 = vector.broadcast %cst_89 : f32 to vector<2x32xf32>
    %180 = arith.divf %178, %179 : vector<2x32xf32>
    %c544 = arith.constant 544 : index
    %c0_90 = arith.constant 0 : index
    %181 = vector.load %arg1[%c544, %c0_90] : memref<584x96xf32, #tpu.memory_space<vmem>>, vector<32x10xf32>
    %cst_91 = arith.constant dense<0.000000e+00> : vector<2x10xf32>
    %182 = tpu.matmul %180, %181, %cst_91 {dimension_numbers = #tpu.dot_dimension_numbers<[1], [0], [0], [1], [0, 0, 1, 1], [], []>} : vector<2x32xf32>, vector<32x10xf32>, vector<2x10xf32> -> vector<2x10xf32>
    %c576 = arith.constant 576 : index
    %c0_92 = arith.constant 0 : index
    %183 = vector.load %arg1[%c576, %c0_92] : memref<584x96xf32, #tpu.memory_space<vmem>>, vector<1x10xf32>
    %184 = vector.broadcast %183 : vector<1x10xf32> to vector<2x10xf32>
    %185 = arith.addf %182, %184 : vector<2x10xf32>
    %c0_93 = arith.constant 0 : index
    %c0_94 = arith.constant 0 : index
    %186 = vector.load %arg2[%c0_93, %c0_94] : memref<2x10xf32, #tpu.memory_space<vmem>>, vector<2x10xf32>
    tpu.vector_store %arg2[%c0_93, %c0_94], %185 {strides = array<i32>} : memref<2x10xf32, #tpu.memory_space<vmem>>, vector<2x10xf32>,
    return
  }
}

</mosaic_0001>

<bundles_post_ra>
// kernel: tpu_custom_call.1
= control target key start
LH: loop header
LB: loop body
LE: loop exit
PB: predicated region body
PF: predicated region fallthrough
CT: control target
= control target key end

     0   :  { %vm12_vm0 = vcmask 23552   ;;  %v4465_v0 = vmov 0.0   ;;  %s6678_s0 = inlined_call_operand.vmem [shape: f32[2,8,8,3], index: 0, kind: input, shape index: {}]   ;;  %s6679_s1 = inlined_call_operand.vmem [shape: f32[584,96], index: 1, kind: input, shape index: {}]   ;;  %s6680_s2 = inlined_call_operand.hbm [shape: f32[2,10], index: 2, kind: output, shape index: {}]  }
   0x1   :  { %13 = vst.msk [vmem:[#allocation2] sm:$0xff] %vm12_vm0, %v4465_v0 }
   0x2   :  { %14 = vst.msk [vmem:[#allocation2 + $0x8] sm:$0xff] %vm12_vm0, %v4465_v0 }
   0x3   :  { %7 = vsyncpa [#allocation8], 0  ;;  %15 = vst.msk [vmem:[#allocation2 + $0x10] sm:$0xff] %vm12_vm0, %v4465_v0  ;;  %vm264_vm1 = vcmask 1046528   ;;  %s4466_s9 = smov 3   ;;  %vm313_vm2 = vcmask 1045504  }
   0x4   :  { %16 = vst.msk [vmem:[#allocation2 + $0x18] sm:$0xff] %vm12_vm0, %v4465_v0  ;;  %s4467_s10 = smov 6   ;;  %v159_v9 = vld [vmem:[%s6678_s0] sm:$0xff]  ;;  %v160_v10 = vld [vmem:[%s6678_s0 + $0x8] sm:$0xff]  ;;  %v161_v11 = vld [vmem:[%s6678_s0 + $0x10] sm:$0xff]  ;;  %s4468_s17 = smov 9  }
   0x5   :  { %17 = vst.msk [vmem:[#allocation2 + $0x20] sm:$0xff] %vm12_vm0, %v4465_v0  ;;  %s4469_s18 = smov 18   ;;  %s4470_s19 = smov 21   ;;  %v162_v27 = vld [vmem:[%s6678_s0 + $0x18] sm:$0xff]  ;;  %v163_v37 = vld [vmem:[%s6678_s0 + $0x20] sm:$0xff]  ;;  %v164_v45 = vld [vmem:[%s6678_s0 + $0x28] sm:$0xff] }
   0x6   :  { %18 = vst.msk [vmem:[#allocation2 + $0x28] sm:$0xff] %vm12_vm0, %v4465_v0  ;;  %s4471_s20 = smov 12   ;;  %s4472_s21 = smov 15   ;;  %v165_v54 = vld [vmem:[%s6678_s0 + $0x30] sm:$0xff]  ;;  %vm94_vm3 = vcmask 261120   ;;  %vm966_vm4 = vcmask 1042432  }
   0x7   :  { %19 = vst.msk [vmem:[#allocation2 + $0x30] sm:$0xff] %vm12_vm0, %v4465_v0  ;;  %s4473_s24 = smov 24   ;;  %vm794_vm5 = vcmask 48128   ;;  %vm811_vm6 = vcmask 72704   ;;  %vm828_vm7 = vcmask 97280   ;;  %vm845_vm8 = vcmask 121856  }
   0x8   :  { %v4513_v1 = vld [vmem:[#allocation2] sm:$0xff]  ;;  %20 = vst.msk [vmem:[#allocation2 + $0x38] sm:$0xff] %vm12_vm0, %v4465_v0  ;;  %vm862_vm9 = vcmask 146432   ;;  %vm879_vm10 = vcmask 171008   ;;  %vm896_vm11 = vcmask 195584   ;;  %vm917_vm12 = vcmask 220160  }
   0x9   :  { %v193_v2 = vld [vmem:[#allocation2 + $0x8] sm:$0xff]  ;;  %v265_v3 = vrot.slane %v4513_v1, 1  ;;  %21 = vst.msk [vmem:[#allocation2 + $0x40] sm:$0xff] %vm12_vm0, %v4465_v0  ;;  %v314_v6 = vrot.slane %v4513_v1, 2  ;;  %vm53_vm13 = vcmask 130048   ;;  %vm1767_vm14 = vcmask 392192  }
   0xa   :  { %v266_v4 = vrot.slane %v193_v2, 1  ;;  %22 = vst.msk [vmem:[#allocation2 + $0x48] sm:$0xff] %vm12_vm0, %v4465_v0  ;;  %v315_v7 = vrot.slane %v193_v2, 2  ;;  %v916_v2 = vld [vmem:[%s6679_s1 + $0x18] sm:$0x7]  ;;  %vm1784_vm15 = vcmask 523264  }
   0xb   :  { %23 = vst.msk [vmem:[#allocation2 + $0x50] sm:$0xff] %vm12_vm0, %v4465_v0  ;;  %3967 = vmatpush.msk.msra.mxu0 %vm966_vm4, %v916_v2  ;;  %s4483_s16 = smov [#allocation7]   ;;  %s3958_s26 = sshll.u32 %s6680_s2, 4  ;;  %s3959_s26 = int_to_ptr.hbm [resolvable:$true] %s3958_s26 }
   0xc   :  { %v267_v5 = vsel %vm264_vm1, %v265_v3, %v266_v4  ;;  %24 = vst.msk [vmem:[#allocation2 + $0x58] sm:$0xff] %vm12_vm0, %v4465_v0  ;;  %v316_v8 = vsel %vm313_vm2, %v314_v6, %v315_v7  ;;  %v915_v3 = vld [vmem:[%s6679_s1 + $0x10] sm:$0xff]  ;;  %v913_v7 = vld [vmem:[%s6679_s1] sm:$0xff]  ;;  %s3956_s22 = sshll.u32 %s4483_s16, 4  ;;  %s3957_s22 = int_to_ptr.vmem [resolvable:$true] %s3956_s22 }
   0xd   :  { %394 = vrot.lane.b32.xlu0 %v267_v5, %s4466_s9  ;;  %25 = vst.msk [vmem:[#allocation2 + $0x60] sm:$0xff] %vm12_vm0, %v4465_v0  ;;  %983 = vmatpush.msra.mxu0 %v915_v3  ;;  %v914_v5 = vld [vmem:[%s6679_s1 + $0x8] sm:$0xff] }
   0xe   :  { %26 = vst.msk [vmem:[#allocation2 + $0x68] sm:$0xff] %vm12_vm0, %v4465_v0 }
   0xf   :  { %27 = vst.msk [vmem:[#allocation2 + $0x70] sm:$0xff] %vm12_vm0, %v4465_v0  ;;  %984 = vmatpush.msra.mxu0 %v914_v5 }
  0x10   :  { %28 = vst.msk [vmem:[#allocation2 + $0x78] sm:$0xff] %vm12_vm0, %v4465_v0 }
  0x11   :  { %29 = vst.msk [vmem:[#allocation2 + $0x80] sm:$0xff] %vm12_vm0, %v4465_v0  ;;  %985 = vmatpush.msra.mxu0 %v913_v7 }
  0x12   :  { %30 = vst.msk [vmem:[#allocation2 + $0x88] sm:$0xff] %vm12_vm0, %v4465_v0 }
  0x13   :  { %31 = vst.msk [vmem:[#allocation2 + $0x90] sm:$0xff] %vm12_vm0, %v4465_v0 }
  0x14   :  { %32 = vst.msk [vmem:[#allocation2 + $0x98] sm:$0xff] %vm12_vm0, %v4465_v0 }
  0x15   :  { %33 = vst.msk [vmem:[#allocation2 + $0xa0] sm:$0xff] %vm12_vm0, %v4465_v0  ;;  %442 = vrot.lane.b32.xlu0 %v316_v8, %s4467_s10 }
  0x16   :  { %34 = vst.msk [vmem:[#allocation2 + $0xa8] sm:$0xff] %vm12_vm0, %v4465_v0 }
  0x17   :  { %35 = vst.msk [vmem:[#allocation2 + $0xb0] sm:$0xff] %vm12_vm0, %v4465_v0 }
  0x18   :  { %36 = vst.msk [vmem:[#allocation2 + $0xb8] sm:$0xff] %vm12_vm0, %v4465_v0 }
  0x19   :  { %37 = vst.msk [vmem:[#allocation2 + $0xc0] sm:$0xff] %vm12_vm0, %v4465_v0 }
  0x1a   :  { %38 = vst.msk [vmem:[#allocation2 + $0xc8] sm:$0xff] %vm12_vm0, %v4465_v0 }
  0x1b   :  { %39 = vst.msk [vmem:[#allocation2 + $0xd0] sm:$0xff] %vm12_vm0, %v4465_v0 }
  0x1c   :  { %40 = vst.msk [vmem:[#allocation2 + $0xd8] sm:$0xff] %vm12_vm0, %v4465_v0 }
  0x1d   :  { %41 = vst.msk [vmem:[#allocation2 + $0xe0] sm:$0xff] %vm12_vm0, %v4465_v0 }
  0x1e   :  { %42 = vst.msk [vmem:[#allocation2 + $0xe8] sm:$0xff] %vm12_vm0, %v4465_v0 }
  0x1f   :  { %43 = vst.msk [vmem:[#allocation2 + $0xf0] sm:$0xff] %vm12_vm0, %v4465_v0 }
  0x20   :  { %44 = vst.msk [vmem:[#allocation2 + $0xf8] sm:$0xff] %vm12_vm0, %v4465_v0 }
  0x21   :  { %45 = vst.msk [vmem:[#allocation2 + $0x100] sm:$0xff] %vm12_vm0, %v4465_v0 }
  0x22   :  { %46 = vst.msk [vmem:[#allocation2 + $0x108] sm:$0xff] %vm12_vm0, %v4465_v0 }
  0x23   :  { %47 = vst.msk [vmem:[#allocation2 + $0x110] sm:$0xff] %vm12_vm0, %v4465_v0 }
  0x24   :  { %48 = vst.msk [vmem:[#allocation2 + $0x118] sm:$0xff] %vm12_vm0, %v4465_v0 }
  0x25   :  { %49 = vst.msk [vmem:[#allocation2 + $0x120] sm:$0xff] %vm12_vm0, %v4465_v0 }
  0x26   :  { %50 = vst.msk [vmem:[#allocation2 + $0x128] sm:$0xff] %vm12_vm0, %v4465_v0 }
  0x27   :  { %51 = vst.msk [vmem:[#allocation2 + $0x130] sm:$0xff] %vm12_vm0, %v4465_v0 }
  0x28   :  { %52 = vst.msk [vmem:[#allocation2 + $0x138] sm:$0xff] %vm12_vm0, %v4465_v0 }
  0x29   :  { %176 = vst.msk [vmem:[#allocation2 + $0x11] sm:$0xff] %vm12_vm0, %v159_v9 }
  0x2a   :  { %177 = vst.msk [vmem:[#allocation2 + $0x21] sm:$0xff] %vm12_vm0, %v160_v10 }
  0x2b   :  { %178 = vst.msk [vmem:[#allocation2 + $0x31] sm:$0xff] %vm12_vm0, %v161_v11  ;;  %v166_v11 = vld [vmem:[%s6678_s0 + $0x38] sm:$0xff] }
  0x2c   :  { %179 = vst.msk [vmem:[#allocation2 + $0x41] sm:$0xff] %vm12_vm0, %v162_v27 }
  0x2d   :  { %180 = vst.msk [vmem:[#allocation2 + $0x51] sm:$0xff] %vm12_vm0, %v163_v37 }
  0x2e   :  { %181 = vst.msk [vmem:[#allocation2 + $0x61] sm:$0xff] %vm12_vm0, %v164_v45 }
  0x2f   :  { %182 = vst.msk [vmem:[#allocation2 + $0x71] sm:$0xff] %vm12_vm0, %v165_v54 }
  0x30   :  { %v4599_v12 = vld [vmem:[#allocation2 + $0x10] sm:$0xff]  ;;  %v195_v13 = vld [vmem:[#allocation2 + $0x18] sm:$0xff]  ;;  %95 = vst.msk [vmem:[#allocation4] sm:$0xff] %vm94_vm3, %v4465_v0 }
  0x31   :  { %490 = vrot.lane.b32.xlu1 %v4599_v12, %s4468_s17  ;;  %v4603_v14 = vld [vmem:[#allocation2 + $0x20] sm:$0xff]  ;;  %v197_v15 = vld [vmem:[#allocation2 + $0x28] sm:$0xff]  ;;  %v268_v16 = vrot.slane %v4599_v12, 1  ;;  %v269_v17 = vrot.slane %v195_v13, 1  ;;  %v317_v21 = vrot.slane %v4599_v12, 2  ;;  %v318_v22 = vrot.slane %v195_v13, 2 }
  0x32   :  { %v271_v18 = vrot.slane %v4603_v14, 1  ;;  %v272_v19 = vrot.slane %v197_v15, 1  ;;  %634 = vrot.lane.b32.xlu2 %v4603_v14, %s4469_s18  ;;  %v320_v25 = vrot.slane %v4603_v14, 2  ;;  %v321_v26 = vrot.slane %v197_v15, 2  ;;  %v199_v29 = vld [vmem:[#allocation2 + $0x38] sm:$0xff]  ;;  %v4626_v30 = vld [vmem:[#allocation2 + $0x30] sm:$0xff] }
  0x33   :  { %v270_v23 = vsel %vm264_vm1, %v268_v16, %v269_v17  ;;  %v319_v24 = vsel %vm313_vm2, %v317_v21, %v318_v22  ;;  %v323_v31 = vrot.slane %v4626_v30, 2  ;;  %v324_v32 = vrot.slane %v199_v29, 2  ;;  %v4647_v38 = vld [vmem:[#allocation2 + $0x40] sm:$0xff]  ;;  %v201_v39 = vld [vmem:[#allocation2 + $0x48] sm:$0xff]  ;;  %100 = vst.msk [vmem:[#allocation4 + $0x28] sm:$0xff] %vm94_vm3, %v4465_v0 }
  0x34   :  { %v273_v20 = vsel %vm264_vm1, %v271_v18, %v272_v19  ;;  %v322_v28 = vsel %vm313_vm2, %v320_v25, %v321_v26  ;;  %v274_v34 = vrot.slane %v4626_v30, 1  ;;  %v275_v35 = vrot.slane %v199_v29, 1  ;;  %v4664_v47 = vld [vmem:[#allocation2 + $0x50] sm:$0xff]  ;;  %v203_v48 = vld [vmem:[#allocation2 + $0x58] sm:$0xff]  ;;  %101 = vst.msk [vmem:[#allocation4 + $0x30] sm:$0xff] %vm94_vm3, %v4465_v0 }
  0x35   :  { %682 = vrot.lane.b32.xlu0 %v273_v20, %s4470_s19  ;;  %v325_v33 = vsel %vm313_vm2, %v323_v31, %v324_v32  ;;  %v277_v40 = vrot.slane %v4647_v38, 1  ;;  %v278_v41 = vrot.slane %v201_v39, 1  ;;  %v326_v42 = vrot.slane %v4647_v38, 2  ;;  %v205_v56 = vld [vmem:[#allocation2 + $0x68] sm:$0xff]  ;;  %v4686_v57 = vld [vmem:[#allocation2 + $0x60] sm:$0xff]  ;;  %106 = vst.msk [vmem:[#allocation4 + $0x58] sm:$0xff] %vm94_vm3, %v4465_v0 }
  0x36   :  { %v276_v36 = vsel %vm264_vm1, %v274_v34, %v275_v35  ;;  %v327_v43 = vrot.slane %v201_v39, 2  ;;  %v280_v49 = vrot.slane %v4664_v47, 1  ;;  %v281_v50 = vrot.slane %v203_v48, 1  ;;  %96 = vst.msk [vmem:[#allocation4 + $0x8] sm:$0xff] %vm94_vm3, %v4465_v0  ;;  %v4754_v13 = vld [vmem:[#allocation2 + $0x70] sm:$0xff]  ;;  %v207_v17 = vld [vmem:[#allocation2 + $0x78] sm:$0xff] }
  0x37   :  { %v279_v44 = vsel %vm264_vm1, %v277_v40, %v278_v41  ;;  %v329_v52 = vrot.slane %v4664_v47, 2  ;;  %v330_v53 = vrot.slane %v203_v48, 2  ;;  %v332_v58 = vrot.slane %v4686_v57, 2  ;;  %97 = vst.msk [vmem:[#allocation4 + $0x10] sm:$0xff] %vm94_vm3, %v4465_v0  ;;  %v4733_v9 = vld [vmem:[#allocation4] sm:$0xff] }
  0x38   :  { %v328_v46 = vsel %vm313_vm2, %v326_v42, %v327_v43  ;;  %v282_v51 = vsel %vm264_vm1, %v280_v49, %v281_v50  ;;  %v333_v59 = vrot.slane %v205_v56, 2  ;;  %v283_v62 = vrot.slane %v4686_v57, 1  ;;  %98 = vst.msk [vmem:[#allocation4 + $0x18] sm:$0xff] %vm94_vm3, %v4465_v0 }
  0x39   :  { %538 = vrot.lane.b32.xlu1 %v270_v23, %s4471_s20  ;;  %v331_v55 = vsel %vm313_vm2, %v329_v52, %v330_v53  ;;  %v284_v63 = vrot.slane %v205_v56, 1  ;;  %99 = vst.msk [vmem:[#allocation4 + $0x20] sm:$0xff] %vm94_vm3, %v4465_v0  ;;  %v286_v18 = vrot.slane %v4754_v13, 1  ;;  %v287_v19 = vrot.slane %v207_v17, 1  ;;  %v168_v56 = vld [vmem:[%s6678_s0 + $0x48] sm:$0xff] }
  0x3a   :  { %586 = vrot.lane.b32.xlu2 %v319_v24, %s4472_s21  ;;  %v4692_v60 = vsel %vm313_vm2, %v332_v58, %v333_v59  ;;  %3169 = vst [vmem:[#allocation1] ss:$2 sm:$0xff] %v4733_v9 }
  0x3b   :  { %v285_v4 = vsel %vm264_vm1, %v283_v62, %v284_v63  ;;  %v4738_v10 = vld [vmem:[#allocation4 + $0x30] sm:$0xff]  ;;  %102 = vst.msk [vmem:[#allocation4 + $0x38] sm:$0xff] %vm94_vm3, %v4465_v0  ;;  %v288_v25 = vsel %vm264_vm1, %v286_v18, %v287_v19  ;;  %v211_v62 = vld [vmem:[#allocation2 + $0x98] sm:$0xff] }
  0x3c   :  { %103 = vst.msk [vmem:[#allocation4 + $0x40] sm:$0xff] %vm94_vm3, %v4465_v0  ;;  %v389_v7 = vrot.slane %v211_v62, 2 }
  0x3d   :  { %444 = vrot.lane.b32.xlu0 %v319_v24, %s4467_s10  ;;  %3177 = vst [vmem:[#allocation1 + $0x20] ss:$2 sm:$0xff] %v4738_v10  ;;  %v336_v24 = vrot.slane %v207_v17, 2  ;;  %v383_v17 = vrot.slane %v211_v62, 1 }
  0x3e   :  { %104 = vst.msk [vmem:[#allocation4 + $0x48] sm:$0xff] %vm94_vm3, %v4465_v0 }
  0x3f   :  { %105 = vst.msk [vmem:[#allocation4 + $0x50] sm:$0xff] %vm94_vm3, %v4465_v0 }
  0x40   :  { %183 = vst.msk [vmem:[#allocation2 + $0x81] sm:$0xff] %vm12_vm0, %v166_v11 }
  0x41   :  { %730 = vrot.lane.b32.xlu1 %v322_v28, %s4473_s24  ;;  %185 = vst.msk [vmem:[#allocation2 + $0xc1] sm:$0xff] %vm12_vm0, %v168_v56 }
  0x42   :  { %396 = vrot.lane.b32.xlu2 %v270_v23, %s4466_s9  ;;  %v335_v23 = vrot.slane %v4754_v13, 2  ;;  %54 = vst.msk [vmem:[#allocation3] sm:$0xff] %vm53_vm13, %v4465_v0 }
  0x43   :  { %55 = vst.msk [vmem:[#allocation3 + $0x8] sm:$0xff] %vm53_vm13, %v4465_v0 }
  0x44   :  { %v337_v29 = vsel %vm313_vm2, %v335_v23, %v336_v24  ;;  %56 = vst.msk [vmem:[#allocation3 + $0x10] sm:$0xff] %vm53_vm13, %v4465_v0 }
  0x45   :  { %588 = vrot.lane.b32.xlu0 %v322_v28, %s4472_s21  ;;  %57 = vst.msk [vmem:[#allocation3 + $0x18] sm:$0xff] %vm53_vm13, %v4465_v0 }
  0x46   :  { %58 = vst.msk [vmem:[#allocation3 + $0x20] sm:$0xff] %vm53_vm13, %v4465_v0 }
  0x47   :  { %v208_v31 = vld [vmem:[#allocation2 + $0x80] sm:$0xff]  ;;  %v209_v32 = vld [vmem:[#allocation2 + $0x88] sm:$0xff]  ;;  %59 = vst.msk [vmem:[#allocation3 + $0x28] sm:$0xff] %vm53_vm13, %v4465_v0 }
  0x48   :  { %v367_v37 = vrot.slane %v209_v32, 1  ;;  %v373_v52 = vrot.slane %v209_v32, 2  ;;  %v169_v32 = vld [vmem:[%s6678_s0 + $0x50] sm:$0xff]  ;;  %60 = vst.msk [vmem:[#allocation3 + $0x30] sm:$0xff] %vm53_vm13, %v4465_v0 }
  0x49   :  { %492 = vrot.lane.b32.xlu1 %v4603_v14, %s4468_s17  ;;  %186 = vst.msk [vmem:[#allocation2 + $0xd1] sm:$0xff] %vm12_vm0, %v169_v32 }
  0x4a   :  { %540 = vrot.lane.b32.xlu2 %v273_v20, %s4471_s20  ;;  %61 = vst.msk [vmem:[#allocation3 + $0x38] sm:$0xff] %vm53_vm13, %v4465_v0 }
  0x4b   :  { %62 = vst.msk [vmem:[#allocation3 + $0x40] sm:$0xff] %vm53_vm13, %v4465_v0 }
  0x4c   :  { %63 = vst.msk [vmem:[#allocation3 + $0x48] sm:$0xff] %vm53_vm13, %v4465_v0 }
  0x4d   :  { %732 = vrot.lane.b32.xlu0 %v325_v33, %s4473_s24  ;;  %64 = vst.msk [vmem:[#allocation3 + $0x50] sm:$0xff] %vm53_vm13, %v4465_v0 }
  0x4e   :  { %65 = vst.msk [vmem:[#allocation3 + $0x58] sm:$0xff] %vm53_vm13, %v4465_v0 }
  0x4f   :  { %66 = vst.msk [vmem:[#allocation3 + $0x60] sm:$0xff] %vm53_vm13, %v4465_v0 }
  0x50   :  { %67 = vst.msk [vmem:[#allocation3 + $0x68] sm:$0xff] %vm53_vm13, %v4465_v0 }
  0x51   :  { %636 = vrot.lane.b32.xlu1 %v4626_v30, %s4469_s18  ;;  %68 = vst.msk [vmem:[#allocation3 + $0x70] sm:$0xff] %vm53_vm13, %v4465_v0 }
  0x52   :  { %684 = vrot.lane.b32.xlu2 %v276_v36, %s4470_s19  ;;  %69 = vst.msk [vmem:[#allocation3 + $0x78] sm:$0xff] %vm53_vm13, %v4465_v0 }
  0x53   :  { %70 = vst.msk [vmem:[#allocation3 + $0x80] sm:$0xff] %vm53_vm13, %v4465_v0 }
  0x54   :  { %71 = vst.msk [vmem:[#allocation3 + $0x88] sm:$0xff] %vm53_vm13, %v4465_v0 }
  0x55   :  { %494 = vrot.lane.b32.xlu0 %v4626_v30, %s4468_s17  ;;  %72 = vst.msk [vmem:[#allocation3 + $0x90] sm:$0xff] %vm53_vm13, %v4465_v0 }
  0x56   :  { %73 = vst.msk [vmem:[#allocation3 + $0x98] sm:$0xff] %vm53_vm13, %v4465_v0 }
  0x57   :  { %74 = vst.msk [vmem:[#allocation3 + $0xa0] sm:$0xff] %vm53_vm13, %v4465_v0 }
  0x58   :  { %75 = vst.msk [vmem:[#allocation3 + $0xa8] sm:$0xff] %vm53_vm13, %v4465_v0 }
  0x59   :  { %398 = vrot.lane.b32.xlu1 %v273_v20, %s4466_s9  ;;  %76 = vst.msk [vmem:[#allocation3 + $0xb0] sm:$0xff] %vm53_vm13, %v4465_v0 }
  0x5a   :  { %446 = vrot.lane.b32.xlu2 %v322_v28, %s4467_s10  ;;  %77 = vst.msk [vmem:[#allocation3 + $0xb8] sm:$0xff] %vm53_vm13, %v4465_v0 }
  0x5b   :  { %78 = vst.msk [vmem:[#allocation3 + $0xc0] sm:$0xff] %vm53_vm13, %v4465_v0 }
  0x5c   :  { %79 = vst.msk [vmem:[#allocation3 + $0xc8] sm:$0xff] %vm53_vm13, %v4465_v0 }
  0x5d   :  { %638 = vrot.lane.b32.xlu0 %v4647_v38, %s4469_s18  ;;  %80 = vst.msk [vmem:[#allocation3 + $0xd0] sm:$0xff] %vm53_vm13, %v4465_v0 }
  0x5e   :  { %81 = vst.msk [vmem:[#allocation3 + $0xd8] sm:$0xff] %vm53_vm13, %v4465_v0 }
  0x5f   :  { %82 = vst.msk [vmem:[#allocation3 + $0xe0] sm:$0xff] %vm53_vm13, %v4465_v0 }
  0x60   :  { %83 = vst.msk [vmem:[#allocation3 + $0xe8] sm:$0xff] %vm53_vm13, %v4465_v0 }
  0x61   :  { %542 = vrot.lane.b32.xlu1 %v276_v36, %s4471_s20  ;;  %84 = vst.msk [vmem:[#allocation3 + $0xf0] sm:$0xff] %vm53_vm13, %v4465_v0 }
  0x62   :  { %590 = vrot.lane.b32.xlu2 %v325_v33, %s4472_s21  ;;  %85 = vst.msk [vmem:[#allocation3 + $0xf8] sm:$0xff] %vm53_vm13, %v4465_v0 }
  0x63   :  { %86 = vst.msk [vmem:[#allocation3 + $0x100] sm:$0xff] %vm53_vm13, %v4465_v0 }
  0x64   :  { %87 = vst.msk [vmem:[#allocation3 + $0x108] sm:$0xff] %vm53_vm13, %v4465_v0 }
  0x65   :  { %400 = vrot.lane.b32.xlu0 %v276_v36, %s4466_s9  ;;  %v366_v36 = vrot.slane %v208_v31, 1  ;;  %88 = vst.msk [vmem:[#allocation3 + $0x110] sm:$0xff] %vm53_vm13, %v4465_v0 }
  0x66   :  { %89 = vst.msk [vmem:[#allocation3 + $0x118] sm:$0xff] %vm53_vm13, %v4465_v0 }
  0x67   :  { %v368_v42 = vsel %vm264_vm1, %v366_v36, %v367_v37  ;;  %90 = vst.msk [vmem:[#allocation3 + $0x120] sm:$0xff] %vm53_vm13, %v4465_v0 }
  0x68   :  { %91 = vst.msk [vmem:[#allocation3 + $0x128] sm:$0xff] %vm53_vm13, %v4465_v0 }
  0x69   :  { %686 = vrot.lane.b32.xlu1 %v279_v44, %s4470_s19  ;;  %92 = vst.msk [vmem:[#allocation3 + $0x130] sm:$0xff] %vm53_vm13, %v4465_v0 }
  0x6a   :  { %734 = vrot.lane.b32.xlu2 %v328_v46, %s4473_s24  ;;  %93 = vst.msk [vmem:[#allocation3 + $0x138] sm:$0xff] %vm53_vm13, %v4465_v0 }
  0x6d   :  { %544 = vrot.lane.b32.xlu0 %v279_v44, %s4471_s20 }
  0x71   :  { %448 = vrot.lane.b32.xlu1 %v325_v33, %s4467_s10 }
  0x72   :  { %496 = vrot.lane.b32.xlu2 %v4647_v38, %s4468_s17 }
  0x75   :  { %688 = vrot.lane.b32.xlu0 %v282_v51, %s4470_s19 }
  0x79   :  { %592 = vrot.lane.b32.xlu1 %v328_v46, %s4472_s21 }
  0x7a   :  { %640 = vrot.lane.b32.xlu2 %v4664_v47, %s4469_s18 }
  0x7d   :  { %450 = vrot.lane.b32.xlu0 %v328_v46, %s4467_s10  ;;  %v167_v46 = vld [vmem:[%s6678_s0 + $0x40] sm:$0xff] }
  0x7e   :  { %184 = vst.msk [vmem:[#allocation2 + $0xb1] sm:$0xff] %vm12_vm0, %v167_v46 }
  0x7f   :  { %v395_v6 = vpop.permute.xlu0 %394 }
  0x80   :  { %v778_v22 = vsel %vm12_vm0, %v4513_v1, %v395_v6 }
  0x81   :  { %736 = vrot.lane.b32.xlu1 %v331_v55, %s4473_s24 }
  0x82   :  { %402 = vrot.lane.b32.xlu2 %v279_v44, %s4466_s9 }
  0x85   :  { %594 = vrot.lane.b32.xlu0 %v331_v55, %s4472_s21 }
  0x87   :  { %v443_v16 = vpop.permute.xlu0 %442 }
  0x88   :  { %v795_v26 = vsel %vm794_vm5, %v778_v22, %v443_v16 }
  0x89   :  { %498 = vrot.lane.b32.xlu1 %v4664_v47, %s4468_s17 }
  0x8a   :  { %546 = vrot.lane.b32.xlu2 %v282_v51, %s4471_s20 }
  0x8c   :  { %v4695_v61 = vpop.permute.xlu2 %634 }
  0x8d   :  { %738 = vrot.lane.b32.xlu0 %v4692_v60, %s4473_s24 }
  0x91   :  { %642 = vrot.lane.b32.xlu1 %v4686_v57, %s4469_s18 }
  0x92   :  { %690 = vrot.lane.b32.xlu2 %v285_v4, %s4470_s19 }
  0x94   :  { %v587_v8 = vpop.permute.xlu2 %586 }
  0x95   :  { %500 = vrot.lane.b32.xlu0 %v4686_v57, %s4468_s17 }
  0x99   :  { %404 = vrot.lane.b32.xlu1 %v282_v51, %s4466_s9  ;;  %v372_v51 = vrot.slane %v208_v31, 2 }
  0x9a   :  { %452 = vrot.lane.b32.xlu2 %v331_v55, %s4467_s10 }
  0x9c   :  { %v397_v15 = vpop.permute.xlu2 %396 }
  0x9d   :  { %644 = vrot.lane.b32.xlu0 %v4754_v13, %s4469_s18  ;;  %v779_v48 = vsel %vm12_vm0, %v4599_v12, %v397_v15  ;;  %v374_v12 = vsel %vm313_vm2, %v372_v51, %v373_v52  ;;  %v217_v52 = vld [vmem:[#allocation2 + $0xc8] sm:$0xff] }
  0x9e   :  { %v296_v56 = vrot.slane %v217_v52, 1 }
  0xa1   :  { %548 = vrot.lane.b32.xlu1 %v285_v4, %s4471_s20 }
  0xa2   :  { %596 = vrot.lane.b32.xlu2 %v4692_v60, %s4472_s21 }
  0xa3   :  { %v491_v20 = vpop.permute.xlu1 %490 }
  0xa4   :  { %v541_v21 = vpop.permute.xlu2 %540  ;;  %v812_v28 = vsel %vm811_vm6, %v795_v26, %v491_v20  ;;  %v4818_v20 = vld [vmem:[#allocation2 + $0xa0] sm:$0xff] }
  0xa5   :  { %406 = vrot.lane.b32.xlu0 %v285_v4, %s4466_s9  ;;  %v210_v4 = vld [vmem:[#allocation2 + $0x90] sm:$0xff]  ;;  %v289_v26 = vrot.slane %v4818_v20, 1 }
  0xa6   :  { %v388_v6 = vrot.slane %v210_v4, 2  ;;  %v382_v16 = vrot.slane %v210_v4, 1 }
  0xa7   :  { %v683_v27 = vpop.permute.xlu0 %682 }
  0xa8   :  { %v390_v11 = vsel %vm313_vm2, %v388_v6, %v389_v7  ;;  %v384_v23 = vsel %vm264_vm1, %v382_v16, %v383_v17  ;;  %v4871_v7 = vld [vmem:[#allocation2 + $0xd0] sm:$0xff] }
  0xa9   :  { %692 = vrot.lane.b32.xlu1 %v288_v25, %s4470_s19  ;;  %v298_v16 = vrot.slane %v4871_v7, 1 }
  0xaa   :  { %740 = vrot.lane.b32.xlu2 %v337_v29, %s4473_s24 }
  0xab   :  { %v539_v1 = vpop.permute.xlu1 %538 }
  0xac   :  { %v829_v33 = vsel %vm828_vm7, %v812_v28, %v539_v1  ;;  %v685_v34 = vpop.permute.xlu2 %684  ;;  %v4827_v1 = vld [vmem:[#allocation2 + $0xb0] sm:$0xff] }
  0xad   :  { %v846_v35 = vsel %vm845_vm8, %v829_v33, %v587_v8  ;;  %550 = vrot.lane.b32.xlu0 %v288_v25, %s4471_s20 }
  0xae   :  { %v863_v40 = vsel %vm862_vm9, %v846_v35, %v4695_v61  ;;  %v215_v35 = vld [vmem:[#allocation2 + $0xb8] sm:$0xff] }
  0xaf   :  { %v445_v39 = vpop.permute.xlu0 %444  ;;  %v880_v41 = vsel %vm879_vm10, %v863_v40, %v683_v27 }
  0xb0   :  { %v796_v50 = vsel %vm794_vm5, %v779_v48, %v445_v39 }
  0xb1   :  { %454 = vrot.lane.b32.xlu1 %v4692_v60, %s4467_s10 }
  0xb2   :  { %502 = vrot.lane.b32.xlu2 %v4754_v13, %s4468_s17 }
  0xb3   :  { %v731_v43 = vpop.permute.xlu1 %730 }
  0xb4   :  { %v897_v44 = vsel %vm896_vm11, %v880_v41, %v731_v43  ;;  %v447_v45 = vpop.permute.xlu2 %446  ;;  %v292_v41 = vrot.slane %v4827_v1, 1 }
  0xb5   :  { %3968 = vmatmul.msk.f32.vlgmr.msra.gmra.mxu0 %vm917_vm12, %v897_v44  ;;  %694 = vrot.lane.b32.xlu0 %v368_v42, %s4470_s19 }
  0xb7   :  { %v589_v49 = vpop.permute.xlu0 %588 }
  0xb9   :  { %598 = vrot.lane.b32.xlu1 %v337_v29, %s4472_s21 }
  0xba   :  { %646 = vrot.lane.b32.xlu2 %v208_v31, %s4469_s18 }
  0xbb   :  { %v493_v53 = vpop.permute.xlu1 %492 }
  0xbc   :  { %v591_v54 = vpop.permute.xlu2 %590  ;;  %v813_v55 = vsel %vm811_vm6, %v796_v50, %v493_v53  ;;  %v342_v50 = vrot.slane %v215_v35, 2 }
  0xbd   :  { %456 = vrot.lane.b32.xlu0 %v337_v29, %s4467_s10  ;;  %v830_v59 = vsel %vm828_vm7, %v813_v55, %v541_v21  ;;  %v213_v21 = vld [vmem:[#allocation2 + $0xa8] sm:$0xff] }
  0xbe   :  { %v847_v60 = vsel %vm845_vm8, %v830_v59, %v589_v49  ;;  %v290_v27 = vrot.slane %v213_v21, 1  ;;  %v339_v29 = vrot.slane %v213_v21, 2  ;;  %v341_v49 = vrot.slane %v4827_v1, 2 }
  0xbf   :  { %v733_v58 = vpop.permute.xlu0 %732 }
  0xc1   :  { %742 = vrot.lane.b32.xlu1 %v374_v12, %s4473_s24 }
  0xc2   :  { %408 = vrot.lane.b32.xlu2 %v288_v25, %s4466_s9 }
  0xc3   :  { %v637_v61 = vpop.permute.xlu1 %636 }
  0xc4   :  { %v864_v63 = vsel %vm862_vm9, %v847_v60, %v637_v61  ;;  %v735_v2 = vpop.permute.xlu2 %734  ;;  %v345_v61 = vrot.slane %v217_v52, 2 }
  0xc5   :  { %v881_v3 = vsel %vm879_vm10, %v864_v63, %v685_v34  ;;  %600 = vrot.lane.b32.xlu0 %v374_v12, %s4472_s21  ;;  %v291_v34 = vsel %vm264_vm1, %v289_v26, %v290_v27 }
  0xc6   :  { %v898_v5 = vsel %vm896_vm11, %v881_v3, %v733_v58  ;;  %v170_v3 = vld [vmem:[%s6678_s0 + $0x58] sm:$0xff] }
  0xc7   :  { %3969 = vmatmul.msk.f32.gmra.mxu0 %vm917_vm12, %v898_v5  ;;  %v495_v8 = vpop.permute.xlu0 %494  ;;  %187 = vst.msk [vmem:[#allocation2 + $0xe1] sm:$0xff] %vm12_vm0, %v170_v3 }
  0xc9   :  { %504 = vrot.lane.b32.xlu1 %v208_v31, %s4468_s17 }
  0xca   :  { %552 = vrot.lane.b32.xlu2 %v368_v42, %s4471_s20  ;;  %v293_v42 = vrot.slane %v215_v35, 1 }
  0xcb   :  { %v399_v15 = vpop.permute.xlu1 %398 }
  0xcc   :  { %v497_v18 = vpop.permute.xlu2 %496  ;;  %v780_v19 = vsel %vm12_vm0, %v4603_v14, %v399_v15  ;;  %v338_v14 = vrot.slane %v4818_v20, 2  ;;  %v294_v51 = vsel %vm264_vm1, %v292_v41, %v293_v42 }
  0xcd   :  { %744 = vrot.lane.b32.xlu0 %v390_v11, %s4473_s24  ;;  %v797_v24 = vsel %vm794_vm5, %v780_v19, %v447_v45  ;;  %v4844_v45 = vld [vmem:[#allocation2 + $0xc0] sm:$0xff] }
  0xce   :  { %v814_v25 = vsel %vm811_vm6, %v797_v24, %v495_v8  ;;  %v340_v37 = vsel %vm313_vm2, %v338_v14, %v339_v29  ;;  %v295_v55 = vrot.slane %v4844_v45, 1  ;;  %v344_v60 = vrot.slane %v4844_v45, 2  ;;  %v219_v8 = vld [vmem:[#allocation2 + $0xd8] sm:$0xff] }
  0xcf   :  { %v639_v22 = vpop.permute.xlu0 %638  ;;  %v299_v17 = vrot.slane %v219_v8, 1  ;;  %v347_v14 = vrot.slane %v4871_v7, 2  ;;  %v348_v29 = vrot.slane %v219_v8, 2 }
  0xd0   :  { %v297_v63 = vsel %vm264_vm1, %v295_v55, %v296_v56 }
  0xd1   :  { %648 = vrot.lane.b32.xlu1 %v210_v4, %s4469_s18 }
  0xd2   :  { %696 = vrot.lane.b32.xlu2 %v384_v23, %s4470_s19 }
  0xd3   :  { %v543_v28 = vpop.permute.xlu1 %542 }
  0xd4   :  { %v641_v31 = vpop.permute.xlu2 %640  ;;  %v831_v33 = vsel %vm828_vm7, %v814_v25, %v543_v28 }
  0xd5   :  { %506 = vrot.lane.b32.xlu0 %v4827_v1, %s4468_s17  ;;  %v848_v39 = vsel %vm845_vm8, %v831_v33, %v591_v54  ;;  %v343_v54 = vsel %vm313_vm2, %v341_v49, %v342_v50 }
  0xd6   :  { %v865_v40 = vsel %vm862_vm9, %v848_v39, %v639_v22  ;;  %v4880_v22 = vsel %vm264_vm1, %v298_v16, %v299_v17 }
  0xd7   :  { %v401_v36 = vpop.permute.xlu0 %400 }
  0xd8   :  { %v781_v12 = vsel %vm12_vm0, %v4626_v30, %v401_v36  ;;  %v346_v30 = vsel %vm313_vm2, %v344_v60, %v345_v61  ;;  %v1052_v60 = vld [vmem:[%s6679_s1 + $0x28] sm:$0xff] }
  0xd9   :  { %410 = vrot.lane.b32.xlu1 %v291_v34, %s4466_s9  ;;  %v349_v34 = vsel %vm313_vm2, %v347_v14, %v348_v29  ;;  %1115 = vmatpush.msra.mxu1 %v1052_v60 }
  0xda   :  { %458 = vrot.lane.b32.xlu2 %v340_v37, %s4467_s10  ;;  %4101 = vmatpush.msra.mxu3 %v1052_v60 }
  0xdb   :  { %v687_v43 = vpop.permute.xlu1 %686 }
  0xdc   :  { %v882_v44 = vsel %vm879_vm10, %v865_v40, %v687_v43  ;;  %v403_v46 = vpop.permute.xlu2 %402  ;;  %v221_v40 = vld [vmem:[#allocation2 + $0xe8] sm:$0xff] }
  0xdd   :  { %v899_v48 = vsel %vm896_vm11, %v882_v44, %v735_v2  ;;  %650 = vrot.lane.b32.xlu0 %v4844_v45, %s4469_s18  ;;  %v782_v26 = vsel %vm12_vm0, %v4647_v38, %v403_v46  ;;  %v171_v38 = vld [vmem:[%s6678_s0 + $0x60] sm:$0xff]  ;;  %v4909_v44 = vld [vmem:[#allocation2 + $0xe0] sm:$0xff]  ;;  %v351_v49 = vrot.slane %v221_v40, 2  ;;  %v302_v55 = vrot.slane %v221_v40, 1 }
  0xde   :  { %3970 = vmatmul.msk.f32.gmra.mxu0 %vm917_vm12, %v899_v48  ;;  %188 = vst.msk [vmem:[#allocation2 + $0xf1] sm:$0xff] %vm12_vm0, %v171_v38  ;;  %v350_v48 = vrot.slane %v4909_v44, 2 }
  0xdf   :  { %v545_v53 = vpop.permute.xlu0 %544 }
  0xe1   :  { %554 = vrot.lane.b32.xlu1 %v294_v51, %s4471_s20 }
  0xe2   :  { %602 = vrot.lane.b32.xlu2 %v343_v54, %s4472_s21 }
  0xe3   :  { %v449_v58 = vpop.permute.xlu1 %448 }
  0xe4   :  { %v547_v59 = vpop.permute.xlu2 %546  ;;  %v798_v62 = vsel %vm794_vm5, %v781_v12, %v449_v58 }
  0xe5   :  { %412 = vrot.lane.b32.xlu0 %v294_v51, %s4466_s9  ;;  %v815_v4 = vsel %vm811_vm6, %v798_v62, %v497_v18  ;;  %v4917_v51 = vsel %vm313_vm2, %v350_v48, %v351_v49  ;;  %v4965_v8 = vld [vmem:[#allocation2 + $0xf0] sm:$0xff]  ;;  %v223_v16 = vld [vmem:[#allocation2 + $0xf8] sm:$0xff]  ;;  %v173_v49 = vld [vmem:[%s6678_s0 + $0x70] sm:$0xff] }
  0xe6   :  { %v832_v5 = vsel %vm828_vm7, %v815_v4, %v545_v53  ;;  %190 = vst.msk [vmem:[#allocation2 + $0x111] sm:$0xff] %vm12_vm0, %v173_v49 }
  0xe7   :  { %v689_v2 = vpop.permute.xlu0 %688 }
  0xe9   :  { %698 = vrot.lane.b32.xlu1 %v297_v63, %s4470_s19 }
  0xea   :  { %746 = vrot.lane.b32.xlu2 %v346_v30, %s4473_s24 }
  0xeb   :  { %v593_v6 = vpop.permute.xlu1 %592 }
  0xec   :  { %v691_v11 = vpop.permute.xlu2 %690  ;;  %v849_v15 = vsel %vm845_vm8, %v832_v5, %v593_v6 }
  0xed   :  { %556 = vrot.lane.b32.xlu0 %v297_v63, %s4471_s20  ;;  %v866_v19 = vsel %vm862_vm9, %v849_v15, %v641_v31 }
  0xee   :  { %v883_v21 = vsel %vm879_vm10, %v866_v19, %v689_v2  ;;  %v305_v19 = vrot.slane %v223_v16, 1 }
  0xef   :  { %v451_v18 = vpop.permute.xlu0 %450 }
  0xf0   :  { %v799_v28 = vsel %vm794_vm5, %v782_v26, %v451_v18  ;;  %v304_v18 = vrot.slane %v4965_v8, 1 }
  0xf1   :  { %460 = vrot.lane.b32.xlu1 %v343_v54, %s4467_s10  ;;  %v301_v54 = vrot.slane %v4909_v44, 1 }
  0xf2   :  { %508 = vrot.lane.b32.xlu2 %v4844_v45, %s4468_s17 }
  0xf3   :  { %v737_v23 = vpop.permute.xlu1 %736 }
  0xf4   :  { %v900_v24 = vsel %vm896_vm11, %v883_v21, %v737_v23  ;;  %v453_v25 = vpop.permute.xlu2 %452 }
  0xf5   :  { %3971 = vmatmul.msk.f32.gmra.mxu0 %vm917_vm12, %v900_v24  ;;  %700 = vrot.lane.b32.xlu0 %v4880_v22, %s4470_s19  ;;  %v353_v24 = vrot.slane %v4965_v8, 2 }
  0xf7   :  { %v595_v27 = vpop.permute.xlu0 %594 }
  0xf9   :  { %604 = vrot.lane.b32.xlu1 %v346_v30, %s4472_s21 }
  0xfa   :  { %652 = vrot.lane.b32.xlu2 %v4871_v7, %s4469_s18 }
  0xfb   :  { %v499_v31 = vpop.permute.xlu1 %498 }
  0xfc   :  { %v597_v32 = vpop.permute.xlu2 %596  ;;  %v816_v33 = vsel %vm811_vm6, %v799_v28, %v499_v31 }
  0xfd   :  { %462 = vrot.lane.b32.xlu0 %v346_v30, %s4467_s10  ;;  %v833_v36 = vsel %vm828_vm7, %v816_v33, %v547_v59  ;;  %v303_v59 = vsel %vm264_vm1, %v301_v54, %v302_v55 }
  0xfe   :  { %v850_v37 = vsel %vm845_vm8, %v833_v36, %v595_v27 }
  0xff   :  { %v739_v35 = vpop.permute.xlu0 %738 }
 0x101   :  { %748 = vrot.lane.b32.xlu1 %v349_v34, %s4473_s24 }
 0x102   :  { %414 = vrot.lane.b32.xlu2 %v297_v63, %s4466_s9 }
 0x103   :  { %v643_v39 = vpop.permute.xlu1 %642 }
 0x104   :  { %v867_v41 = vsel %vm862_vm9, %v850_v37, %v643_v39  ;;  %v741_v42 = vpop.permute.xlu2 %740 }
 0x105   :  { %v884_v43 = vsel %vm879_vm10, %v867_v41, %v691_v11  ;;  %606 = vrot.lane.b32.xlu0 %v349_v34, %s4472_s21 }
 0x106   :  { %v901_v46 = vsel %vm896_vm11, %v884_v43, %v739_v35 }
 0x107   :  { %3972 = vmatmul.msk.f32.gmra.mxu0 %vm917_vm12, %v901_v46  ;;  %v501_v50 = vpop.permute.xlu0 %500 }
 0x109   :  { %510 = vrot.lane.b32.xlu1 %v4871_v7, %s4468_s17 }
 0x10a   :  { %558 = vrot.lane.b32.xlu2 %v4880_v22, %s4471_s20 }
 0x10b   :  { %v405_v52 = vpop.permute.xlu1 %404 }
 0x10c   :  { %v4921_v53 = vpop.permute.xlu2 %502  ;;  %v783_v56 = vsel %vm12_vm0, %v4664_v47, %v405_v52  ;;  %v1051_v47 = vld [vmem:[%s6679_s1 + $0x20] sm:$0xff] }
 0x10d   :  { %750 = vrot.lane.b32.xlu0 %v4917_v51, %s4473_s24  ;;  %v800_v58 = vsel %vm794_vm5, %v783_v56, %v453_v25  ;;  %1116 = vmatpush.msra.mxu1 %v1051_v47  ;;  %v354_v25 = vrot.slane %v223_v16, 2 }
 0x10e   :  { %v817_v61 = vsel %vm811_vm6, %v800_v58, %v501_v50  ;;  %4102 = vmatpush.msra.mxu3 %v1051_v47 }
 0x10f   :  { %v645_v12 = vpop.permute.xlu0 %644  ;;  %v5020_v14 = vsel %vm313_vm2, %v353_v24, %v354_v25 }
 0x111   :  { %654 = vrot.lane.b32.xlu1 %v4909_v44, %s4469_s18 }
 0x112   :  { %702 = vrot.lane.b32.xlu2 %v303_v59, %s4470_s19 }
 0x113   :  { %v549_v62 = vpop.permute.xlu1 %548 }
 0x114   :  { %v4940_v63 = vpop.permute.xlu2 %646  ;;  %v834_v2 = vsel %vm828_vm7, %v817_v61, %v549_v62 }
 0x115   :  { %512 = vrot.lane.b32.xlu0 %v4909_v44, %s4468_s17  ;;  %v851_v4 = vsel %vm845_vm8, %v834_v2, %v597_v32 }
 0x116   :  { %v868_v30 = vsel %vm862_vm9, %v851_v4, %v645_v12 }
 0x117   :  { %v407_v3 = vpop.permute.xlu0 %406 }
 0x118   :  { %v784_v21 = vsel %vm12_vm0, %v4686_v57, %v407_v3  ;;  %v5005_v57 = vsel %vm264_vm1, %v304_v18, %v305_v19  ;;  %v174_v3 = vld [vmem:[%s6678_s0 + $0x78] sm:$0xff] }
 0x119   :  { %416 = vrot.lane.b32.xlu1 %v4880_v22, %s4466_s9  ;;  %191 = vst.msk [vmem:[#allocation2 + $0x121] sm:$0xff] %vm12_vm0, %v174_v3 }
 0x11a   :  { %464 = vrot.lane.b32.xlu2 %v349_v34, %s4467_s10 }
 0x11b   :  { %v693_v5 = vpop.permute.xlu1 %692 }
 0x11c   :  { %v885_v6 = vsel %vm879_vm10, %v868_v30, %v693_v5  ;;  %v4967_v11 = vpop.permute.xlu2 %408 }
 0x11d   :  { %v902_v15 = vsel %vm896_vm11, %v885_v6, %v741_v42  ;;  %656 = vrot.lane.b32.xlu0 %v4965_v8, %s4469_s18  ;;  %v785_v42 = vsel %vm12_vm0, %v4754_v13, %v4967_v11  ;;  %v172_v13 = vld [vmem:[%s6678_s0 + $0x68] sm:$0xff]  ;;  %s4474_s0 = smov 112  }
 0x11e   :  { %3973 = vmatmul.msk.f32.gmra.mxu0 %vm917_vm12, %v902_v15  ;;  %189 = vst.msk [vmem:[#allocation2 + $0x101] sm:$0xff] %vm12_vm0, %v172_v13 }
 0x11f   :  { %v551_v17 = vpop.permute.xlu0 %550 }
 0x121   :  { %560 = vrot.lane.b32.xlu1 %v303_v59, %s4471_s20 }
 0x122   :  { %608 = vrot.lane.b32.xlu2 %v4917_v51, %s4472_s21 }
 0x123   :  { %v455_v22 = vpop.permute.xlu1 %454 }
 0x124   :  { %v4997_v23 = vpop.permute.xlu2 %552  ;;  %v801_v26 = vsel %vm794_vm5, %v784_v21, %v455_v22 }
 0x125   :  { %418 = vrot.lane.b32.xlu0 %v303_v59, %s4466_s9  ;;  %v818_v28 = vsel %vm811_vm6, %v801_v26, %v4921_v53  ;;  %v5094_v56 = vld [vmem:[#allocation2 + $0x100] sm:$0xff]  ;;  %v225_v12 = vld [vmem:[#allocation2 + $0x108] sm:$0xff] }
 0x126   :  { %v835_v29 = vsel %vm828_vm7, %v818_v28, %v551_v17  ;;  %v307_v60 = vrot.slane %v5094_v56, 1  ;;  %v308_v61 = vrot.slane %v225_v12, 1  ;;  %v356_v62 = vrot.slane %v5094_v56, 2 }
 0x127   :  { %v695_v27 = vpop.permute.xlu0 %694  ;;  %v357_v47 = vrot.slane %v225_v12, 2 }
 0x128   :  { %v309_v4 = vsel %vm264_vm1, %v307_v60, %v308_v61 }
 0x129   :  { %704 = vrot.lane.b32.xlu1 %v5005_v57, %s4470_s19  ;;  %v358_v30 = vsel %vm313_vm2, %v356_v62, %v357_v47 }
 0x12a   :  { %752 = vrot.lane.b32.xlu2 %v5020_v14, %s4473_s24 }
 0x12b   :  { %v599_v31 = vpop.permute.xlu1 %598 }
 0x12c   :  { %v697_v32 = vpop.permute.xlu2 %696  ;;  %v852_v33 = vsel %vm845_vm8, %v835_v29, %v599_v31 }
 0x12d   :  { %562 = vrot.lane.b32.xlu0 %v5005_v57, %s4471_s20  ;;  %v869_v34 = vsel %vm862_vm9, %v852_v33, %v4940_v63 }
 0x12e   :  { %v886_v35 = vsel %vm879_vm10, %v869_v34, %v695_v27 }
 0x12f   :  { %v457_v38 = vpop.permute.xlu0 %456 }
 0x130   :  { %v802_v46 = vsel %vm794_vm5, %v785_v42, %v457_v38 }
 0x131   :  { %466 = vrot.lane.b32.xlu1 %v4917_v51, %s4467_s10 }
 0x132   :  { %v987_v36 = vpop.f32.mrf.mxu0  ;;  %514 = vrot.lane.b32.xlu2 %v4965_v8, %s4468_s17 }
 0x133   :  { %v1035_v37 = vmax.f32 %v987_v36, 0.0  ;;  %v743_v39 = vpop.permute.xlu1 %742 }
 0x134   :  { %v903_v40 = vsel %vm896_vm11, %v886_v35, %v743_v39  ;;  %v459_v41 = vpop.permute.xlu2 %458 }
 0x135   :  { %3974 = vmatmul.msk.f32.gmra.mxu0 %vm917_vm12, %v903_v40  ;;  %3984 = vmatmul.msk.f32.vlgmr.msra.gmra.mxu1 %vm53_vm13, %v1035_v37 }
 0x136   :  { %706 = vrot.lane.b32.xlu0 %v309_v4, %s4470_s19 }
 0x137   :  { %v601_v43 = vpop.permute.xlu0 %600 }
 0x139   :  { %610 = vrot.lane.b32.xlu1 %v5020_v14, %s4472_s21 }
 0x13a   :  { %658 = vrot.lane.b32.xlu2 %v5094_v56, %s4469_s18 }
 0x13b   :  { %v505_v48 = vpop.permute.xlu1 %504 }
 0x13c   :  { %v603_v50 = vpop.permute.xlu2 %602  ;;  %v819_v51 = vsel %vm811_vm6, %v802_v46, %v505_v48  ;;  %v229_v46 = vld [vmem:[#allocation2 + $0x128] sm:$0xff] }
 0x13d   :  { %v836_v53 = vsel %vm828_vm7, %v819_v51, %v4997_v23  ;;  %v5123_v23 = vld [vmem:[#allocation2 + $0x110] sm:$0xff]  ;;  %v370_v51 = vrot.slane %v229_v46, 1 }
 0x13e   :  { %v853_v54 = vsel %vm845_vm8, %v836_v53, %v601_v43  ;;  %468 = vrot.lane.b32.xlu0 %v5020_v14, %s4467_s10  ;;  %v359_v28 = vrot.slane %v5123_v23, 2  ;;  %v228_v43 = vld [vmem:[#allocation2 + $0x120] sm:$0xff] }
 0x13f   :  { %v745_v52 = vpop.permute.xlu0 %744 }
 0x141   :  { %754 = vrot.lane.b32.xlu1 %v358_v30, %s4473_s24 }
 0x142   :  { %420 = vrot.lane.b32.xlu2 %v5005_v57, %s4466_s9  ;;  %v310_v57 = vrot.slane %v5123_v23, 1 }
 0x143   :  { %v649_v55 = vpop.permute.xlu1 %648 }
 0x144   :  { %v870_v58 = vsel %vm862_vm9, %v853_v54, %v649_v55  ;;  %v990_v0 = vpop.f32.mrf.mxu0  ;;  %v747_v59 = vpop.permute.xlu2 %746 }
 0x145   :  { %v887_v63 = vsel %vm879_vm10, %v870_v58, %v697_v32  ;;  %v1036_v2 = vmax.f32 %v990_v0, 0.0  ;;  %v375_v0 = vrot.slane %v228_v43, 2 }
 0x146   :  { %v904_v5 = vsel %vm896_vm11, %v887_v63, %v745_v52  ;;  %612 = vrot.lane.b32.xlu0 %v358_v30, %s4472_s21 }
 0x147   :  { %v507_v6 = vpop.permute.xlu0 %506  ;;  %3975 = vmatmul.msk.f32.gmra.mxu0 %vm917_vm12, %v904_v5  ;;  %3985 = vmatmul.msk.f32.gmra.mxu1 %vm53_vm13, %v1036_v2 }
 0x149   :  { %516 = vrot.lane.b32.xlu1 %v5094_v56, %s4468_s17 }
 0x14a   :  { %564 = vrot.lane.b32.xlu2 %v309_v4, %s4471_s20 }
 0x14b   :  { %v411_v11 = vpop.permute.xlu1 %410 }
 0x14c   :  { %v509_v15 = vpop.permute.xlu2 %508  ;;  %v786_v16 = vsel %vm12_vm0, %v4818_v20, %v411_v11  ;;  %v227_v20 = vld [vmem:[#allocation2 + $0x118] sm:$0xff] }
 0x14d   :  { %v803_v18 = vsel %vm794_vm5, %v786_v16, %v459_v41  ;;  %v311_v27 = vrot.slane %v227_v20, 1  ;;  %v360_v14 = vrot.slane %v227_v20, 2  ;;  %v231_v16 = vld [vmem:[#allocation2 + $0x138] sm:$0xff] }
 0x14e   :  { %v820_v19 = vsel %vm811_vm6, %v803_v18, %v507_v6  ;;  %v386_v18 = vrot.slane %v231_v16, 1 }
 0x14f   :  { %v651_v17 = vpop.permute.xlu0 %650  ;;  %v312_v34 = vsel %vm264_vm1, %v310_v57, %v311_v27  ;;  %v361_v35 = vsel %vm313_vm2, %v359_v28, %v360_v14 }
 0x150   :  { %756 = vrot.lane.b32.xlu0 %v361_v35, %s4473_s24 }
 0x151   :  { %660 = vrot.lane.b32.xlu1 %v5123_v23, %s4469_s18 }
 0x152   :  { %708 = vrot.lane.b32.xlu2 %v312_v34, %s4470_s19 }
 0x153   :  { %v555_v21 = vpop.permute.xlu1 %554 }
 0x154   :  { %v653_v22 = vpop.permute.xlu2 %652  ;;  %v837_v24 = vsel %vm828_vm7, %v820_v19, %v555_v21  ;;  %v392_v21 = vrot.slane %v231_v16, 2 }
 0x155   :  { %v854_v26 = vsel %vm845_vm8, %v837_v24, %v603_v50  ;;  %v369_v50 = vrot.slane %v228_v43, 1 }
 0x156   :  { %v871_v29 = vsel %vm862_vm9, %v854_v26, %v651_v17 }
 0x157   :  { %v413_v25 = vpop.permute.xlu0 %412  ;;  %v371_v53 = vsel %vm264_vm1, %v369_v50, %v370_v51 }
 0x158   :  { %v787_v40 = vsel %vm12_vm0, %v4827_v1, %v413_v25  ;;  %518 = vrot.lane.b32.xlu0 %v5123_v23, %s4468_s17 }
 0x159   :  { %422 = vrot.lane.b32.xlu1 %v309_v4, %s4466_s9 }
 0x15a   :  { %470 = vrot.lane.b32.xlu2 %v358_v30, %s4467_s10 }
 0x15b   :  { %v699_v31 = vpop.permute.xlu1 %698  ;;  %v993_v32 = vpop.f32.mrf.mxu0 }
 0x15c   :  { %v888_v33 = vsel %vm879_vm10, %v871_v29, %v699_v31  ;;  %v1037_v38 = vmax.f32 %v993_v32, 0.0  ;;  %v415_v37 = vpop.permute.xlu2 %414 }
 0x15d   :  { %v905_v36 = vsel %vm896_vm11, %v888_v33, %v747_v59  ;;  %v376_v59 = vrot.slane %v229_v46, 2  ;;  %v788_v3 = vsel %vm12_vm0, %v4844_v45, %v415_v37 }
 0x15e   :  { %3976 = vmatmul.msk.f32.gmra.mxu0 %vm917_vm12, %v905_v36  ;;  %3986 = vmatmul.msk.f32.gmra.mxu1 %vm53_vm13, %v1037_v38 }
 0x15f   :  { %v557_v39 = vpop.permute.xlu0 %556  ;;  %v377_v2 = vsel %vm313_vm2, %v375_v0, %v376_v59 }
 0x160   :  { %662 = vrot.lane.b32.xlu0 %v228_v43, %s4469_s18 }
 0x161   :  { %566 = vrot.lane.b32.xlu1 %v312_v34, %s4471_s20 }
 0x162   :  { %614 = vrot.lane.b32.xlu2 %v361_v35, %s4472_s21 }
 0x163   :  { %v461_v41 = vpop.permute.xlu1 %460 }
 0x164   :  { %v804_v42 = vsel %vm794_vm5, %v787_v40, %v461_v41  ;;  %v559_v48 = vpop.permute.xlu2 %558 }
 0x165   :  { %v821_v49 = vsel %vm811_vm6, %v804_v42, %v509_v15  ;;  %v230_v15 = vld [vmem:[#allocation2 + $0x130] sm:$0xff] }
 0x166   :  { %v838_v1 = vsel %vm828_vm7, %v821_v49, %v557_v39  ;;  %v385_v17 = vrot.slane %v230_v15, 1  ;;  %v391_v19 = vrot.slane %v230_v15, 2 }
 0x167   :  { %v701_v13 = vpop.permute.xlu0 %700 }
 0x168   :  { %424 = vrot.lane.b32.xlu0 %v312_v34, %s4466_s9  ;;  %v387_v57 = vsel %vm264_vm1, %v385_v17, %v386_v18  ;;  %v393_v27 = vsel %vm313_vm2, %v391_v19, %v392_v21  ;;  %s4475_s9 = smov 32  }
 0x169   :  { %710 = vrot.lane.b32.xlu1 %v371_v53, %s4470_s19 }
 0x16a   :  { %758 = vrot.lane.b32.xlu2 %v377_v2, %s4473_s24 }
 0x16b   :  { %v605_v52 = vpop.permute.xlu1 %604 }
 0x16c   :  { %v855_v54 = vsel %vm845_vm8, %v838_v1, %v605_v52  ;;  %v703_v61 = vpop.permute.xlu2 %702 }
 0x16d   :  { %v872_v12 = vsel %vm862_vm9, %v855_v54, %v653_v22 }
 0x16e   :  { %v889_v58 = vsel %vm879_vm10, %v872_v12, %v701_v13 }
 0x16f   :  { %v463_v55 = vpop.permute.xlu0 %462 }
 0x170   :  { %v805_v30 = vsel %vm794_vm5, %v788_v3, %v463_v55  ;;  %568 = vrot.lane.b32.xlu0 %v371_v53, %s4471_s20  ;;  %s4480_s20 = smov 96  }
 0x171   :  { %472 = vrot.lane.b32.xlu1 %v361_v35, %s4467_s10  ;;  %s4476_s10 = smov 16  }
 0x172   :  { %v996_v60 = vpop.f32.mrf.mxu0  ;;  %520 = vrot.lane.b32.xlu2 %v228_v43, %s4468_s17  ;;  %s4477_s17 = smov 48  }
 0x173   :  { %v1038_v62 = vmax.f32 %v996_v60, 0.0  ;;  %v749_v47 = vpop.permute.xlu1 %748 }
 0x174   :  { %v906_v63 = vsel %vm896_vm11, %v889_v58, %v749_v47  ;;  %v465_v6 = vpop.permute.xlu2 %464  ;;  %v1200_v47 = vld [vmem:[#allocation3 + $0x8] sm:$0xff] }
 0x175   :  { %3977 = vmatmul.msk.f32.gmra.mxu0 %vm917_vm12, %v906_v63  ;;  %3987 = vmatmul.msk.f32.gmra.mxu1 %vm53_vm13, %v1038_v62 }
 0x177   :  { %v607_v4 = vpop.permute.xlu0 %606 }
 0x178   :  { %712 = vrot.lane.b32.xlu0 %v387_v57, %s4470_s19  ;;  %s4479_s19 = smov 80  }
 0x179   :  { %616 = vrot.lane.b32.xlu1 %v377_v2, %s4472_s21 }
 0x17a   :  { %664 = vrot.lane.b32.xlu2 %v230_v15, %s4469_s18  ;;  %s4478_s18 = smov 64  }
 0x17b   :  { %v511_v5 = vpop.permute.xlu1 %510 }
 0x17c   :  { %v822_v11 = vsel %vm811_vm6, %v805_v30, %v511_v5  ;;  %v609_v31 = vpop.permute.xlu2 %608 }
 0x17d   :  { %v839_v45 = vsel %vm828_vm7, %v822_v11, %v559_v48 }
 0x17e   :  { %v856_v22 = vsel %vm845_vm8, %v839_v45, %v607_v4  ;;  %v1320_v4 = vrot.slane %v1200_v47, 2 }
 0x17f   :  { %v751_v24 = vpop.permute.xlu0 %750 }
 0x181   :  { %760 = vrot.lane.b32.xlu1 %v393_v27, %s4473_s24 }
 0x183   :  { %v655_v20 = vpop.permute.xlu1 %654 }
 0x184   :  { %v873_v25 = vsel %vm862_vm9, %v856_v22, %v655_v20  ;;  %v999_v26 = vpop.f32.mrf.mxu0  ;;  %v753_v34 = vpop.permute.xlu2 %752 }
 0x185   :  { %v890_v28 = vsel %vm879_vm10, %v873_v25, %v703_v61  ;;  %v1039_v14 = vmax.f32 %v999_v26, 0.0 }
 0x186   :  { %v907_v29 = vsel %vm896_vm11, %v890_v28, %v751_v24 }
 0x187   :  { %3978 = vmatmul.msk.f32.gmra.mxu0 %vm917_vm12, %v907_v29  ;;  %3988 = vmatmul.msk.f32.gmra.mxu1 %vm53_vm13, %v1039_v14  ;;  %v513_v33 = vpop.permute.xlu0 %512 }
 0x18b   :  { %v417_v32 = vpop.permute.xlu1 %416 }
 0x18c   :  { %v789_v38 = vsel %vm12_vm0, %v4871_v7, %v417_v32  ;;  %v515_v43 = vpop.permute.xlu2 %514 }
 0x18d   :  { %v806_v35 = vsel %vm794_vm5, %v789_v38, %v465_v6 }
 0x18e   :  { %v823_v36 = vsel %vm811_vm6, %v806_v35, %v513_v33  ;;  %v1272_v33 = vrot.slane %v1200_v47, 1 }
 0x18f   :  { %v657_v40 = vpop.permute.xlu0 %656 }
 0x193   :  { %v561_v37 = vpop.permute.xlu1 %560 }
 0x194   :  { %v840_v39 = vsel %vm828_vm7, %v823_v36, %v561_v37  ;;  %v659_v50 = vpop.permute.xlu2 %658 }
 0x195   :  { %v857_v41 = vsel %vm845_vm8, %v840_v39, %v609_v31 }
 0x196   :  { %v874_v42 = vsel %vm862_vm9, %v857_v41, %v657_v40 }
 0x197   :  { %v419_v51 = vpop.permute.xlu0 %418 }
 0x198   :  { %v790_v52 = vsel %vm12_vm0, %v4909_v44, %v419_v51  ;;  %v5208_v44 = vld [vmem:[#allocation3] sm:$0xff] }
 0x199   :  { %v1319_v3 = vrot.slane %v5208_v44, 2  ;;  %v1271_v31 = vrot.slane %v5208_v44, 1 }
 0x19b   :  { %v705_v46 = vpop.permute.xlu1 %704  ;;  %v1002_v13 = vpop.f32.mrf.mxu0  ;;  %v1321_v17 = vsel %vm313_vm2, %v1319_v3, %v1320_v4  ;;  %v1273_v39 = vsel %vm264_vm1, %v1271_v31, %v1272_v33 }
 0x19c   :  { %v891_v48 = vsel %vm879_vm10, %v874_v42, %v705_v46  ;;  %v1040_v49 = vmax.f32 %v1002_v13, 0.0  ;;  %v421_v53 = vpop.permute.xlu2 %420 }
 0x19d   :  { %v908_v7 = vsel %vm896_vm11, %v891_v48, %v753_v34  ;;  %v791_v24 = vsel %vm12_vm0, %v4965_v8, %v421_v53 }
 0x19e   :  { %3979 = vmatmul.msk.f32.gmra.mxu0 %vm917_vm12, %v908_v7  ;;  %3989 = vmatmul.msk.f32.gmra.mxu1 %vm53_vm13, %v1040_v49 }
 0x19f   :  { %v563_v55 = vpop.permute.xlu0 %562 }
 0x1a3   :  { %v467_v1 = vpop.permute.xlu1 %466 }
 0x1a4   :  { %v807_v54 = vsel %vm794_vm5, %v790_v52, %v467_v1  ;;  %v565_v2 = vpop.permute.xlu2 %564 }
 0x1a5   :  { %v824_v59 = vsel %vm811_vm6, %v807_v54, %v515_v43 }
 0x1a6   :  { %v841_v62 = vsel %vm828_vm7, %v824_v59, %v563_v55 }
 0x1a8   :  { %v707_v5 = vpop.permute.xlu0 %706 }
 0x1ab   :  { %v611_v12 = vpop.permute.xlu1 %610 }
 0x1ac   :  { %v858_v63 = vsel %vm845_vm8, %v841_v62, %v611_v12  ;;  %v709_v26 = vpop.permute.xlu2 %708 }
 0x1ad   :  { %v875_v30 = vsel %vm862_vm9, %v858_v63, %v659_v50 }
 0x1ae   :  { %v892_v11 = vsel %vm879_vm10, %v875_v30, %v707_v5 }
 0x1b0   :  { %v469_v20 = vpop.permute.xlu0 %468 }
 0x1b1   :  { %v808_v57 = vsel %vm794_vm5, %v791_v24, %v469_v20 }
 0x1b2   :  { %v1005_v58 = vpop.f32.mrf.mxu0  ;;  %v1118_v0 = vpop.f32.mrf.mxu1 }
 0x1b3   :  { %v1041_v60 = vmax.f32 %v1005_v58, 0.0  ;;  %v5200_v61 = vmax.f32 %v1118_v0, 0.0  ;;  %v755_v6 = vpop.permute.xlu1 %754 }
 0x1b4   :  { %v909_v15 = vsel %vm896_vm11, %v892_v11, %v755_v6  ;;  %v471_v41 = vpop.permute.xlu2 %470 }
 0x1b5   :  { %1183 = vst.msk [vmem:[#allocation3 + $0x11] sm:$0xff] %vm53_vm13, %v5200_v61  ;;  %2066 = vrot.lane.b32.xlu0 %v5200_v61, %s4474_s0  ;;  %3990 = vmatmul.msk.f32.gmra.mxu1 %vm53_vm13, %v1041_v60 }
 0x1b6   :  { %3980 = vmatmul.msk.f32.gmra.mxu0 %vm917_vm12, %v909_v15 }
 0x1b8   :  { %v613_v34 = vpop.permute.xlu0 %612 }
 0x1bb   :  { %v517_v25 = vpop.permute.xlu1 %516 }
 0x1bc   :  { %v5215_v16 = vld [vmem:[#allocation3 + $0x10] sm:$0xff]  ;;  %v1202_v45 = vld [vmem:[#allocation3 + $0x18] sm:$0xff]  ;;  %v825_v32 = vsel %vm811_vm6, %v808_v57, %v517_v25  ;;  %v615_v54 = vpop.permute.xlu2 %614 }
 0x1bd   :  { %v1322_v18 = vrot.slane %v5215_v16, 2  ;;  %v1323_v19 = vrot.slane %v1202_v45, 2  ;;  %v1274_v8 = vrot.slane %v5215_v16, 1  ;;  %v1275_v38 = vrot.slane %v1202_v45, 1 }
 0x1be   :  { %v842_v36 = vsel %vm828_vm7, %v825_v32, %v565_v2 }
 0x1bf   :  { %v5221_v21 = vsel %vm313_vm2, %v1322_v18, %v1323_v19  ;;  %v859_v37 = vsel %vm845_vm8, %v842_v36, %v613_v34  ;;  %v1276_v40 = vsel %vm264_vm1, %v1274_v8, %v1275_v38 }
 0x1c0   :  { %v4131_v22 = vpack.i.bf16 %v5221_v21, %v1321_v17  ;;  %v4126_v43 = vpack.i.bf16 %v1276_v40, %v1273_v39 }
 0x1c2   :  { %4132 = vrot.lane.b32.xlu0 %v4131_v22, %s4475_s9  ;;  %v757_v51 = vpop.permute.xlu0 %756 }
 0x1c3   :  { %v661_v35 = vpop.permute.xlu1 %660 }
 0x1c4   :  { %v1008_v27 = vpop.f32.mrf.mxu0  ;;  %v1121_v28 = vpop.f32.mrf.mxu1  ;;  %v876_v42 = vsel %vm862_vm9, %v859_v37, %v661_v35 }
 0x1c5   :  { %v1042_v14 = vmax.f32 %v1008_v27, 0.0  ;;  %v5228_v29 = vmax.f32 %v1121_v28, 0.0  ;;  %v893_v50 = vsel %vm879_vm10, %v876_v42, %v709_v26  ;;  %v759_v30 = vpop.permute.xlu2 %758 }
 0x1c6   :  { %v910_v52 = vsel %vm896_vm11, %v893_v50, %v757_v51 }
 0x1c7   :  { %1184 = vst.msk [vmem:[#allocation3 + $0x21] sm:$0xff] %vm53_vm13, %v5228_v29  ;;  %2068 = vrot.lane.b32.xlu2 %v5228_v29, %s4474_s0  ;;  %3991 = vmatmul.msk.f32.gmra.mxu1 %vm53_vm13, %v1042_v14 }
 0x1c8   :  { %3981 = vmatmul.msk.f32.gmra.mxu0 %vm917_vm12, %v910_v52 }
 0x1ca   :  { %v519_v58 = vpop.permute.xlu0 %518 }
 0x1cb   :  { %v423_v1 = vpop.permute.xlu1 %422 }
 0x1cc   :  { %v792_v12 = vsel %vm12_vm0, %v5094_v56, %v423_v1 }
 0x1cd   :  { %v809_v59 = vsel %vm794_vm5, %v792_v12, %v471_v41  ;;  %v521_v14 = vpop.permute.xlu2 %520 }
 0x1ce   :  { %v5243_v46 = vld [vmem:[#allocation3 + $0x20] sm:$0xff]  ;;  %v1204_v13 = vld [vmem:[#allocation3 + $0x28] sm:$0xff]  ;;  %v826_v47 = vsel %vm811_vm6, %v809_v59, %v519_v58 }
 0x1cf   :  { %4127 = vrot.lane.b32.xlu2 %v4126_v43, %s4476_s10  ;;  %v4136_v48 = vpack.i.bf16 %v5243_v46, %v5215_v16  ;;  %v1277_v49 = vrot.slane %v5243_v46, 1  ;;  %v1278_v7 = vrot.slane %v1204_v13, 1  ;;  %v1325_v3 = vrot.slane %v5243_v46, 2 }
 0x1d0   :  { %v1326_v4 = vrot.slane %v1204_v13, 2 }
 0x1d1   :  { %4137 = vrot.lane.b32.xlu1 %v4136_v48, %s4477_s17  ;;  %v1279_v53 = vsel %vm264_vm1, %v1277_v49, %v1278_v7 }
 0x1d2   :  { %v4141_v55 = vpack.i.bf16 %v1279_v53, %v1276_v40  ;;  %v5269_v5 = vsel %vm313_vm2, %v1325_v3, %v1326_v4  ;;  %v663_v11 = vpop.permute.xlu0 %662  ;;  %v2048_v4 = vld [vmem:[%s6679_s1 + $0xc0] sm:$0xff] }
 0x1d3   :  { %v567_v0 = vpop.permute.xlu1 %566  ;;  %v4146_v18 = vpack.i.bf16 %v5269_v5, %v5221_v21 }
 0x1d4   :  { %v843_v56 = vsel %vm828_vm7, %v826_v47, %v567_v0 }
 0x1d5   :  { %v860_v6 = vsel %vm845_vm8, %v843_v56, %v615_v54  ;;  %v665_v40 = vpop.permute.xlu2 %664  ;;  %v2049_v54 = vld [vmem:[%s6679_s1 + $0xc8] sm:$0xff] }
 0x1d6   :  { %v877_v45 = vsel %vm862_vm9, %v860_v6, %v663_v11  ;;  %2144 = vmatpush.msrb.mxu1 %v2049_v54  ;;  %v1859_v54 = vld [vmem:[%s6679_s1 + $0x68] sm:$0xff] }
 0x1d7   :  { %4142 = vrot.lane.b32.xlu2 %v4141_v55, %s4478_s18 }
 0x1d8   :  { %2145 = vmatpush.msrb.mxu1 %v2048_v4 }
 0x1da   :  { %v425_v21 = vpop.permute.xlu0 %424 }
 0x1db   :  { %v1011_v60 = vpop.f32.mrf.mxu0  ;;  %v1124_v62 = vpop.f32.mrf.mxu1  ;;  %v793_v28 = vsel %vm12_vm0, %v5123_v23, %v425_v21  ;;  %vm1801_vm0 = vcmask 654336  }
 0x1dc   :  { %v1043_v63 = vmax.f32 %v1011_v60, 0.0  ;;  %v5259_v2 = vmax.f32 %v1124_v62, 0.0  ;;  %v711_v15 = vpop.permute.xlu1 %710 }
 0x1dd   :  { %v894_v17 = vsel %vm879_vm10, %v877_v45, %v711_v15 }
 0x1de   :  { %1185 = vst.msk [vmem:[#allocation3 + $0x31] sm:$0xff] %vm53_vm13, %v5259_v2  ;;  %2070 = vrot.lane.b32.xlu0 %v5259_v2, %s4474_s0  ;;  %3992 = vmatmul.msk.f32.gmra.mxu1 %vm53_vm13, %v1043_v63  ;;  %v911_v19 = vsel %vm896_vm11, %v894_v17, %v759_v30 }
 0x1df   :  { %3982 = vmatmul.msk.f32.gmra.mxu0 %vm917_vm12, %v911_v19 }
 0x1e2   :  { %v569_v33 = vpop.permute.xlu0 %568 }
 0x1e4   :  { %v473_v57 = vpop.permute.xlu1 %472 }
 0x1e5   :  { %v5277_v22 = vld [vmem:[#allocation3 + $0x30] sm:$0xff]  ;;  %v1206_v24 = vld [vmem:[#allocation3 + $0x38] sm:$0xff]  ;;  %v810_v32 = vsel %vm794_vm5, %v793_v28, %v473_v57  ;;  %vm1818_vm5 = vcmask 785408  }
 0x1e6   :  { %4147 = vrot.lane.b32.xlu0 %v4146_v18, %s4479_s19  ;;  %v4151_v20 = vpack.i.bf16 %v5277_v22, %v5243_v46  ;;  %v1280_v25 = vrot.slane %v5277_v22, 1  ;;  %v1281_v26 = vrot.slane %v1206_v24, 1  ;;  %v827_v38 = vsel %vm811_vm6, %v810_v32, %v521_v14  ;;  %v1866_v28 = vld [vmem:[%s6679_s1 + $0xa0] sm:$0xff]  ;;  %v1864_v32 = vld [vmem:[%s6679_s1 + $0x90] sm:$0xff] }
 0x1e7   :  { %v844_v36 = vsel %vm828_vm7, %v827_v38, %v569_v33  ;;  %v1328_v50 = vrot.slane %v5277_v22, 2  ;;  %v1329_v51 = vrot.slane %v1206_v24, 2  ;;  %vm1835_vm6 = vcmask 916480  }
 0x1e8   :  { %4152 = vrot.lane.b32.xlu1 %v4151_v20, %s4480_s20  ;;  %v1282_v27 = vsel %vm264_vm1, %v1280_v25, %v1281_v26  ;;  %vm2934_vm7 = vcmask 1041409  }
 0x1e9   :  { %v4161_v31 = vpack.i.bf16 %v1282_v27, %v1279_v53  ;;  %v5317_v58 = vsel %vm313_vm2, %v1328_v50, %v1329_v51  ;;  %v1862_v50 = vld [vmem:[%s6679_s1 + $0x80] sm:$0xff] }
 0x1ea   :  { %v713_v42 = vpop.permute.xlu0 %712  ;;  %v4166_v0 = vpack.i.bf16 %v5317_v58, %v5269_v5 }
 0x1ec   :  { %v617_v8 = vpop.permute.xlu1 %616 }
 0x1ed   :  { %v861_v23 = vsel %vm845_vm8, %v844_v36, %v617_v8  ;;  %vm2936_vm8 = vcmask 1042434  }
 0x1ee   :  { %v878_v41 = vsel %vm862_vm9, %v861_v23, %v665_v40  ;;  %v1863_v23 = vld [vmem:[%s6679_s1 + $0x88] sm:$0xff]  ;;  %vm2938_vm9 = vcmask 1043459  }
 0x1ef   :  { %v895_v13 = vsel %vm879_vm10, %v878_v41, %v713_v42  ;;  %vm2940_vm10 = vcmask 1044484  }
 0x1f0   :  { %4162 = vrot.lane.b32.xlu1 %v4161_v31, %s4476_s10 }
 0x1f2   :  { %v1014_v34 = vpop.f32.mrf.mxu0  ;;  %v1127_v35 = vpop.f32.mrf.mxu1 }
 0x1f3   :  { %v1044_v37 = vmax.f32 %v1014_v34, 0.0  ;;  %v5292_v39 = vmax.f32 %v1127_v35, 0.0 }
 0x1f4   :  { %v761_v43 = vpop.permute.xlu1 %760 }
 0x1f5   :  { %1186 = vst.msk [vmem:[#allocation3 + $0x41] sm:$0xff] %vm53_vm13, %v5292_v39  ;;  %2072 = vrot.lane.b32.xlu2 %v5292_v39, %s4474_s0  ;;  %3993 = vmatmul.msk.f32.gmra.mxu1 %vm53_vm13, %v1044_v37  ;;  %v912_v48 = vsel %vm896_vm11, %v895_v13, %v761_v43  ;;  %vm2942_vm11 = vcmask 1045509  }
 0x1f6   :  { %3983 = vmatmul.msk.f32.gmra.mxu0 %vm917_vm12, %v912_v48  ;;  %vm2944_vm12 = vcmask 1046534  }
 0x1fc   :  { %v5304_v49 = vld [vmem:[#allocation3 + $0x40] sm:$0xff]  ;;  %v1208_v7 = vld [vmem:[#allocation3 + $0x48] sm:$0xff] }
 0x1fd   :  { %4157 = vrot.lane.b32.xlu2 %v4161_v31, %s4474_s0  ;;  %v4171_v1 = vpack.i.bf16 %v5304_v49, %v5277_v22  ;;  %v1283_v52 = vrot.slane %v5304_v49, 1  ;;  %v1284_v53 = vrot.slane %v1208_v7, 1  ;;  %v1331_v63 = vrot.slane %v5304_v49, 2  ;;  %v1865_v31 = vld [vmem:[%s6679_s1 + $0x98] sm:$0xff] }
 0x1fe   :  { %v1332_v3 = vrot.slane %v1208_v7, 2 }
 0x1ff   :  { %4172 = vrot.lane.b32.xlu0 %v4171_v1, %s4477_s17  ;;  %v1285_v55 = vsel %vm264_vm1, %v1283_v52, %v1284_v53  ;;  %v1861_v1 = vld [vmem:[%s6679_s1 + $0x78] sm:$0xff]  ;;  %v1860_v53 = vld [vmem:[%s6679_s1 + $0x70] sm:$0xff] }
 0x200   :  { %v4176_v12 = vpack.i.bf16 %v1285_v55, %v1282_v27  ;;  %v5335_v56 = vsel %vm313_vm2, %v1331_v63, %v1332_v3  ;;  %v1867_v27 = vld [vmem:[%s6679_s1 + $0xa8] sm:$0xff] }
 0x201   :  { %v4181_v30 = vpack.i.bf16 %v5335_v56, %v5317_v58  ;;  %1902 = vmatpush.msra.mxu2 %v1867_v27 }
 0x202   :  { %4177 = vrot.lane.b32.xlu1 %v4176_v12, %s4478_s18  ;;  %v1857_v12 = vld [vmem:[%s6679_s1 + $0x58] sm:$0xff] }
 0x203   :  { %1903 = vmatpush.msra.mxu2 %v1866_v28 }
 0x204   :  { %v1017_v59 = vpop.f32.mrf.mxu0  ;;  %v1130_v60 = vpop.f32.mrf.mxu1 }
 0x205   :  { %v1045_v62 = vmax.f32 %v1017_v59, 0.0  ;;  %v5322_v47 = vmax.f32 %v1130_v60, 0.0  ;;  %4167 = vrot.lane.b32.xlu2 %v4166_v0, %s4475_s9  ;;  %1904 = vmatpush.msra.mxu2 %v1865_v31  ;;  %v1856_v60 = vld [vmem:[%s6679_s1 + $0x50] sm:$0xff] }
 0x207   :  { %1187 = vst.msk [vmem:[#allocation3 + $0x51] sm:$0xff] %vm53_vm13, %v5322_v47  ;;  %3994 = vmatmul.msk.f32.gmra.mxu1 %vm53_vm13, %v1045_v62  ;;  %2074 = vrot.lane.b32.xlu0 %v5322_v47, %s4474_s0 }
 0x208   :  { %1905 = vmatpush.msra.mxu2 %v1864_v32 }
 0x20a   :  { %1906 = vmatpush.msra.mxu2 %v1863_v23 }
 0x20c   :  { %1907 = vmatpush.msra.mxu2 %v1862_v50 }
 0x20d   :  { %4182 = vrot.lane.b32.xlu2 %v4181_v30, %s4479_s19 }
 0x20e   :  { %v5340_v6 = vld [vmem:[#allocation3 + $0x50] sm:$0xff]  ;;  %v1210_v11 = vld [vmem:[#allocation3 + $0x58] sm:$0xff]  ;;  %1908 = vmatpush.msra.mxu2 %v1861_v1 }
 0x20f   :  { %v4186_v15 = vpack.i.bf16 %v5340_v6, %v5304_v49  ;;  %v1286_v45 = vrot.slane %v5340_v6, 1  ;;  %v1287_v17 = vrot.slane %v1210_v11, 1  ;;  %v1335_v21 = vrot.slane %v1210_v11, 2  ;;  %v1855_v11 = vld [vmem:[%s6679_s1 + $0x48] sm:$0xff]  ;;  %v5466_v1 = vld [vmem:[#allocation3 + $0x98] sm:$0xff] }
 0x210   :  { %v1334_v57 = vrot.slane %v5340_v6, 2  ;;  %1909 = vmatpush.msra.mxu2 %v1860_v53 }
 0x211   :  { %4187 = vrot.lane.b32.xlu0 %v4186_v15, %s4480_s20  ;;  %v1288_v18 = vsel %vm264_vm1, %v1286_v45, %v1287_v17  ;;  %v1854_v17 = vld [vmem:[%s6679_s1 + $0x40] sm:$0xff] }
 0x212   :  { %v4191_v19 = vpack.i.bf16 %v1288_v18, %v1285_v55  ;;  %v5364_v14 = vsel %vm313_vm2, %v1334_v57, %v1335_v21  ;;  %v1858_v55 = vld [vmem:[%s6679_s1 + $0x60] sm:$0xff]  ;;  %1910 = vmatpush.msra.mxu2 %v1859_v54 }
 0x213   :  { %v4201_v33 = vpack.i.bf16 %v5364_v14, %v5335_v56 }
 0x214   :  { %4192 = vrot.lane.b32.xlu1 %v4191_v19, %s4474_s0  ;;  %1911 = vmatpush.msra.mxu2 %v1858_v55 }
 0x216   :  { %1912 = vmatpush.msra.mxu2 %v1857_v12 }
 0x218   :  { %1913 = vmatpush.msra.mxu2 %v1856_v60 }
 0x21a   :  { %1914 = vmatpush.msra.mxu2 %v1855_v11 }
 0x21b   :  { %v1020_v24 = vpop.f32.mrf.mxu0  ;;  %v1133_v20 = vpop.f32.mrf.mxu1 }
 0x21c   :  { %v1046_v25 = vmax.f32 %v1020_v24, 0.0  ;;  %v5348_v26 = vmax.f32 %v1133_v20, 0.0  ;;  %4197 = vrot.lane.b32.xlu1 %v4191_v19, %s4476_s10  ;;  %1915 = vmatpush.msra.mxu2 %v1854_v17  ;;  %v1853_v19 = vld [vmem:[%s6679_s1 + $0x38] sm:$0xff]  ;;  %v1852_v24 = vld [vmem:[%s6679_s1 + $0x30] sm:$0xff] }
 0x21e   :  { %1188 = vst.msk [vmem:[#allocation3 + $0x61] sm:$0xff] %vm53_vm13, %v5348_v26  ;;  %2076 = vrot.lane.b32.xlu2 %v5348_v26, %s4474_s0  ;;  %3995 = vmatmul.msk.f32.vlgmr.msra.gmra.mxu3 %vm53_vm13, %v1046_v25 }
 0x21f   :  { %1916 = vmatpush.msra.mxu2 %v1853_v19 }
 0x221   :  { %v2069_v7 = vpop.permute.xlu2 %2068  ;;  %1917 = vmatpush.msra.mxu2 %v1852_v24 }
 0x225   :  { %v5374_v8 = vld [vmem:[#allocation3 + $0x60] sm:$0xff]  ;;  %v1212_v38 = vld [vmem:[#allocation3 + $0x68] sm:$0xff] }
 0x226   :  { %4202 = vrot.lane.b32.xlu2 %v4201_v33, %s4475_s9  ;;  %v4206_v34 = vpack.i.bf16 %v5374_v8, %v5340_v6  ;;  %v1289_v35 = vrot.slane %v5374_v8, 1  ;;  %v1290_v36 = vrot.slane %v1212_v38, 1  ;;  %v1337_v37 = vrot.slane %v5374_v8, 2 }
 0x227   :  { %v2067_v40 = vpop.permute.xlu0 %2066  ;;  %v1338_v41 = vrot.slane %v1212_v38, 2 }
 0x228   :  { %4207 = vrot.lane.b32.xlu0 %v4206_v34, %s4477_s17  ;;  %4016 = vmatmul.msk.f32.vlgmr.msrb.gmra.mxu1 %vm53_vm13, %v2067_v40  ;;  %v1291_v42 = vsel %vm264_vm1, %v1289_v35, %v1290_v36 }
 0x229   :  { %v4211_v43 = vpack.i.bf16 %v1291_v42, %v1288_v18  ;;  %v5388_v13 = vsel %vm313_vm2, %v1337_v37, %v1338_v41  ;;  %v5431_v15 = vpop.permute.xlu2 %4127 }
 0x22a   :  { %v4216_v48 = vpack.i.bf16 %v5388_v13, %v5364_v14  ;;  %v4129_v38 = vunpack.i.l.bf16 %v5431_v15 }
 0x22b   :  { %4212 = vrot.lane.b32.xlu1 %v4211_v43, %s4478_s18 }
 0x22e   :  { %4217 = vrot.lane.b32.xlu2 %v4216_v48, %s4479_s19 }
 0x230   :  { %4017 = vmatmul.msk.f32.gmra.mxu1 %vm53_vm13, %v2069_v7 }
 0x231   :  { %v5447_v57 = vpop.permute.xlu2 %4142 }
 0x232   :  { %v1136_v51 = vpop.f32.mrf.mxu1 }
 0x233   :  { %v5401_v52 = vmax.f32 %v1136_v51, 0.0  ;;  %v1023_v0 = vpop.f32.mrf.mxu0  ;;  %v5464_v51 = vld [vmem:[#allocation3 + $0x90] sm:$0xff] }
 0x234   :  { %v1047_v59 = vmax.f32 %v1023_v0, 0.0  ;;  %v4133_v21 = vpop.permute.xlu0 %4132  ;;  %v4130_v0 = vunpack.i.h.bf16 %v5431_v15  ;;  %v1387_v60 = vrot.slane %v5464_v51, 1  ;;  %v4144_v15 = vunpack.i.l.bf16 %v5447_v57 }
 0x235   :  { %1189 = vst.msk [vmem:[#allocation3 + $0x71] sm:$0xff] %vm53_vm13, %v5401_v52  ;;  %2078 = vrot.lane.b32.xlu0 %v5401_v52, %s4474_s0  ;;  %v4134_v48 = vunpack.i.l.bf16 %v4133_v21 }
 0x236   :  { %3996 = vmatmul.msk.f32.gmra.mxu3 %vm53_vm13, %v1047_v59  ;;  %v1735_v59 = vsel %vm53_vm13, %v5208_v44, %v4129_v38  ;;  %v1736_v44 = vsel %vm53_vm13, %v5215_v16, %v4130_v0 }
 0x23c   :  { %v5422_v62 = vld [vmem:[#allocation3 + $0x70] sm:$0xff]  ;;  %v1214_v63 = vld [vmem:[#allocation3 + $0x78] sm:$0xff] }
 0x23d   :  { %v4221_v3 = vpack.i.bf16 %v5422_v62, %v5374_v8  ;;  %v1292_v4 = vrot.slane %v5422_v62, 1  ;;  %v1293_v30 = vrot.slane %v1214_v63, 1  ;;  %v1340_v27 = vrot.slane %v5422_v62, 2 }
 0x23e   :  { %v1341_v28 = vrot.slane %v1214_v63, 2  ;;  %v1388_v63 = vrot.slane %v5466_v1, 1 }
 0x23f   :  { %4222 = vrot.lane.b32.xlu0 %v4221_v3, %s4480_s20  ;;  %v1294_v45 = vsel %vm264_vm1, %v1292_v4, %v1293_v30  ;;  %v4135_v3 = vunpack.i.h.bf16 %v4133_v21  ;;  %v1751_v4 = vsel %vm94_vm3, %v1735_v59, %v4134_v48 }
 0x240   :  { %v4226_v18 = vpack.i.bf16 %v1294_v45, %v1291_v42  ;;  %v5456_v31 = vsel %vm313_vm2, %v1340_v27, %v1341_v28 }
 0x241   :  { %v4236_v33 = vpack.i.bf16 %v5456_v31, %v5388_v13  ;;  %v1752_v21 = vsel %vm94_vm3, %v1736_v44, %v4135_v3 }
 0x242   :  { %4227 = vrot.lane.b32.xlu1 %v4226_v18, %s4474_s0 }
 0x243   :  { %v4138_v32 = vpop.permute.xlu1 %4137 }
 0x244   :  { %v1139_v20 = vpop.f32.mrf.mxu1  ;;  %v4139_v53 = vunpack.i.l.bf16 %v4138_v32  ;;  %v4140_v30 = vunpack.i.h.bf16 %v4138_v32 }
 0x245   :  { %v5445_v25 = vmax.f32 %v1139_v20, 0.0  ;;  %v1026_v23 = vpop.f32.mrf.mxu0  ;;  %v1389_v20 = vsel %vm264_vm1, %v1387_v60, %v1388_v63 }
 0x246   :  { %v1048_v7 = vmax.f32 %v1026_v23, 0.0  ;;  %v1768_v11 = vsel %vm1767_vm14, %v1751_v4, %v4139_v53  ;;  %v1769_v32 = vsel %vm1767_vm14, %v1752_v21, %v4140_v30  ;;  %v4145_v23 = vunpack.i.h.bf16 %v5447_v57 }
 0x247   :  { %1190 = vst.msk [vmem:[#allocation3 + $0x81] sm:$0xff] %vm53_vm13, %v5445_v25  ;;  %2080 = vrot.lane.b32.xlu2 %v5445_v25, %s4474_s0  ;;  %v1785_v28 = vsel %vm1784_vm15, %v1768_v11, %v4144_v15 }
 0x248   :  { %3997 = vmatmul.msk.f32.gmra.mxu3 %vm53_vm13, %v1048_v7  ;;  %v1786_v57 = vsel %vm1784_vm15, %v1769_v32, %v4145_v23  ;;  %v5511_v7 = vld [vmem:[#allocation3 + $0xa0] sm:$0xff] }
 0x24a   :  { %4232 = vrot.lane.b32.xlu1 %v4226_v18, %s4476_s10 }
 0x24e   :  { %v1215_v36 = vld [vmem:[#allocation3 + $0x80] sm:$0xff]  ;;  %v1216_v37 = vld [vmem:[#allocation3 + $0x88] sm:$0xff] }
 0x24f   :  { %v2073_v34 = vpop.permute.xlu2 %2072  ;;  %4237 = vrot.lane.b32.xlu2 %v4236_v33, %s4475_s9  ;;  %v4241_v40 = vpack.i.bf16 %v1215_v36, %v5422_v62  ;;  %v1371_v41 = vrot.slane %v1215_v36, 1  ;;  %v1372_v42 = vrot.slane %v1216_v37, 1  ;;  %v1377_v43 = vrot.slane %v1215_v36, 2 }
 0x250   :  { %v2071_v35 = vpop.permute.xlu0 %2070  ;;  %v1378_v50 = vrot.slane %v1216_v37, 2  ;;  %v4246_v24 = vpack.i.bf16 %v5464_v51, %v1215_v36 }
 0x251   :  { %4018 = vmatmul.msk.f32.gmra.mxu1 %vm53_vm13, %v2071_v35  ;;  %4242 = vrot.lane.b32.xlu0 %v4241_v40, %s4477_s17  ;;  %v1373_v54 = vsel %vm264_vm1, %v1371_v41, %v1372_v42  ;;  %v1869_v41 = vld [vmem:[%s6679_s1 + $0xb8] sm:$0xff]  ;;  %v1868_v42 = vld [vmem:[%s6679_s1 + $0xb0] sm:$0xff] }
 0x252   :  { %v4251_v55 = vpack.i.bf16 %v1373_v54, %v1294_v45  ;;  %v5472_v12 = vsel %vm313_vm2, %v1377_v43, %v1378_v50  ;;  %v4261_v37 = vpack.i.bf16 %v1389_v20, %v1373_v54  ;;  %1981 = vmatpush.msrb.mxu3 %v1869_v41  ;;  %v1220_v50 = vld [vmem:[#allocation3 + $0xa8] sm:$0xff]  ;;  %v1295_v54 = vrot.slane %v5511_v7, 1 }
 0x253   :  { %v4256_v45 = vpack.i.bf16 %v5472_v12, %v5456_v31 }
 0x254   :  { %4252 = vrot.lane.b32.xlu1 %v4251_v55, %s4478_s18  ;;  %1982 = vmatpush.msrb.mxu3 %v1868_v42  ;;  %v1296_v55 = vrot.slane %v1220_v50, 1 }
 0x256   :  { %v1297_v11 = vsel %vm264_vm1, %v1295_v54, %v1296_v55 }
 0x257   :  { %v4158_v18 = vpop.permute.xlu2 %4157  ;;  %4257 = vrot.lane.b32.xlu2 %v4256_v45, %s4479_s19 }
 0x258   :  { %v4148_v17 = vpop.permute.xlu0 %4147  ;;  %v4160_v60 = vunpack.i.h.bf16 %v4158_v18 }
 0x259   :  { %v4149_v19 = vunpack.i.l.bf16 %v4148_v17  ;;  %4019 = vmatmul.msk.f32.gmra.mxu1 %vm53_vm13, %v2073_v34  ;;  %4247 = vrot.lane.b32.xlu0 %v4246_v24, %s4480_s20  ;;  %v4159_v34 = vunpack.i.l.bf16 %v4158_v18  ;;  %v4150_v35 = vunpack.i.h.bf16 %v4148_v17 }
 0x25a   :  { %v4153_v27 = vpop.permute.xlu1 %4152 }
 0x25b   :  { %v4154_v33 = vunpack.i.l.bf16 %v4153_v27  ;;  %v1142_v16 = vpop.f32.mrf.mxu1  ;;  %v1802_v38 = vsel %vm1801_vm0, %v1785_v28, %v4149_v19  ;;  %v4155_v48 = vunpack.i.h.bf16 %v4153_v27  ;;  %v1803_v53 = vsel %vm1801_vm0, %v1786_v57, %v4150_v35 }
 0x25c   :  { %v5496_v36 = vmax.f32 %v1142_v16, 0.0  ;;  %4262 = vrot.lane.b32.xlu1 %v4261_v37, %s4474_s0  ;;  %v1029_v0 = vpop.f32.mrf.mxu0  ;;  %v1343_v27 = vrot.slane %v5511_v7, 2  ;;  %v1344_v28 = vrot.slane %v1220_v50, 2 }
 0x25d   :  { %v1819_v40 = vsel %vm1818_vm5, %v1802_v38, %v4154_v33  ;;  %v1820_v59 = vsel %vm1818_vm5, %v1803_v53, %v4155_v48  ;;  %v1049_v63 = vmax.f32 %v1029_v0, 0.0 }
 0x25e   :  { %1191 = vst.msk [vmem:[#allocation3 + $0xb1] sm:$0xff] %vm53_vm13, %v5496_v36  ;;  %v1836_v43 = vsel %vm1835_vm6, %v1819_v40, %v4159_v34  ;;  %v1837_v30 = vsel %vm1835_vm6, %v1820_v59, %v4160_v60  ;;  %v1345_v38 = vsel %vm313_vm2, %v1343_v27, %v1344_v28 }
 0x25f   :  { %1918 = vmatmul.f32.vlgmr.msra.gmra.mxu2 %v1836_v43  ;;  %3998 = vmatmul.msk.f32.gmra.mxu3 %vm53_vm13, %v1049_v63  ;;  %v5526_v18 = vpop.permute.xlu2 %4167 }
 0x260   :  { %v4169_v60 = vunpack.i.l.bf16 %v5526_v18 }
 0x261   :  { %2082 = vrot.lane.b32.xlu0 %v5496_v36, %s4474_s0 }
 0x262   :  { %v4163_v21 = vpop.permute.xlu1 %4162 }
 0x263   :  { %v4164_v23 = vunpack.i.l.bf16 %v4163_v21 }
 0x265   :  { %v5518_v3 = vld [vmem:[#allocation3 + $0xb0] sm:$0xff]  ;;  %v1222_v4 = vld [vmem:[#allocation3 + $0xb8] sm:$0xff]  ;;  %v1737_v55 = vsel %vm53_vm13, %v5243_v46, %v4164_v23 }
 0x266   :  { %v1298_v45 = vrot.slane %v5518_v3, 1  ;;  %v1299_v15 = vrot.slane %v1222_v4, 1  ;;  %v1346_v32 = vrot.slane %v5518_v3, 2  ;;  %v1347_v33 = vrot.slane %v1222_v4, 2 }
 0x267   :  { %1921 = vmatmul.f32.gmra.mxu2 %v1837_v30  ;;  %v5538_v16 = vpop.permute.xlu2 %4182 }
 0x268   :  { %v1300_v17 = vsel %vm264_vm1, %v1298_v45, %v1299_v15  ;;  %v1348_v34 = vsel %vm313_vm2, %v1346_v32, %v1347_v33  ;;  %v1753_v45 = vsel %vm94_vm3, %v1737_v55, %v4169_v60  ;;  %v4184_v33 = vunpack.i.l.bf16 %v5538_v16 }
 0x269   :  { %v4266_v44 = vpack.i.bf16 %v1300_v17, %v1297_v11  ;;  %v4271_v41 = vpack.i.bf16 %v1348_v34, %v1345_v38 }
 0x26b   :  { %4267 = vrot.lane.b32.xlu1 %v4266_v44, %s4476_s10  ;;  %v4165_v44 = vunpack.i.h.bf16 %v4163_v21 }
 0x271   :  { %v5528_v19 = vpop.permute.xlu0 %4172 }
 0x272   :  { %v1145_v24 = vpop.f32.mrf.mxu1  ;;  %v4174_v0 = vunpack.i.l.bf16 %v5528_v19 }
 0x273   :  { %v5530_v20 = vmax.f32 %v1145_v24, 0.0  ;;  %v1032_v35 = vpop.f32.mrf.mxu0 }
 0x274   :  { %v1050_v40 = vmax.f32 %v1032_v35, 0.0  ;;  %v4178_v42 = vpop.permute.xlu1 %4177  ;;  %v1770_v46 = vsel %vm1767_vm14, %v1753_v45, %v4174_v0  ;;  %v1738_v35 = vsel %vm53_vm13, %v5277_v22, %v4165_v44 }
 0x275   :  { %1192 = vst.msk [vmem:[#allocation3 + $0xc1] sm:$0xff] %vm53_vm13, %v5530_v20  ;;  %2084 = vrot.lane.b32.xlu2 %v5530_v20, %s4474_s0  ;;  %v4179_v63 = vunpack.i.l.bf16 %v4178_v42 }
 0x276   :  { %3999 = vmatmul.msk.f32.gmra.mxu3 %vm53_vm13, %v1050_v40  ;;  %v4170_v40 = vunpack.i.h.bf16 %v5526_v18 }
 0x277   :  { %v1787_v27 = vsel %vm1784_vm15, %v1770_v46, %v4179_v63 }
 0x278   :  { %v2077_v15 = vpop.permute.xlu2 %2076  ;;  %v1804_v23 = vsel %vm1801_vm0, %v1787_v27, %v4184_v33  ;;  %v1754_v22 = vsel %vm94_vm3, %v1738_v35, %v4170_v40 }
 0x279   :  { %v2075_v37 = vpop.permute.xlu0 %2074 }
 0x27a   :  { %4020 = vmatmul.msk.f32.gmra.mxu1 %vm53_vm13, %v2075_v37  ;;  %v4175_v37 = vunpack.i.h.bf16 %v5528_v19 }
 0x27c   :  { %v5544_v43 = vld [vmem:[#allocation3 + $0xc0] sm:$0xff]  ;;  %v1224_v48 = vld [vmem:[#allocation3 + $0xc8] sm:$0xff]  ;;  %v1771_v19 = vsel %vm1767_vm14, %v1754_v22, %v4175_v37 }
 0x27d   :  { %4272 = vrot.lane.b32.xlu2 %v4271_v41, %s4475_s9  ;;  %v4276_v57 = vpack.i.bf16 %v5544_v43, %v5518_v3  ;;  %v1301_v50 = vrot.slane %v5544_v43, 1  ;;  %v1302_v53 = vrot.slane %v1224_v48, 1  ;;  %v1349_v54 = vrot.slane %v5544_v43, 2 }
 0x27e   :  { %v1350_v59 = vrot.slane %v1224_v48, 2  ;;  %4000 = vmatmul.msk.f32.vlgmr.msrb.gmra.mxu3 %vm53_vm13, %v5269_v5  ;;  %v4180_v41 = vunpack.i.h.bf16 %v4178_v42 }
 0x27f   :  { %4277 = vrot.lane.b32.xlu0 %v4276_v57, %s4477_s17  ;;  %v1303_v4 = vsel %vm264_vm1, %v1301_v50, %v1302_v53  ;;  %v4185_v53 = vunpack.i.h.bf16 %v5538_v16 }
 0x280   :  { %v4281_v30 = vpack.i.bf16 %v1303_v4, %v1300_v17  ;;  %v5558_v11 = vsel %vm313_vm2, %v1349_v54, %v1350_v59  ;;  %v1788_v57 = vsel %vm1784_vm15, %v1771_v19, %v4180_v41 }
 0x281   :  { %v4286_v28 = vpack.i.bf16 %v5558_v11, %v1348_v34  ;;  %v1805_v0 = vsel %vm1801_vm0, %v1788_v57, %v4185_v53 }
 0x282   :  { %4282 = vrot.lane.b32.xlu1 %v4281_v30, %s4478_s18  ;;  %4021 = vmatmul.msk.f32.gmra.mxu1 %vm53_vm13, %v2077_v15 }
 0x283   :  { %v4188_v24 = vpop.permute.xlu0 %4187 }
 0x284   :  { %v4189_v32 = vunpack.i.l.bf16 %v4188_v24  ;;  %v1148_v17 = vpop.f32.mrf.mxu1  ;;  %v4190_v50 = vunpack.i.h.bf16 %v4188_v24  ;;  %v4203_v24 = vpop.permute.xlu2 %4202 }
 0x285   :  { %v5569_v38 = vmax.f32 %v1148_v17, 0.0  ;;  %4287 = vrot.lane.b32.xlu2 %v4286_v28, %s4479_s19 }
 0x286   :  { %v4193_v21 = vpop.permute.xlu1 %4192  ;;  %v1821_v5 = vsel %vm1818_vm5, %v1804_v23, %v4189_v32  ;;  %4001 = vmatmul.msk.f32.gmra.mxu3 %vm53_vm13, %v5317_v58  ;;  %v1822_v60 = vsel %vm1818_vm5, %v1805_v0, %v4190_v50 }
 0x287   :  { %1193 = vst.msk [vmem:[#allocation3 + $0xd1] sm:$0xff] %vm53_vm13, %v5569_v38  ;;  %v4194_v34 = vunpack.i.l.bf16 %v4193_v21  ;;  %2086 = vrot.lane.b32.xlu0 %v5569_v38, %s4474_s0  ;;  %v4195_v18 = vunpack.i.h.bf16 %v4193_v21 }
 0x289   :  { %v1838_v48 = vsel %vm1835_vm6, %v1821_v5, %v4194_v34  ;;  %v1839_v58 = vsel %vm1835_vm6, %v1822_v60, %v4195_v18 }
 0x28a   :  { %1924 = vmatmul.f32.gmra.mxu2 %v1838_v48  ;;  %v4204_v48 = vunpack.i.l.bf16 %v4203_v24 }
 0x28e   :  { %v5589_v42 = vld [vmem:[#allocation3 + $0xd0] sm:$0xff]  ;;  %v1226_v54 = vld [vmem:[#allocation3 + $0xd8] sm:$0xff]  ;;  %4002 = vmatmul.msk.f32.gmra.mxu3 %vm53_vm13, %v5335_v56  ;;  %v4198_v17 = vpop.permute.xlu1 %4197  ;;  %v4218_v56 = vpop.permute.xlu2 %4217 }
 0x28f   :  { %v4291_v55 = vpack.i.bf16 %v5589_v42, %v5544_v43  ;;  %v1352_v59 = vrot.slane %v5589_v42, 2  ;;  %v1353_v63 = vrot.slane %v1226_v54, 2  ;;  %v1304_v30 = vrot.slane %v5589_v42, 1 }
 0x290   :  { %v1305_v16 = vrot.slane %v1226_v54, 1  ;;  %v4199_v33 = vunpack.i.l.bf16 %v4198_v17  ;;  %v4200_v18 = vunpack.i.h.bf16 %v4198_v17  ;;  %v4219_v60 = vunpack.i.l.bf16 %v4218_v56 }
 0x291   :  { %4292 = vrot.lane.b32.xlu0 %v4291_v55, %s4480_s20  ;;  %v5600_v45 = vsel %vm313_vm2, %v1352_v59, %v1353_v63  ;;  %v4205_v63 = vunpack.i.h.bf16 %v4203_v24  ;;  %v1394_v17 = vrot.slane %v5466_v1, 2 }
 0x292   :  { %1927 = vmatmul.f32.gmra.mxu2 %v1839_v58  ;;  %v1306_v15 = vsel %vm264_vm1, %v1304_v30, %v1305_v16  ;;  %v4306_v44 = vpack.i.bf16 %v5600_v45, %v5558_v11  ;;  %v1739_v37 = vsel %vm53_vm13, %v5304_v49, %v4199_v33  ;;  %v1740_v16 = vsel %vm53_vm13, %v5340_v6, %v4200_v18 }
 0x293   :  { %v4296_v46 = vpack.i.bf16 %v1306_v15, %v1303_v4  ;;  %v1755_v50 = vsel %vm94_vm3, %v1739_v37, %v4204_v48  ;;  %v1756_v33 = vsel %vm94_vm3, %v1740_v16, %v4205_v63  ;;  %v4220_v37 = vunpack.i.h.bf16 %v4218_v56 }
 0x294   :  { %4307 = vrot.lane.b32.xlu2 %v4306_v44, %s4475_s9 }
 0x295   :  { %4297 = vrot.lane.b32.xlu1 %v4296_v46, %s4474_s0 }
 0x296   :  { %4003 = vmatmul.msk.f32.gmra.mxu3 %vm53_vm13, %v5364_v14 }
 0x29a   :  { %v4208_v27 = vpop.permute.xlu0 %4207 }
 0x29b   :  { %v4209_v40 = vunpack.i.l.bf16 %v4208_v27  ;;  %v4210_v58 = vunpack.i.h.bf16 %v4208_v27 }
 0x29d   :  { %4302 = vrot.lane.b32.xlu1 %v4296_v46, %s4476_s10  ;;  %v4213_v14 = vpop.permute.xlu1 %4212  ;;  %v1772_v54 = vsel %vm1767_vm14, %v1755_v50, %v4209_v40  ;;  %v1773_v6 = vsel %vm1767_vm14, %v1756_v33, %v4210_v58 }
 0x29e   :  { %4004 = vmatmul.msk.f32.gmra.mxu3 %vm53_vm13, %v5388_v13  ;;  %v4214_v22 = vunpack.i.l.bf16 %v4213_v14  ;;  %v4215_v46 = vunpack.i.h.bf16 %v4213_v14 }
 0x2a0   :  { %v1789_v0 = vsel %vm1784_vm15, %v1772_v54, %v4214_v22  ;;  %v1790_v27 = vsel %vm1784_vm15, %v1773_v6, %v4215_v46 }
 0x2a1   :  { %v1151_v28 = vpop.f32.mrf.mxu3  ;;  %v2081_v19 = vpop.permute.xlu2 %2080  ;;  %v1806_v44 = vsel %vm1801_vm0, %v1789_v0, %v4219_v60 }
 0x2a2   :  { %v5612_v32 = vmax.f32 %v1151_v28, 0.0  ;;  %v1393_v28 = vrot.slane %v5464_v51, 2  ;;  %v1807_v51 = vsel %vm1801_vm0, %v1790_v27, %v4220_v37 }
 0x2a4   :  { %1194 = vst.msk [vmem:[#allocation3 + $0xe1] sm:$0xff] %vm53_vm13, %v5612_v32  ;;  %2088 = vrot.lane.b32.xlu2 %v5612_v32, %s4474_s0 }
 0x2a6   :  { %4005 = vmatmul.msk.f32.gmra.mxu3 %vm53_vm13, %v5456_v31 }
 0x2a7   :  { %v2079_v4 = vpop.permute.xlu0 %2078 }
 0x2a8   :  { %4022 = vmatmul.msk.f32.gmra.mxu1 %vm53_vm13, %v2079_v4 }
 0x2ab   :  { %v5621_v21 = vld [vmem:[#allocation3 + $0xe0] sm:$0xff]  ;;  %v1228_v35 = vld [vmem:[#allocation3 + $0xe8] sm:$0xff] }
 0x2ac   :  { %v4311_v34 = vpack.i.bf16 %v5621_v21, %v5589_v42  ;;  %v1355_v23 = vrot.slane %v5621_v21, 2  ;;  %v1356_v13 = vrot.slane %v1228_v35, 2  ;;  %v1307_v41 = vrot.slane %v5621_v21, 1 }
 0x2ad   :  { %v1308_v5 = vrot.slane %v1228_v35, 1  ;;  %v1395_v35 = vsel %vm313_vm2, %v1393_v28, %v1394_v17 }
 0x2ae   :  { %4312 = vrot.lane.b32.xlu0 %v4311_v34, %s4477_s17  ;;  %v5633_v49 = vsel %vm313_vm2, %v1355_v23, %v1356_v13  ;;  %4006 = vmatmul.msk.f32.gmra.mxu3 %vm53_vm13, %v5472_v12 }
 0x2af   :  { %v5636_v57 = vsel %vm264_vm1, %v1307_v41, %v1308_v5  ;;  %v4321_v31 = vpack.i.bf16 %v5633_v49, %v5600_v45  ;;  %v4238_v41 = vpop.permute.xlu2 %4237 }
 0x2b0   :  { %4023 = vmatmul.msk.f32.gmra.mxu1 %vm53_vm13, %v2081_v19  ;;  %v4316_v53 = vpack.i.bf16 %v5636_v57, %v1306_v15  ;;  %v4239_v50 = vunpack.i.l.bf16 %v4238_v41 }
 0x2b1   :  { %v4223_v55 = vpop.permute.xlu0 %4222  ;;  %4322 = vrot.lane.b32.xlu2 %v4321_v31, %s4479_s19 }
 0x2b2   :  { %4317 = vrot.lane.b32.xlu1 %v4316_v53, %s4478_s18  ;;  %v4224_v59 = vunpack.i.l.bf16 %v4223_v55  ;;  %v4225_v12 = vunpack.i.h.bf16 %v4223_v55 }
 0x2b4   :  { %v4228_v30 = vpop.permute.xlu1 %4227  ;;  %v1823_v4 = vsel %vm1818_vm5, %v1806_v44, %v4224_v59  ;;  %v1824_v1 = vsel %vm1818_vm5, %v1807_v51, %v4225_v12  ;;  %v4240_v12 = vunpack.i.h.bf16 %v4238_v41 }
 0x2b5   :  { %v4229_v15 = vunpack.i.l.bf16 %v4228_v30  ;;  %v4230_v14 = vunpack.i.h.bf16 %v4228_v30 }
 0x2b6   :  { %4007 = vmatmul.msk.f32.gmra.mxu3 %vm53_vm13, %v1395_v35 }
 0x2b7   :  { %v1840_v24 = vsel %vm1835_vm6, %v1823_v4, %v4229_v15  ;;  %v1841_v34 = vsel %vm1835_vm6, %v1824_v1, %v4230_v14 }
 0x2b8   :  { %1930 = vmatmul.f32.gmra.mxu2 %v1840_v24 }
 0x2b9   :  { %v1154_v23 = vpop.f32.mrf.mxu3 }
 0x2ba   :  { %v5664_v13 = vmax.f32 %v1154_v23, 0.0 }
 0x2bc   :  { %v4233_v40 = vpop.permute.xlu1 %4232  ;;  %1195 = vst.msk [vmem:[#allocation3 + $0xf1] sm:$0xff] %vm53_vm13, %v5664_v13  ;;  %2090 = vrot.lane.b32.xlu0 %v5664_v13, %s4474_s0 }
 0x2bd   :  { %v4234_v56 = vunpack.i.l.bf16 %v4233_v40  ;;  %v4235_v30 = vunpack.i.h.bf16 %v4233_v40 }
 0x2be   :  { %4008 = vmatmul.msk.f32.gmra.mxu3 %vm53_vm13, %v5558_v11  ;;  %v4258_v11 = vpop.permute.xlu2 %4257 }
 0x2bf   :  { %v1741_v22 = vsel %vm53_vm13, %v5374_v8, %v4234_v56  ;;  %v4259_v17 = vunpack.i.l.bf16 %v4258_v11  ;;  %v4260_v23 = vunpack.i.h.bf16 %v4258_v11  ;;  %v4481_v11 = vmov -3.4028235e+38  }
 0x2c0   :  { %1933 = vmatmul.f32.gmra.mxu2 %v1841_v34  ;;  %v1757_v63 = vsel %vm94_vm3, %v1741_v22, %v4239_v50  ;;  %109 = vst.msk [vmem:[#allocation5 + $0x10] sm:$0xff] %vm53_vm13, %v4481_v11 }
 0x2c1   :  { %110 = vst.msk [vmem:[#allocation5 + $0x18] sm:$0xff] %vm53_vm13, %v4481_v11 }
 0x2c2   :  { %107 = vst.msk [vmem:[#allocation5] sm:$0xff] %vm53_vm13, %v4481_v11 }
 0x2c3   :  { %v4243_v5 = vpop.permute.xlu0 %4242  ;;  %v5674_v31 = vld [vmem:[#allocation3 + $0xf0] sm:$0xff]  ;;  %v1230_v53 = vld [vmem:[#allocation3 + $0xf8] sm:$0xff]  ;;  %108 = vst.msk [vmem:[#allocation5 + $0x8] sm:$0xff] %vm53_vm13, %v4481_v11 }
 0x2c4   :  { %v4244_v19 = vunpack.i.l.bf16 %v4243_v5  ;;  %v4326_v54 = vpack.i.bf16 %v5674_v31, %v5621_v21  ;;  %v1358_v55 = vrot.slane %v5674_v31, 2  ;;  %v1359_v0 = vrot.slane %v1230_v53, 2  ;;  %111 = vst.msk [vmem:[#allocation5 + $0x20] sm:$0xff] %vm53_vm13, %v4481_v11 }
 0x2c5   :  { %v1310_v59 = vrot.slane %v5674_v31, 1  ;;  %v1311_v60 = vrot.slane %v1230_v53, 1  ;;  %v4245_v33 = vunpack.i.h.bf16 %v4243_v5  ;;  %112 = vst.msk [vmem:[#allocation5 + $0x28] sm:$0xff] %vm53_vm13, %v4481_v11 }
 0x2c6   :  { %v4253_v48 = vpop.permute.xlu1 %4252  ;;  %4327 = vrot.lane.b32.xlu0 %v4326_v54, %s4480_s20  ;;  %4009 = vmatmul.msk.f32.gmra.mxu3 %vm53_vm13, %v5600_v45  ;;  %v1360_v8 = vsel %vm313_vm2, %v1358_v55, %v1359_v0  ;;  %v1774_v16 = vsel %vm1767_vm14, %v1757_v63, %v4244_v19  ;;  %v1742_v45 = vsel %vm53_vm13, %v5422_v62, %v4235_v30 }
 0x2c7   :  { %v4254_v18 = vunpack.i.l.bf16 %v4253_v48  ;;  %v4341_v15 = vpack.i.bf16 %v1360_v8, %v5633_v49  ;;  %v1312_v44 = vsel %vm264_vm1, %v1310_v59, %v1311_v60  ;;  %v4255_v35 = vunpack.i.h.bf16 %v4253_v48  ;;  %113 = vst.msk [vmem:[#allocation5 + $0x30] sm:$0xff] %vm53_vm13, %v4481_v11 }
 0x2c8   :  { %v4331_v4 = vpack.i.bf16 %v1312_v44, %v5636_v57  ;;  %v1758_v57 = vsel %vm94_vm3, %v1742_v45, %v4240_v12  ;;  %114 = vst.msk [vmem:[#allocation5 + $0x38] sm:$0xff] %vm53_vm13, %v4481_v11 }
 0x2c9   :  { %v1791_v46 = vsel %vm1784_vm15, %v1774_v16, %v4254_v18  ;;  %4342 = vrot.lane.b32.xlu2 %v4341_v15, %s4475_s9  ;;  %v1775_v51 = vsel %vm1767_vm14, %v1758_v57, %v4245_v33  ;;  %115 = vst.msk [vmem:[#allocation5 + $0x40] sm:$0xff] %vm53_vm13, %v4481_v11 }
 0x2ca   :  { %4332 = vrot.lane.b32.xlu1 %v4331_v4, %s4474_s0  ;;  %v1808_v27 = vsel %vm1801_vm0, %v1791_v46, %v4259_v17  ;;  %v1792_v1 = vsel %vm1784_vm15, %v1775_v51, %v4255_v35  ;;  %116 = vst.msk [vmem:[#allocation5 + $0x48] sm:$0xff] %vm53_vm13, %v4481_v11 }
 0x2cb   :  { %v4248_v58 = vpop.permute.xlu0 %4247  ;;  %v1157_v40 = vpop.f32.mrf.mxu3  ;;  %v1809_v5 = vsel %vm1801_vm0, %v1792_v1, %v4260_v23  ;;  %117 = vst.msk [vmem:[#allocation5 + $0x50] sm:$0xff] %vm53_vm13, %v4481_v11 }
 0x2cc   :  { %v4249_v28 = vunpack.i.l.bf16 %v4248_v58  ;;  %v4250_v34 = vunpack.i.h.bf16 %v4248_v58  ;;  %v5703_v56 = vmax.f32 %v1157_v40, 0.0  ;;  %118 = vst.msk [vmem:[#allocation5 + $0x58] sm:$0xff] %vm53_vm13, %v4481_v11 }
 0x2cd   :  { %119 = vst.msk [vmem:[#allocation5 + $0x60] sm:$0xff] %vm53_vm13, %v4481_v11 }
 0x2ce   :  { %v4263_v24 = vpop.permute.xlu1 %4262  ;;  %v1825_v37 = vsel %vm1818_vm5, %v1808_v27, %v4249_v28  ;;  %4010 = vmatmul.msk.f32.gmra.mxu3 %vm53_vm13, %v5633_v49  ;;  %1196 = vst.msk [vmem:[#allocation3 + $0x101] sm:$0xff] %vm53_vm13, %v5703_v56  ;;  %v1826_v49 = vsel %vm1818_vm5, %v1809_v5, %v4250_v34 }
 0x2cf   :  { %v4264_v6 = vunpack.i.l.bf16 %v4263_v24  ;;  %v4265_v41 = vunpack.i.h.bf16 %v4263_v24  ;;  %v2085_v22 = vpop.permute.xlu2 %2084  ;;  %120 = vst.msk [vmem:[#allocation5 + $0x68] sm:$0xff] %vm53_vm13, %v4481_v11 }
 0x2d0   :  { %121 = vst.msk [vmem:[#allocation5 + $0x70] sm:$0xff] %vm53_vm13, %v4481_v11 }
 0x2d1   :  { %v1842_v14 = vsel %vm1835_vm6, %v1825_v37, %v4264_v6  ;;  %v1843_v48 = vsel %vm1835_vm6, %v1826_v49, %v4265_v41  ;;  %122 = vst.msk [vmem:[#allocation5 + $0x78] sm:$0xff] %vm53_vm13, %v4481_v11 }
 0x2d2   :  { %1936 = vmatmul.f32.gmra.mxu2 %v1842_v14  ;;  %4337 = vrot.lane.b32.xlu1 %v4331_v4, %s4476_s10  ;;  %123 = vst.msk [vmem:[#allocation5 + $0x80] sm:$0xff] %vm53_vm13, %v4481_v11 }
 0x2d3   :  { %v2083_v62 = vpop.permute.xlu0 %2082  ;;  %124 = vst.msk [vmem:[#allocation5 + $0x88] sm:$0xff] %vm53_vm13, %v4481_v11 }
 0x2d4   :  { %4024 = vmatmul.msk.f32.gmra.mxu1 %vm53_vm13, %v2083_v62  ;;  %125 = vst.msk [vmem:[#allocation5 + $0x90] sm:$0xff] %vm53_vm13, %v4481_v11 }
 0x2d5   :  { %v5713_v19 = vld [vmem:[#allocation3 + $0x100] sm:$0xff]  ;;  %v1232_v50 = vld [vmem:[#allocation3 + $0x108] sm:$0xff]  ;;  %126 = vst.msk [vmem:[#allocation5 + $0x98] sm:$0xff] %vm53_vm13, %v4481_v11 }
 0x2d6   :  { %4011 = vmatmul.msk.f32.gmra.mxu3 %vm53_vm13, %v1360_v8  ;;  %v4346_v53 = vpack.i.bf16 %v5713_v19, %v5674_v31  ;;  %v1314_v18 = vrot.slane %v1232_v50, 1  ;;  %v1361_v54 = vrot.slane %v5713_v19, 2  ;;  %v1362_v55 = vrot.slane %v1232_v50, 2  ;;  %127 = vst.msk [vmem:[#allocation5 + $0xa0] sm:$0xff] %vm53_vm13, %v4481_v11 }
 0x2d7   :  { %v1313_v0 = vrot.slane %v5713_v19, 1  ;;  %v5732_v16 = vpop.permute.xlu2 %4272  ;;  %128 = vst.msk [vmem:[#allocation5 + $0xa8] sm:$0xff] %vm53_vm13, %v4481_v11 }
 0x2d8   :  { %4347 = vrot.lane.b32.xlu0 %v4346_v53, %s4477_s17  ;;  %v1363_v59 = vsel %vm313_vm2, %v1361_v54, %v1362_v55  ;;  %129 = vst.msk [vmem:[#allocation5 + $0xb0] sm:$0xff] %vm53_vm13, %v4481_v11  ;;  %v4274_v41 = vunpack.i.l.bf16 %v5732_v16 }
 0x2d9   :  { %v4356_v60 = vpack.i.bf16 %v1363_v59, %v1360_v8  ;;  %v1315_v63 = vsel %vm264_vm1, %v1313_v0, %v1314_v18  ;;  %130 = vst.msk [vmem:[#allocation5 + $0xb8] sm:$0xff] %vm53_vm13, %v4481_v11 }
 0x2da   :  { %1939 = vmatmul.f32.gmra.mxu2 %v1843_v48  ;;  %v4351_v30 = vpack.i.bf16 %v1315_v63, %v1312_v44  ;;  %131 = vst.msk [vmem:[#allocation5 + $0xc0] sm:$0xff] %vm53_vm13, %v4481_v11 }
 0x2db   :  { %4357 = vrot.lane.b32.xlu2 %v4356_v60, %s4479_s19  ;;  %132 = vst.msk [vmem:[#allocation5 + $0xc8] sm:$0xff] %vm53_vm13, %v4481_v11 }
 0x2dc   :  { %4025 = vmatmul.msk.f32.gmra.mxu1 %vm53_vm13, %v2085_v22  ;;  %4352 = vrot.lane.b32.xlu1 %v4351_v30, %s4478_s18  ;;  %133 = vst.msk [vmem:[#allocation5 + $0xd0] sm:$0xff] %vm53_vm13, %v4481_v11  ;;  %v2147_v22 = vpop.f32.mrf.mxu1  ;;  %v4275_v30 = vunpack.i.h.bf16 %v5732_v16 }
 0x2dd   :  { %v4268_v27 = vpop.permute.xlu1 %4267  ;;  %134 = vst.msk [vmem:[#allocation5 + $0xd8] sm:$0xff] %vm53_vm13, %v4481_v11 }
 0x2de   :  { %4012 = vmatmul.msk.f32.gmra.mxu3 %vm53_vm13, %v1363_v59  ;;  %v4269_v51 = vunpack.i.l.bf16 %v4268_v27  ;;  %135 = vst.msk [vmem:[#allocation5 + $0xe0] sm:$0xff] %vm53_vm13, %v4481_v11  ;;  %v4270_v18 = vunpack.i.h.bf16 %v4268_v27 }
 0x2df   :  { %v5757_v15 = vpop.permute.xlu2 %4287  ;;  %136 = vst.msk [vmem:[#allocation5 + $0xe8] sm:$0xff] %vm53_vm13, %v4481_v11 }
 0x2e0   :  { %v1743_v34 = vsel %vm53_vm13, %v5511_v7, %v4269_v51  ;;  %137 = vst.msk [vmem:[#allocation5 + $0xf0] sm:$0xff] %vm53_vm13, %v4481_v11  ;;  %v4289_v0 = vunpack.i.l.bf16 %v5757_v15 }
 0x2e1   :  { %v1759_v50 = vsel %vm94_vm3, %v1743_v34, %v4274_v41  ;;  %138 = vst.msk [vmem:[#allocation5 + $0xf8] sm:$0xff] %vm53_vm13, %v4481_v11 }
 0x2e2   :  { %v1160_v8 = vpop.f32.mrf.mxu3  ;;  %v1919_v5 = vpop.f32.mrf.mxu2  ;;  %139 = vst.msk [vmem:[#allocation5 + $0x100] sm:$0xff] %vm53_vm13, %v4481_v11 }
 0x2e3   :  { %v5739_v58 = vmax.f32 %v1160_v8, 0.0  ;;  %140 = vst.msk [vmem:[#allocation5 + $0x108] sm:$0xff] %vm53_vm13, %v4481_v11 }
 0x2e4   :  { %141 = vst.msk [vmem:[#allocation5 + $0x110] sm:$0xff] %vm53_vm13, %v4481_v11  ;;  %v2150_v41 = vpop.f32.mrf.mxu1 }
 0x2e5   :  { %1197 = vst.msk [vmem:[#allocation3 + $0x111] sm:$0xff] %vm53_vm13, %v5739_v58 }
 0x2e6   :  { %142 = vst.msk [vmem:[#allocation5 + $0x118] sm:$0xff] %vm53_vm13, %v4481_v11 }
 0x2e7   :  { %143 = vst.msk [vmem:[#allocation5 + $0x120] sm:$0xff] %vm53_vm13, %v4481_v11 }
 0x2e8   :  { %144 = vst.msk [vmem:[#allocation5 + $0x128] sm:$0xff] %vm53_vm13, %v4481_v11 }
 0x2e9   :  { %145 = vst.msk [vmem:[#allocation5 + $0x130] sm:$0xff] %vm53_vm13, %v4481_v11 }
 0x2ea   :  { %146 = vst.msk [vmem:[#allocation5 + $0x138] sm:$0xff] %vm53_vm13, %v4481_v11 }
 0x2eb   :  { %147 = vst.msk [vmem:[#allocation6] sm:$0xff] %vm94_vm3, %v4481_v11 }
 0x2ec   :  { %v5763_v46 = vld [vmem:[#allocation3 + $0x110] sm:$0xff]  ;;  %v1234_v28 = vld [vmem:[#allocation3 + $0x118] sm:$0xff]  ;;  %148 = vst.msk [vmem:[#allocation6 + $0x8] sm:$0xff] %vm94_vm3, %v4481_v11 }
 0x2ed   :  { %v4361_v17 = vpack.i.bf16 %v5763_v46, %v5713_v19  ;;  %v1317_v4 = vrot.slane %v1234_v28, 1  ;;  %v1364_v24 = vrot.slane %v5763_v46, 2  ;;  %v1365_v45 = vrot.slane %v1234_v28, 2  ;;  %149 = vst.msk [vmem:[#allocation6 + $0x10] sm:$0xff] %vm94_vm3, %v4481_v11 }
 0x2ee   :  { %v1316_v33 = vrot.slane %v5763_v46, 1  ;;  %v5796_v14 = vpop.permute.xlu2 %4307  ;;  %150 = vst.msk [vmem:[#allocation6 + $0x18] sm:$0xff] %vm94_vm3, %v4481_v11 }
 0x2ef   :  { %4362 = vrot.lane.b32.xlu0 %v4361_v17, %s4480_s20  ;;  %v5777_v6 = vsel %vm313_vm2, %v1364_v24, %v1365_v45  ;;  %151 = vst.msk [vmem:[#allocation6 + $0x20] sm:$0xff] %vm94_vm3, %v4481_v11 }
 0x2f0   :  { %v4376_v12 = vpack.i.bf16 %v5777_v6, %v1363_v59  ;;  %4013 = vmatmul.msk.f32.gmra.mxu3 %vm53_vm13, %v5777_v6  ;;  %v5785_v35 = vsel %vm264_vm1, %v1316_v33, %v1317_v4  ;;  %v2195_v59 = vmax.f32 %v2147_v22, 0.0  ;;  %v1744_v4 = vsel %vm53_vm13, %v5518_v3, %v4270_v18  ;;  %v1922_v3 = vpop.f32.mrf.mxu2  ;;  %152 = vst.msk [vmem:[#allocation6 + $0x28] sm:$0xff] %vm94_vm3, %v4481_v11 }
 0x2f1   :  { %v5759_v44 = vpop.permute.xlu0 %4277  ;;  %v4366_v37 = vpack.i.bf16 %v5785_v35, %v1315_v63  ;;  %v1760_v34 = vsel %vm94_vm3, %v1744_v4, %v4275_v30  ;;  %153 = vst.msk [vmem:[#allocation6 + $0x30] sm:$0xff] %vm94_vm3, %v4481_v11  ;;  %v2153_v30 = vpop.f32.mrf.mxu1 }
 0x2f2   :  { %4377 = vrot.lane.b32.xlu2 %v4376_v12, %s4475_s9  ;;  %v4279_v23 = vunpack.i.l.bf16 %v5759_v44  ;;  %v4280_v24 = vunpack.i.h.bf16 %v5759_v44  ;;  %154 = vst.msk [vmem:[#allocation6 + $0x38] sm:$0xff] %vm94_vm3, %v4481_v11 }
 0x2f3   :  { %4367 = vrot.lane.b32.xlu1 %v4366_v37, %s4474_s0  ;;  %155 = vst.msk [vmem:[#allocation6 + $0x40] sm:$0xff] %vm94_vm3, %v4481_v11 }
 0x2f4   :  { %v5809_v62 = vpop.permute.xlu1 %4282  ;;  %v1776_v53 = vsel %vm1767_vm14, %v1759_v50, %v4279_v23  ;;  %156 = vst.msk [vmem:[#allocation6 + $0x48] sm:$0xff] %vm94_vm3, %v4481_v11 }
 0x2f5   :  { %v4284_v49 = vunpack.i.l.bf16 %v5809_v62  ;;  %v4285_v45 = vunpack.i.h.bf16 %v5809_v62  ;;  %157 = vst.msk [vmem:[#allocation6 + $0x50] sm:$0xff] %vm94_vm3, %v4481_v11 }
 0x2f6   :  { %158 = vst.msk [vmem:[#allocation6 + $0x58] sm:$0xff] %vm94_vm3, %v4481_v11 }
 0x2f7   :  { %v1793_v54 = vsel %vm1784_vm15, %v1776_v53, %v4284_v49 }
 0x2f8   :  { %v1810_v17 = vsel %vm1801_vm0, %v1793_v54, %v4289_v0  ;;  %v4290_v54 = vunpack.i.h.bf16 %v5757_v15 }
 0x2f9   :  { %v2087_v57 = vpop.permute.xlu0 %2086  ;;  %v1163_v1 = vpop.f32.mrf.mxu3 }
 0x2fa   :  { %4026 = vmatmul.msk.f32.gmra.mxu1 %vm53_vm13, %v2087_v57  ;;  %v5818_v40 = vmax.f32 %v1163_v1, 0.0 }
 0x2fb   :  { %4372 = vrot.lane.b32.xlu1 %v4366_v37, %s4476_s10 }
 0x2fc   :  { %1198 = vst.msk [vmem:[#allocation3 + $0x121] sm:$0xff] %vm53_vm13, %v5818_v40 }
 0x2fe   :  { %v2089_v48 = vpop.permute.xlu2 %2088 }
 0x301   :  { %v1984_v60 = vpop.f32.mrf.mxu3 }
 0x302   :  { %4027 = vmatmul.msk.f32.gmra.mxu1 %vm53_vm13, %v2089_v48  ;;  %v1985_v8 = vadd.f32 %v1984_v60, %v1919_v5  ;;  %v1777_v5 = vsel %vm1767_vm14, %v1760_v34, %v4280_v24 }
 0x303   :  { %v5830_v7 = vpop.permute.xlu0 %4292  ;;  %v1235_v33 = vld [vmem:[#allocation3 + $0x120] sm:$0xff]  ;;  %v1236_v27 = vld [vmem:[#allocation3 + $0x128] sm:$0xff]  ;;  %v1794_v22 = vsel %vm1784_vm15, %v1777_v5, %v4285_v45 }
 0x304   :  { %v4294_v55 = vunpack.i.l.bf16 %v5830_v7  ;;  %v2032_v12 = vmax.f32 %v1985_v8, 0.0  ;;  %v4381_v37 = vpack.i.bf16 %v1235_v33, %v5763_v46  ;;  %v1375_v57 = vrot.slane %v1236_v27, 1 }
 0x305   :  { %v1380_v51 = vrot.slane %v1235_v33, 2  ;;  %v1381_v44 = vrot.slane %v1236_v27, 2  ;;  %v1374_v62 = vrot.slane %v1235_v33, 1  ;;  %v4295_v18 = vunpack.i.h.bf16 %v5830_v7 }
 0x306   :  { %v1827_v16 = vsel %vm1818_vm5, %v1810_v17, %v4294_v55  ;;  %v2211_v23 = vadd.f32 %v2195_v59, %v2032_v12  ;;  %4382 = vrot.lane.b32.xlu0 %v4381_v37, %s4477_s17  ;;  %v5904_v17 = vld [vmem:[#allocation3 + $0x138] sm:$0xff]  ;;  %v2197_v27 = vmax.f32 %v2153_v30, 0.0 }
 0x307   :  { %v4298_v63 = vpop.permute.xlu1 %4297  ;;  %v1382_v49 = vsel %vm313_vm2, %v1380_v51, %v1381_v44  ;;  %v1376_v48 = vsel %vm264_vm1, %v1374_v62, %v1375_v57  ;;  %v2156_v51 = vpop.f32.mrf.mxu1 }
 0x308   :  { %v4299_v28 = vunpack.i.l.bf16 %v4298_v63  ;;  %2228 = vst.msk [vmem:[#allocation5 + $0x11] sm:$0xff] %vm53_vm13, %v2211_v23  ;;  %v4391_v50 = vpack.i.bf16 %v1382_v49, %v5777_v6  ;;  %4014 = vmatmul.msk.f32.gmra.mxu3 %vm53_vm13, %v1382_v49  ;;  %v4386_v53 = vpack.i.bf16 %v1376_v48, %v5785_v35  ;;  %v4300_v0 = vunpack.i.h.bf16 %v4298_v63 }
 0x309   :  { %v1987_v55 = vpop.f32.mrf.mxu3  ;;  %v1811_v6 = vsel %vm1801_vm0, %v1794_v22, %v4290_v54  ;;  %v2196_v63 = vmax.f32 %v2150_v41, 0.0  ;;  %v2198_v44 = vmax.f32 %v2156_v51, 0.0 }
 0x30a   :  { %v1844_v1 = vsel %vm1835_vm6, %v1827_v16, %v4299_v28  ;;  %v1988_v59 = vadd.f32 %v1987_v55, %v1922_v3  ;;  %4392 = vrot.lane.b32.xlu2 %v4391_v50, %s4479_s19  ;;  %4387 = vrot.lane.b32.xlu1 %v4386_v53, %s4478_s18  ;;  %v1828_v35 = vsel %vm1818_vm5, %v1811_v6, %v4295_v18  ;;  %v5902_v28 = vld [vmem:[#allocation3 + $0x130] sm:$0xff] }
 0x30b   :  { %1942 = vmatmul.f32.gmra.mxu2 %v1844_v1  ;;  %v1845_v60 = vsel %vm1835_vm6, %v1828_v35, %v4300_v0  ;;  %v1390_v45 = vrot.slane %v5902_v28, 1  ;;  %v4323_v18 = vpop.permute.xlu2 %4322 }
 0x30c   :  { %v2033_v15 = vmax.f32 %v1988_v59, 0.0  ;;  %v4324_v6 = vunpack.i.l.bf16 %v4323_v18 }
 0x30d   :  { %v1925_v7 = vpop.f32.mrf.mxu2 }
 0x30e   :  { %1667 = vrot.lane.b32.xlu0 %v1235_v33, %s4480_s20  ;;  %v2212_v8 = vadd.f32 %v2196_v63, %v2033_v15  ;;  %v1391_v33 = vrot.slane %v5904_v17, 1 }
 0x30f   :  { %v4303_v23 = vpop.permute.xlu1 %4302 }
 0x310   :  { %2229 = vst.msk [vmem:[#allocation5 + $0x21] sm:$0xff] %vm53_vm13, %v2212_v8  ;;  %v1392_v37 = vsel %vm264_vm1, %v1390_v45, %v1391_v33  ;;  %v4304_v5 = vunpack.i.l.bf16 %v4303_v23 }
 0x311   :  { %v1990_v4 = vpop.f32.mrf.mxu3 }
 0x312   :  { %2092 = vrot.lane.b32.xlu2 %v5703_v56, %s4474_s0  ;;  %1715 = vrot.lane.b32.xlu1 %v1376_v48, %s4474_s0  ;;  %v1991_v24 = vadd.f32 %v1990_v4, %v1925_v7 }
 0x313   :  { %1945 = vmatmul.f32.gmra.mxu2 %v1845_v60 }
 0x314   :  { %v2034_v16 = vmax.f32 %v1991_v24, 0.0 }
 0x315   :  { %v1928_v57 = vpop.f32.mrf.mxu2 }
 0x316   :  { %v2213_v12 = vadd.f32 %v2197_v27, %v2034_v16  ;;  %1669 = vrot.lane.b32.xlu0 %v5902_v28, %s4480_s20 }
 0x318   :  { %2230 = vst.msk [vmem:[#allocation5 + $0x31] sm:$0xff] %vm53_vm13, %v2213_v12 }
 0x319   :  { %v1993_v3 = vpop.f32.mrf.mxu3 }
 0x31a   :  { %2094 = vrot.lane.b32.xlu2 %v5739_v58, %s4474_s0  ;;  %1717 = vrot.lane.b32.xlu1 %v1392_v37, %s4474_s0  ;;  %v1994_v11 = vadd.f32 %v1993_v3, %v1928_v57 }
 0x31c   :  { %v2035_v62 = vmax.f32 %v1994_v11, 0.0 }
 0x31e   :  { %v2214_v1 = vadd.f32 %v2198_v44, %v2035_v62  ;;  %2096 = vrot.lane.b32.xlu0 %v5818_v40, %s4474_s0 }
 0x320   :  { %2231 = vst.msk [vmem:[#allocation5 + $0x41] sm:$0xff] %vm53_vm13, %v2214_v1  ;;  %v4313_v34 = vpop.permute.xlu0 %4312 }
 0x321   :  { %v4314_v49 = vunpack.i.l.bf16 %v4313_v34  ;;  %v4315_v63 = vunpack.i.h.bf16 %v4313_v34 }
 0x322   :  { %2614 = vrot.lane.b32.xlu2 %v5228_v29, %s4480_s20  ;;  %2612 = vrot.lane.b32.xlu1 %v5200_v61, %s4480_s20  ;;  %v2159_v29 = vpop.f32.mrf.mxu1  ;;  %v1996_v61 = vpop.f32.mrf.mxu3 }
 0x323   :  { %v2199_v50 = vmax.f32 %v2159_v29, 0.0 }
 0x326   :  { %2616 = vrot.lane.b32.xlu0 %v5259_v2, %s4480_s20  ;;  %v4318_v2 = vpop.permute.xlu1 %4317 }
 0x327   :  { %v4319_v22 = vunpack.i.l.bf16 %v4318_v2  ;;  %v4320_v24 = vunpack.i.h.bf16 %v4318_v2 }
 0x32a   :  { %2620 = vrot.lane.b32.xlu2 %v5322_v47, %s4480_s20  ;;  %2618 = vrot.lane.b32.xlu1 %v5292_v39, %s4480_s20  ;;  %v1745_v39 = vsel %vm53_vm13, %v5544_v43, %v4304_v5  ;;  %v1999_v15 = vpop.f32.mrf.mxu3 }
 0x32e   :  { %2622 = vrot.lane.b32.xlu0 %v5348_v26, %s4480_s20  ;;  %v2091_v41 = vpop.permute.xlu0 %2090  ;;  %v4309_v26 = vunpack.i.l.bf16 %v5796_v14 }
 0x32f   :  { %4028 = vmatmul.msk.f32.gmra.mxu1 %vm53_vm13, %v2091_v41 }
 0x330   :  { %v1761_v54 = vsel %vm94_vm3, %v1745_v39, %v4309_v26 }
 0x331   :  { %v1778_v55 = vsel %vm1767_vm14, %v1761_v54, %v4314_v49 }
 0x332   :  { %2626 = vrot.lane.b32.xlu2 %v5445_v25, %s4480_s20  ;;  %2624 = vrot.lane.b32.xlu1 %v5401_v52, %s4480_s20  ;;  %v4305_v25 = vunpack.i.h.bf16 %v4303_v23  ;;  %v1795_v43 = vsel %vm1784_vm15, %v1778_v55, %v4319_v22 }
 0x333   :  { %v1812_v8 = vsel %vm1801_vm0, %v1795_v43, %v4324_v6 }
 0x334   :  { %v1746_v35 = vsel %vm53_vm13, %v5589_v42, %v4305_v25 }
 0x336   :  { %2628 = vrot.lane.b32.xlu0 %v5496_v36, %s4480_s20  ;;  %v2162_v36 = vpop.f32.mrf.mxu1 }
 0x337   :  { %v2200_v45 = vmax.f32 %v2162_v36, 0.0 }
 0x338   :  { %v4328_v52 = vpop.permute.xlu0 %4327 }
 0x339   :  { %v4329_v59 = vunpack.i.l.bf16 %v4328_v52  ;;  %v4330_v57 = vunpack.i.h.bf16 %v4328_v52 }
 0x33a   :  { %2632 = vrot.lane.b32.xlu2 %v5569_v38, %s4480_s20  ;;  %2630 = vrot.lane.b32.xlu1 %v5530_v20, %s4480_s20  ;;  %v4310_v38 = vunpack.i.h.bf16 %v5796_v14 }
 0x33b   :  { %v1931_v47 = vpop.f32.mrf.mxu2  ;;  %v1829_v20 = vsel %vm1818_vm5, %v1812_v8, %v4329_v59 }
 0x33c   :  { %v1997_v48 = vadd.f32 %v1996_v61, %v1931_v47  ;;  %v4333_v7 = vpop.permute.xlu1 %4332  ;;  %v1762_v42 = vsel %vm94_vm3, %v1746_v35, %v4310_v38  ;;  %v2246_v38 = vld [vmem:[#allocation5 + $0x10] sm:$0xff] }
 0x33d   :  { %v4334_v30 = vunpack.i.l.bf16 %v4333_v7  ;;  %v1779_v16 = vsel %vm1767_vm14, %v1762_v42, %v4315_v63  ;;  %v4335_v14 = vunpack.i.h.bf16 %v4333_v7 }
 0x33e   :  { %v2036_v53 = vmax.f32 %v1997_v48, 0.0  ;;  %2634 = vrot.lane.b32.xlu0 %v5612_v32, %s4480_s20  ;;  %v1796_v37 = vsel %vm1784_vm15, %v1779_v16, %v4320_v24  ;;  %v4325_v32 = vunpack.i.h.bf16 %v4323_v18  ;;  %v2165_v44 = vpop.f32.mrf.mxu1  ;;  %v2245_v18 = vld [vmem:[#allocation5 + $0x8] sm:$0xff]  ;;  %v2247_v24 = vld [vmem:[#allocation5 + $0x18] sm:$0xff] }
 0x33f   :  { %v1846_v33 = vsel %vm1835_vm6, %v1829_v20, %v4334_v30  ;;  %v2201_v34 = vmax.f32 %v2165_v44, 0.0  ;;  %v2317_v43 = vrot.slane %v2245_v18, 1  ;;  %v2397_v8 = vrot.slane %v2245_v18, 2 }
 0x340   :  { %v2215_v0 = vadd.f32 %v2199_v50, %v2036_v53  ;;  %1948 = vmatmul.f32.gmra.mxu2 %v1846_v33  ;;  %v1813_v51 = vsel %vm1801_vm0, %v1796_v37, %v4325_v32  ;;  %v2244_v53 = vld [vmem:[#allocation5] sm:$0xff]  ;;  %v2319_v32 = vrot.slane %v2246_v38, 1 }
 0x341   :  { %v1830_v3 = vsel %vm1818_vm5, %v1813_v51, %v4330_v57  ;;  %v2396_v30 = vrot.slane %v2244_v53, 2 }
 0x342   :  { %2232 = vst.msk [vmem:[#allocation5 + $0x51] sm:$0xff] %vm53_vm13, %v2215_v0  ;;  %2638 = vrot.lane.b32.xlu2 %v5703_v56, %s4480_s20  ;;  %2636 = vrot.lane.b32.xlu1 %v5664_v13, %s4480_s20  ;;  %v1847_v11 = vsel %vm1835_vm6, %v1830_v3, %v4335_v14  ;;  %v4343_v56 = vpop.permute.xlu2 %4342  ;;  %v2002_v13 = vpop.f32.mrf.mxu3  ;;  %v2316_v0 = vrot.slane %v2244_v53, 1  ;;  %v2320_v14 = vrot.slane %v2247_v24, 1 }
 0x343   :  { %v1934_v60 = vpop.f32.mrf.mxu2  ;;  %v4344_v52 = vunpack.i.l.bf16 %v4343_v56  ;;  %v4345_v42 = vunpack.i.h.bf16 %v4343_v56  ;;  %v2398_v51 = vsel %vm313_vm2, %v2396_v30, %v2397_v8  ;;  %v1396_v56 = vrot.slane %v5902_v28, 2 }
 0x344   :  { %v2000_v4 = vadd.f32 %v1999_v15, %v1934_v60  ;;  %v4338_v29 = vpop.permute.xlu1 %4337 }
 0x345   :  { %v4339_v49 = vunpack.i.l.bf16 %v4338_v29  ;;  %v4340_v6 = vunpack.i.h.bf16 %v4338_v29 }
 0x346   :  { %v2037_v27 = vmax.f32 %v2000_v4, 0.0  ;;  %2640 = vrot.lane.b32.xlu0 %v5739_v58, %s4480_s20  ;;  %v2168_v58 = vpop.f32.mrf.mxu1 }
 0x347   :  { %v1747_v25 = vsel %vm53_vm13, %v5621_v21, %v4339_v49  ;;  %v2318_v21 = vsel %vm264_vm1, %v2316_v0, %v2317_v43  ;;  %v1748_v20 = vsel %vm53_vm13, %v5674_v31, %v4340_v6  ;;  %v6028_v6 = vld [vmem:[#allocation5 + $0x48] sm:$0xff] }
 0x348   :  { %v2216_v12 = vadd.f32 %v2200_v45, %v2037_v27  ;;  %1951 = vmatmul.f32.gmra.mxu2 %v1847_v11  ;;  %v1763_v59 = vsel %vm94_vm3, %v1747_v25, %v4344_v52  ;;  %v2380_v37 = vmax.f32 %v2244_v53, %v2318_v21  ;;  %v1764_v3 = vsel %vm94_vm3, %v1748_v20, %v4345_v42  ;;  %v2251_v53 = vld [vmem:[#allocation5 + $0x38] sm:$0xff] }
 0x349   :  { %v2326_v43 = vrot.slane %v2251_v53, 1 }
 0x34a   :  { %2233 = vst.msk [vmem:[#allocation5 + $0x61] sm:$0xff] %vm53_vm13, %v2216_v12  ;;  %2642 = vrot.lane.b32.xlu1 %v5818_v40, %s4480_s20  ;;  %v5981_v41 = vpop.permute.xlu2 %4357  ;;  %v2005_v61 = vpop.f32.mrf.mxu3  ;;  %v2202_v40 = vmax.f32 %v2168_v58, 0.0  ;;  %v2249_v58 = vld [vmem:[#allocation5 + $0x28] sm:$0xff] }
 0x34b   :  { %v4348_v47 = vpop.permute.xlu0 %4347  ;;  %v4359_v60 = vunpack.i.l.bf16 %v5981_v41 }
 0x34c   :  { %v4349_v54 = vunpack.i.l.bf16 %v4348_v47  ;;  %v4350_v45 = vunpack.i.h.bf16 %v4348_v47  ;;  %v1397_v47 = vrot.slane %v5904_v17, 2 }
 0x34e   :  { %v4353_v22 = vpop.permute.xlu1 %4352  ;;  %v1780_v15 = vsel %vm1767_vm14, %v1763_v59, %v4349_v54  ;;  %v1781_v31 = vsel %vm1767_vm14, %v1764_v3, %v4350_v45  ;;  %v2329_v45 = vrot.slane %v6028_v6, 1 }
 0x34f   :  { %v4354_v55 = vunpack.i.l.bf16 %v4353_v22  ;;  %v4355_v16 = vunpack.i.h.bf16 %v4353_v22  ;;  %v2323_v22 = vrot.slane %v2249_v58, 1 }
 0x351   :  { %v1797_v35 = vsel %vm1784_vm15, %v1780_v15, %v4354_v55  ;;  %v1798_v11 = vsel %vm1784_vm15, %v1781_v31, %v4355_v16 }
 0x352   :  { %v5984_v26 = vpop.permute.xlu2 %4377  ;;  %v1814_v27 = vsel %vm1801_vm0, %v1797_v35, %v4359_v60  ;;  %v2403_v35 = vrot.slane %v2249_v58, 2 }
 0x353   :  { %v4379_v16 = vunpack.i.l.bf16 %v5984_v26 }
 0x355   :  { %v1937_v62 = vpop.f32.mrf.mxu2 }
 0x356   :  { %v2003_v1 = vadd.f32 %v2002_v13, %v1937_v62  ;;  %v2460_v13 = vmax.f32 %v2380_v37, %v2398_v51  ;;  %v4360_v62 = vunpack.i.h.bf16 %v5981_v41 }
 0x358   :  { %v2038_v23 = vmax.f32 %v2003_v1, 0.0  ;;  %v1815_v29 = vsel %vm1801_vm0, %v1798_v11, %v4360_v62  ;;  %v2476_v28 = vmax.f32 %v2460_v13, %v2246_v38  ;;  %v6066_v11 = vld [vmem:[#allocation5 + $0x68] sm:$0xff] }
 0x35a   :  { %v2217_v5 = vadd.f32 %v2201_v34, %v2038_v23  ;;  %v2321_v23 = vsel %vm264_vm1, %v2319_v32, %v2320_v14  ;;  %v6055_v32 = vld [vmem:[#allocation5 + $0x58] sm:$0xff]  ;;  %v6057_v14 = vld [vmem:[#allocation5 + $0x60] sm:$0xff] }
 0x35b   :  { %v2381_v49 = vmax.f32 %v2246_v38, %v2321_v23  ;;  %v2504_v54 = vmax.f32 %v2476_v28, %v2321_v23  ;;  %v2334_v58 = vrot.slane %v6057_v14, 1 }
 0x35c   :  { %2234 = vst.msk [vmem:[#allocation5 + $0x71] sm:$0xff] %vm53_vm13, %v2217_v5  ;;  %v2248_v5 = vld [vmem:[#allocation5 + $0x20] sm:$0xff] }
 0x35d   :  { %v1940_v2 = vpop.f32.mrf.mxu2  ;;  %v2402_v15 = vrot.slane %v2248_v5, 2 }
 0x35e   :  { %v2006_v39 = vadd.f32 %v2005_v61, %v1940_v2  ;;  %v2399_v61 = vrot.slane %v2246_v38, 2  ;;  %v2400_v2 = vrot.slane %v2247_v24, 2  ;;  %v2406_v24 = vrot.slane %v2251_v53, 2 }
 0x360   :  { %v2039_v48 = vmax.f32 %v2006_v39, 0.0  ;;  %v2401_v18 = vsel %vm313_vm2, %v2399_v61, %v2400_v2 }
 0x361   :  { %v4363_v36 = vpop.permute.xlu0 %4362  ;;  %v2461_v17 = vmax.f32 %v2381_v49, %v2401_v18  ;;  %v2528_v60 = vmax.f32 %v2504_v54, %v2401_v18 }
 0x362   :  { %v2218_v50 = vadd.f32 %v2202_v40, %v2039_v48  ;;  %v4364_v7 = vunpack.i.l.bf16 %v4363_v36  ;;  %v4365_v44 = vunpack.i.h.bf16 %v4363_v36  ;;  %v1398_v40 = vsel %vm313_vm2, %v1396_v56, %v1397_v47  ;;  %v6026_v36 = vld [vmem:[#allocation5 + $0x40] sm:$0xff] }
 0x363   :  { %v2322_v48 = vrot.slane %v2248_v5, 1  ;;  %4015 = vmatmul.msk.f32.gmra.mxu3 %vm53_vm13, %v1398_v40  ;;  %v2328_v38 = vrot.slane %v6026_v36, 1  ;;  %v6038_v20 = vld [vmem:[#allocation5 + $0x70] sm:$0xff]  ;;  %v6059_v51 = vmax.f32 %v2528_v60, %v2248_v5  ;;  %v2408_v18 = vrot.slane %v6026_v36, 2 }
 0x364   :  { %2235 = vst.msk [vmem:[#allocation5 + $0x81] sm:$0xff] %vm53_vm13, %v2218_v50  ;;  %v5993_v63 = vpop.permute.xlu2 %4392  ;;  %v1831_v12 = vsel %vm1818_vm5, %v1814_v27, %v4364_v7  ;;  %v1832_v39 = vsel %vm1818_vm5, %v1815_v29, %v4365_v44  ;;  %v6015_v50 = vld [vmem:[#allocation5 + $0x30] sm:$0xff]  ;;  %v2477_v7 = vmax.f32 %v2461_v17, %v2248_v5  ;;  %v2337_v44 = vrot.slane %v6038_v20, 1 }
 0x365   :  { %v4368_v4 = vpop.permute.xlu1 %4367  ;;  %v6022_v55 = vsel %vm264_vm1, %v2322_v48, %v2323_v22  ;;  %v2325_v0 = vrot.slane %v6015_v50, 1  ;;  %v2405_v8 = vrot.slane %v6015_v50, 2  ;;  %v4394_v61 = vunpack.i.l.bf16 %v5993_v63 }
 0x366   :  { %v4369_v33 = vunpack.i.l.bf16 %v4368_v4  ;;  %v4370_v1 = vunpack.i.h.bf16 %v4368_v4  ;;  %v2382_v30 = vmax.f32 %v2248_v5, %v6022_v55  ;;  %v6051_v37 = vmax.f32 %v2477_v7, %v6022_v55 }
 0x367   :  { %v6035_v4 = vsel %vm264_vm1, %v2325_v0, %v2326_v43  ;;  %v6072_v62 = vsel %vm313_vm2, %v2405_v8, %v2406_v24  ;;  %v2332_v5 = vrot.slane %v6055_v32, 1 }
 0x368   :  { %v1848_v57 = vsel %vm1835_vm6, %v1831_v12, %v4369_v33  ;;  %v1849_v41 = vsel %vm1835_vm6, %v1832_v39, %v4370_v1  ;;  %v6041_v33 = vld [vmem:[#allocation5 + $0x78] sm:$0xff]  ;;  %v6048_v12 = vsel %vm313_vm2, %v2402_v15, %v2403_v35  ;;  %v2335_v39 = vrot.slane %v6066_v11, 1 }
 0x369   :  { %1954 = vmatmul.f32.gmra.mxu2 %v1848_v57  ;;  %v6053_v57 = vld [vmem:[#allocation5 + $0x50] sm:$0xff]  ;;  %v6064_v3 = vmax.f32 %v2382_v30, %v6048_v12  ;;  %v2338_v13 = vrot.slane %v6041_v33, 1  ;;  %v2418_v0 = vrot.slane %v6041_v33, 2  ;;  %v4380_v35 = vunpack.i.h.bf16 %v5984_v26  ;;  %v2171_v26 = vpop.f32.mrf.mxu1 }
 0x36a   :  { %v2331_v29 = vrot.slane %v6053_v57, 1  ;;  %v2411_v54 = vrot.slane %v6053_v57, 2  ;;  %v6110_v15 = vsel %vm264_vm1, %v2334_v58, %v2335_v39  ;;  %v2412_v30 = vrot.slane %v6055_v32, 2  ;;  %v2869_v32 = vld [vmem:[%s6679_s1 + $0xd8] sm:$0xff] }
 0x36b   :  { %v2478_v28 = vmax.f32 %v6064_v3, %v6015_v50  ;;  %v6093_v48 = vsel %vm264_vm1, %v2337_v44, %v2338_v13  ;;  %v6124_v33 = vld [vmem:[#allocation5 + $0x88] sm:$0xff]  ;;  %2991 = vmatpush.msra.mxu3 %v2869_v32  ;;  %v2262_v32 = vld [vmem:[#allocation5 + $0x90] sm:$0xff] }
 0x36c   :  { %v2093_v34 = vpop.permute.xlu2 %2092  ;;  %v6101_v17 = vsel %vm264_vm1, %v2331_v29, %v2332_v5  ;;  %v6144_v13 = vsel %vm313_vm2, %v2411_v54, %v2412_v30  ;;  %v2497_v29 = vrot.slane %v6124_v33, 1  ;;  %v4395_v5 = vunpack.i.h.bf16 %v5993_v63 }
 0x36d   :  { %4029 = vmatmul.msk.f32.gmra.mxu1 %vm53_vm13, %v2093_v34  ;;  %v6018_v25 = vpop.permute.xlu1 %4372  ;;  %v6075_v34 = vsel %vm264_vm1, %v2328_v38, %v2329_v45  ;;  %v2385_v38 = vmax.f32 %v6053_v57, %v6101_v17  ;;  %v6122_v45 = vld [vmem:[#allocation5 + $0x80] sm:$0xff] }
 0x36e   :  { %v4374_v59 = vunpack.i.l.bf16 %v6018_v25  ;;  %v4375_v2 = vunpack.i.h.bf16 %v6018_v25  ;;  %v2384_v53 = vmax.f32 %v6026_v36, %v6075_v34  ;;  %v2409_v25 = vrot.slane %v6028_v6, 2 }
 0x36f   :  { %v2387_v6 = vmax.f32 %v6038_v20, %v6093_v48 }
 0x370   :  { %v1749_v27 = vsel %vm53_vm13, %v5713_v19, %v4374_v59  ;;  %v2383_v19 = vmax.f32 %v6015_v50, %v6035_v4  ;;  %v1750_v43 = vsel %vm53_vm13, %v5763_v46, %v4375_v2  ;;  %v2414_v46 = vrot.slane %v6057_v14, 2 }
 0x371   :  { %1957 = vmatmul.f32.gmra.mxu2 %v1849_v41  ;;  %v1765_v56 = vsel %vm94_vm3, %v1749_v27, %v4379_v16  ;;  %v2529_v41 = vmax.f32 %v6051_v37, %v6048_v12  ;;  %v1766_v27 = vsel %vm94_vm3, %v1750_v43, %v4380_v35  ;;  %v6130_v16 = vsel %vm313_vm2, %v2408_v18, %v2409_v25 }
 0x372   :  { %v6086_v49 = vmax.f32 %v2383_v19, %v6072_v62  ;;  %v2008_v19 = vpop.f32.mrf.mxu3  ;;  %v2203_v18 = vmax.f32 %v2171_v26, 0.0 }
 0x373   :  { %v2545_v63 = vmax.f32 %v2529_v41, %v6015_v50 }
 0x374   :  { %v2095_v52 = vpop.permute.xlu2 %2094 }
 0x375   :  { %4030 = vmatmul.msk.f32.gmra.mxu1 %vm53_vm13, %v2095_v52  ;;  %v2417_v52 = vrot.slane %v6038_v20, 2 }
 0x377   :  { %v6133_v37 = vsel %vm313_vm2, %v2417_v52, %v2418_v0  ;;  %v2868_v52 = vld [vmem:[%s6679_s1 + $0xd0] sm:$0xff] }
 0x378   :  { %v6030_v21 = vpop.permute.xlu0 %4382  ;;  %v2467_v44 = vmax.f32 %v2387_v6, %v6133_v37  ;;  %2992 = vmatpush.msra.mxu3 %v2868_v52 }
 0x379   :  { %v4384_v42 = vunpack.i.l.bf16 %v6030_v21  ;;  %v4385_v59 = vunpack.i.h.bf16 %v6030_v21  ;;  %v2415_v21 = vrot.slane %v6066_v11, 2  ;;  %v2464_v11 = vmax.f32 %v2384_v53, %v6130_v16 }
 0x37a   :  { %v2483_v54 = vmax.f32 %v2467_v44, %v6122_v45  ;;  %v2011_v26 = vpop.f32.mrf.mxu3 }
 0x37b   :  { %v1782_v23 = vsel %vm1767_vm14, %v1765_v56, %v4384_v42  ;;  %v2386_v42 = vmax.f32 %v6057_v14, %v6110_v15  ;;  %v1783_v3 = vsel %vm1767_vm14, %v1766_v27, %v4385_v59  ;;  %v6151_v58 = vsel %vm313_vm2, %v2414_v46, %v2415_v21  ;;  %v2174_v46 = vpop.f32.mrf.mxu1 }
 0x37c   :  { %v4388_v31 = vpop.permute.xlu1 %4387  ;;  %v2480_v2 = vmax.f32 %v2464_v11, %v6053_v57  ;;  %v2615_v39 = vpop.permute.xlu2 %2614  ;;  %vm2946_vm14 = vcmask 1047559  }
 0x37d   :  { %v4389_v1 = vunpack.i.l.bf16 %v4388_v31  ;;  %v4390_v7 = vunpack.i.h.bf16 %v4388_v31  ;;  %v2479_v31 = vmax.f32 %v6086_v49, %v6026_v36  ;;  %v2506_v49 = vmax.f32 %v2478_v28, %v6035_v4 }
 0x37e   :  { %v2508_v41 = vmax.f32 %v2480_v2, %v6101_v17 }
 0x37f   :  { %v1799_v47 = vsel %vm1784_vm15, %v1782_v23, %v4389_v1  ;;  %v1800_v1 = vsel %vm1784_vm15, %v1783_v3, %v4390_v7  ;;  %v2496_v23 = vrot.slane %v6122_v45, 1  ;;  %v2507_v6 = vmax.f32 %v2479_v31, %v6075_v34 }
 0x380   :  { %v1668_v40 = vpop.permute.xlu0 %1667  ;;  %v1816_v22 = vsel %vm1801_vm0, %v1799_v47, %v4394_v61  ;;  %v2465_v61 = vmax.f32 %v2385_v38, %v6144_v13  ;;  %v1817_v25 = vsel %vm1801_vm0, %v1800_v1, %v4395_v5  ;;  %v2530_v35 = vmax.f32 %v2506_v49, %v6072_v62 }
 0x381   :  { %v1833_v60 = vsel %vm1818_vm5, %v1816_v22, %v1668_v40  ;;  %v2466_v40 = vmax.f32 %v2386_v42, %v6151_v58  ;;  %v2572_v22 = vmax.f32 %v6059_v51, %v6022_v55  ;;  %v6168_v43 = vsel %vm264_vm1, %v2496_v23, %v2497_v29 }
 0x382   :  { %v2481_v50 = vmax.f32 %v2465_v61, %v6057_v14  ;;  %v2520_v7 = vrot.slane %v6122_v45, 2  ;;  %v2511_v38 = vmax.f32 %v2483_v54, %v6168_v43  ;;  %v2532_v42 = vmax.f32 %v2508_v41, %v6144_v13 }
 0x383   :  { %v2482_v0 = vmax.f32 %v2466_v40, %v6038_v20  ;;  %v2596_v31 = vmax.f32 %v2572_v22, %v6048_v12  ;;  %v2546_v11 = vmax.f32 %v2530_v35, %v6026_v36  ;;  %v2564_v61 = vrot.slane %v2262_v32, 1 }
 0x384   :  { %v1716_v8 = vpop.permute.xlu1 %1715  ;;  %v2509_v27 = vmax.f32 %v2481_v50, %v6110_v15  ;;  %v2621_v5 = vpop.permute.xlu2 %2620  ;;  %v2548_v12 = vmax.f32 %v2532_v42, %v6057_v14  ;;  %vm3094_vm0 = vcmask 1041408  }
 0x385   :  { %v1850_v24 = vsel %vm1835_vm6, %v1833_v60, %v1716_v8  ;;  %v2521_v60 = vrot.slane %v6124_v33, 2  ;;  %v2573_v8 = vmax.f32 %v2545_v63, %v6035_v4  ;;  %v2531_v33 = vmax.f32 %v2507_v6, %v6130_v16 }
 0x386   :  { %1960 = vmatmul.f32.gmra.mxu2 %v1850_v24  ;;  %v2510_v24 = vmax.f32 %v2482_v0, %v6093_v48  ;;  %v2574_v22 = vmax.f32 %v2546_v11, %v6075_v34  ;;  %v2588_v0 = vrot.slane %v2262_v32, 2  ;;  %v2576_v14 = vmax.f32 %v2548_v12, %v6110_v15 }
 0x387   :  { %v2522_v3 = vsel %vm313_vm2, %v2520_v7, %v2521_v60  ;;  %v2597_v1 = vmax.f32 %v2573_v8, %v6072_v62  ;;  %v2547_v29 = vmax.f32 %v2531_v33, %v6053_v57 }
 0x388   :  { %v1670_v56 = vpop.permute.xlu0 %1669  ;;  %v2535_v23 = vmax.f32 %v2511_v38, %v2522_v3  ;;  %v2534_v40 = vmax.f32 %v2510_v24, %v6133_v37  ;;  %v2600_v60 = vmax.f32 %v2576_v14, %v6151_v58 }
 0x389   :  { %v1834_v28 = vsel %vm1818_vm5, %v1817_v25, %v1670_v56  ;;  %v2204_v56 = vmax.f32 %v2174_v46, 0.0  ;;  %v2575_v57 = vmax.f32 %v2547_v29, %v6101_v17 }
 0x38a   :  { %v2551_v62 = vmax.f32 %v2535_v23, %v2262_v32 }
 0x38b   :  { %v2599_v35 = vmax.f32 %v2575_v57, %v6144_v13 }
 0x38c   :  { %v1718_v55 = vpop.permute.xlu1 %1717 }
 0x38d   :  { %v1851_v59 = vsel %vm1835_vm6, %v1834_v28, %v1718_v55  ;;  %vm3095_vm6 = vcmask 1045508  }
 0x38e   :  { %v1943_v47 = vpop.f32.mrf.mxu2  ;;  %1963 = vmatmul.f32.gmra.mxu2 %v1851_v59 }
 0x38f   :  { %v2009_v53 = vadd.f32 %v2008_v19, %v1943_v47  ;;  %v2263_v19 = vld [vmem:[#allocation5 + $0x98] sm:$0xff] }
 0x390   :  { %v2097_v21 = vpop.permute.xlu0 %2096  ;;  %v2565_v2 = vrot.slane %v2263_v19, 1  ;;  %v2589_v28 = vrot.slane %v2263_v19, 2 }
 0x391   :  { %v2040_v51 = vmax.f32 %v2009_v53, 0.0  ;;  %4031 = vmatmul.msk.f32.gmra.mxu1 %vm53_vm13, %v2097_v21  ;;  %v2661_v53 = vadd.f32 %v2615_v39, %v2597_v1  ;;  %v2550_v39 = vmax.f32 %v2534_v40, %v6122_v45  ;;  %v2627_v45 = vpop.permute.xlu2 %2626 }
 0x392   :  { %v2566_v52 = vsel %vm264_vm1, %v2564_v61, %v2565_v2  ;;  %v2590_v17 = vsel %vm313_vm2, %v2588_v0, %v2589_v28 }
 0x393   :  { %v2219_v30 = vadd.f32 %v2203_v18, %v2040_v51  ;;  %v2533_v18 = vmax.f32 %v2509_v27, %v6151_v58  ;;  %v2579_v34 = vmax.f32 %v2551_v62, %v2566_v52  ;;  %v2578_v7 = vmax.f32 %v2550_v39, %v6168_v43 }
 0x394   :  { %v2613_v47 = vpop.permute.xlu1 %2612 }
 0x395   :  { %2236 = vst.msk [vmem:[#allocation5 + $0xb1] sm:$0xff] %vm53_vm13, %v2219_v30  ;;  %v2660_v36 = vadd.f32 %v2613_v47, %v2596_v31  ;;  %v2549_v54 = vmax.f32 %v2533_v18, %v6038_v20  ;;  %v2598_v20 = vmax.f32 %v2574_v22, %v6130_v16  ;;  %v2603_v46 = vmax.f32 %v2579_v34, %v2590_v17 }
 0x396   :  { %v1946_v4 = vpop.f32.mrf.mxu2  ;;  %v2602_v42 = vmax.f32 %v2578_v7, %v2522_v3 }
 0x397   :  { %v2012_v44 = vadd.f32 %v2011_v26, %v1946_v4  ;;  %v2676_v25 = vmax.f32 %v2660_v36, %v2661_v53  ;;  %v2577_v59 = vmax.f32 %v2549_v54, %v6093_v48  ;;  %v2664_v26 = vadd.f32 %v2621_v5, %v2600_v60 }
 0x398   :  { %v2617_v55 = vpop.permute.xlu0 %2616  ;;  %v2667_v32 = vadd.f32 %v2627_v45, %v2603_v46 }
 0x399   :  { %v2041_v49 = vmax.f32 %v2012_v44, 0.0  ;;  %v2692_v51 = vrot.slane %v2676_v25, 2  ;;  %v2693_v50 = vrot.slane %v2676_v25, 4  ;;  %v2694_v41 = vrot.slane %v2676_v25, 6 }
 0x39a   :  { %v4032_v30 = vrot.slane %v2676_v25, 9  ;;  %v2662_v8 = vadd.f32 %v2617_v55, %v2598_v20  ;;  %v2601_v48 = vmax.f32 %v2577_v59, %v6133_v37 }
 0x39b   :  { %v2220_v63 = vadd.f32 %v2204_v56, %v2041_v49  ;;  %v4033_v15 = vrot.slane %v2692_v51, 9  ;;  %v4034_v21 = vrot.slane %v2693_v50, 9  ;;  %v4035_v24 = vrot.slane %v2694_v41, 9 }
 0x39c   :  { %v2619_v6 = vpop.permute.xlu1 %2618  ;;  %v2836_v43 = vmax.f32 %v2676_v25, %v4032_v30 }
 0x39d   :  { %2237 = vst.msk [vmem:[#allocation5 + $0xc1] sm:$0xff] %vm53_vm13, %v2220_v63  ;;  %v2663_v38 = vadd.f32 %v2619_v6, %v2599_v35  ;;  %v2837_v58 = vmax.f32 %v2692_v51, %v4033_v15  ;;  %v2838_v4 = vmax.f32 %v2693_v50, %v4034_v21  ;;  %v2839_v31 = vmax.f32 %v2694_v41, %v4035_v24 }
 0x39e   :  { %v2902_v2 = vperm.slane %v2836_v43, 0 }
 0x39f   :  { %v2677_v27 = vmax.f32 %v2662_v8, %v2663_v38  ;;  %v2903_v47 = vperm.slane %v2837_v58, 0  ;;  %v2904_v40 = vperm.slane %v2838_v4, 0  ;;  %v2905_v36 = vperm.slane %v2839_v31, 0 }
 0x3a0   :  { %v2623_v16 = vpop.permute.xlu0 %2622 }
 0x3a1   :  { %v2665_v13 = vadd.f32 %v2623_v16, %v2601_v48  ;;  %v2695_v19 = vrot.slane %v2677_v27, 2  ;;  %v4036_v33 = vrot.slane %v2677_v27, 9  ;;  %v2696_v1 = vrot.slane %v2677_v27, 4 }
 0x3a2   :  { %v2697_v23 = vrot.slane %v2677_v27, 6  ;;  %v2935_v34 = vsel %vm2934_vm7, %v2903_v47, %v2902_v2  ;;  %v2267_v2 = vld [vmem:[#allocation5 + $0xb8] sm:$0xff] }
 0x3a3   :  { %v2678_v11 = vmax.f32 %v2664_v26, %v2665_v13  ;;  %v4037_v44 = vrot.slane %v2695_v19, 9  ;;  %v2840_v56 = vmax.f32 %v2677_v27, %v4036_v33  ;;  %v4038_v63 = vrot.slane %v2696_v1, 9 }
 0x3a4   :  { %v2625_v37 = vpop.permute.xlu1 %2624  ;;  %v4039_v62 = vrot.slane %v2697_v23, 9  ;;  %v2937_v17 = vsel %vm2936_vm8, %v2904_v40, %v2935_v34 }
 0x3a5   :  { %v2698_v3 = vrot.slane %v2678_v11, 2  ;;  %v2699_v29 = vrot.slane %v2678_v11, 4  ;;  %v2700_v5 = vrot.slane %v2678_v11, 6  ;;  %v4040_v61 = vrot.slane %v2678_v11, 9 }
 0x3a6   :  { %v2666_v49 = vadd.f32 %v2625_v37, %v2602_v42  ;;  %v2906_v25 = vperm.slane %v2840_v56, 0  ;;  %v2841_v52 = vmax.f32 %v2695_v19, %v4037_v44  ;;  %v2842_v55 = vmax.f32 %v2696_v1, %v4038_v63  ;;  %v2177_v37 = vpop.f32.mrf.mxu1  ;;  %v2014_v1 = vpop.f32.mrf.mxu3 }
 0x3a7   :  { %v4041_v53 = vrot.slane %v2698_v3, 9  ;;  %v4042_v18 = vrot.slane %v2699_v29, 9  ;;  %v2844_v12 = vmax.f32 %v2678_v11, %v4040_v61  ;;  %v4043_v57 = vrot.slane %v2700_v5, 9  ;;  %v2266_v61 = vld [vmem:[#allocation5 + $0xb0] sm:$0xff] }
 0x3a8   :  { %v2679_v22 = vmax.f32 %v2666_v49, %v2667_v32  ;;  %v2843_v39 = vmax.f32 %v2697_v23, %v4039_v62  ;;  %v2907_v51 = vperm.slane %v2841_v52, 0  ;;  %v2908_v59 = vperm.slane %v2842_v55, 0 }
 0x3a9   :  { %v2845_v54 = vmax.f32 %v2698_v3, %v4041_v53  ;;  %v2846_v0 = vmax.f32 %v2699_v29, %v4042_v18  ;;  %v2910_v14 = vperm.slane %v2844_v12, 0  ;;  %v2939_v35 = vsel %vm2938_vm9, %v2905_v36, %v2937_v17  ;;  %v2264_v3 = vld [vmem:[#allocation5 + $0xa0] sm:$0xff]  ;;  %v2265_v29 = vld [vmem:[#allocation5 + $0xa8] sm:$0xff] }
 0x3aa   :  { %v4044_v28 = vrot.slane %v2679_v22, 9  ;;  %v2701_v50 = vrot.slane %v2679_v22, 2  ;;  %v2702_v20 = vrot.slane %v2679_v22, 4  ;;  %v2909_v6 = vperm.slane %v2843_v39, 0  ;;  %v2269_v17 = vld [vmem:[#allocation5 + $0xc8] sm:$0xff] }
 0x3ab   :  { %v2911_v41 = vperm.slane %v2845_v54, 0  ;;  %v2703_v7 = vrot.slane %v2679_v22, 6  ;;  %v2941_v45 = vsel %vm2940_vm10, %v2906_v25, %v2939_v35  ;;  %v2847_v15 = vmax.f32 %v2700_v5, %v4043_v57 }
 0x3ac   :  { %v4045_v60 = vrot.slane %v2701_v50, 9  ;;  %v4046_v30 = vrot.slane %v2702_v20, 9  ;;  %v2848_v8 = vmax.f32 %v2679_v22, %v4044_v28  ;;  %v2943_v38 = vsel %vm2942_vm11, %v2907_v51, %v2941_v45 }
 0x3ad   :  { %v4047_v46 = vrot.slane %v2703_v7, 9  ;;  %v2912_v24 = vperm.slane %v2846_v0, 0  ;;  %v2945_v48 = vsel %vm2944_vm12, %v2908_v59, %v2943_v38  ;;  %v2913_v27 = vperm.slane %v2847_v15, 0  ;;  %v2268_v59 = vld [vmem:[#allocation5 + $0xc0] sm:$0xff] }
 0x3ae   :  { %v2849_v21 = vmax.f32 %v2701_v50, %v4045_v60  ;;  %v2850_v26 = vmax.f32 %v2702_v20, %v4046_v30  ;;  %v2947_v16 = vsel %vm2946_vm14, %v2909_v6, %v2945_v48  ;;  %v2948_v13 = vsel %vm2934_vm7, %v2911_v41, %v2910_v14  ;;  %v2180_v22 = vpop.f32.mrf.mxu1  ;;  %v2017_v63 = vpop.f32.mrf.mxu3 }
 0x3af   :  { %v2851_v42 = vmax.f32 %v2703_v7, %v4047_v46  ;;  %4064 = vmatmul.msk.f32.vlgmr.msra.gmra.mxu3 %vm53_vm13, %v2947_v16  ;;  %v2914_v43 = vperm.slane %v2848_v8, 0  ;;  %v2949_v58 = vsel %vm2936_vm8, %v2912_v24, %v2948_v13  ;;  %v2205_v47 = vmax.f32 %v2177_v37, 0.0 }
 0x3b0   :  { %v2915_v32 = vperm.slane %v2849_v21, 0  ;;  %v2950_v19 = vsel %vm2938_vm9, %v2913_v27, %v2949_v58  ;;  %v2916_v33 = vperm.slane %v2850_v26, 0  ;;  %v2340_v40 = vrot.slane %v2264_v3, 1 }
 0x3b1   :  { %v2951_v4 = vsel %vm2940_vm10, %v2914_v43, %v2950_v19  ;;  %v2917_v31 = vperm.slane %v2851_v42, 0  ;;  %v2341_v53 = vrot.slane %v2265_v29, 1  ;;  %v2343_v18 = vrot.slane %v2266_v61, 1 }
 0x3b2   :  { %v2952_v11 = vsel %vm2942_vm11, %v2915_v32, %v2951_v4  ;;  %v2344_v12 = vrot.slane %v2267_v2, 1  ;;  %v2420_v25 = vrot.slane %v2264_v3, 2  ;;  %v2421_v57 = vrot.slane %v2265_v29, 2 }
 0x3b3   :  { %v2953_v44 = vsel %vm2944_vm12, %v2916_v33, %v2952_v11  ;;  %v2342_v62 = vsel %vm264_vm1, %v2340_v40, %v2341_v53  ;;  %v2206_v28 = vmax.f32 %v2180_v22, 0.0  ;;  %v2423_v39 = vrot.slane %v2266_v61, 2  ;;  %v2629_v40 = vpop.permute.xlu0 %2628 }
 0x3b4   :  { %v2954_v56 = vsel %vm2946_vm14, %v2917_v31, %v2953_v44  ;;  %v2345_v52 = vsel %vm264_vm1, %v2343_v18, %v2344_v12  ;;  %v2388_v55 = vmax.f32 %v2264_v3, %v2342_v62  ;;  %v2424_v14 = vrot.slane %v2267_v2, 2 }
 0x3b5   :  { %v2422_v34 = vsel %vm313_vm2, %v2420_v25, %v2421_v57  ;;  %v2389_v50 = vmax.f32 %v2266_v61, %v2345_v52  ;;  %v2346_v7 = vrot.slane %v2268_v59, 1  ;;  %v2347_v60 = vrot.slane %v2269_v17, 1 }
 0x3b6   :  { %v2468_v20 = vmax.f32 %v2388_v55, %v2422_v34  ;;  %v2425_v6 = vsel %vm313_vm2, %v2423_v39, %v2424_v14  ;;  %v2426_v8 = vrot.slane %v2268_v59, 2  ;;  %v2427_v38 = vrot.slane %v2269_v17, 2  ;;  %v2020_v29 = vpop.f32.mrf.mxu3 }
 0x3b7   :  { %4065 = vmatmul.msk.f32.gmra.mxu3 %vm53_vm13, %v2954_v56  ;;  %v2469_v35 = vmax.f32 %v2389_v50, %v2425_v6  ;;  %v2348_v15 = vsel %vm264_vm1, %v2346_v7, %v2347_v60 }
 0x3b8   :  { %v2484_v45 = vmax.f32 %v2468_v20, %v2266_v61  ;;  %v2428_v26 = vsel %vm313_vm2, %v2426_v8, %v2427_v38  ;;  %v2390_v19 = vmax.f32 %v2268_v59, %v2348_v15  ;;  %v2183_v61 = vpop.f32.mrf.mxu1 }
 0x3b9   :  { %v2485_v30 = vmax.f32 %v2469_v35, %v2268_v59 }
 0x3ba   :  { %v2512_v46 = vmax.f32 %v2484_v45, %v2345_v52  ;;  %v2470_v44 = vmax.f32 %v2390_v19, %v2428_v26 }
 0x3bb   :  { %v2513_v21 = vmax.f32 %v2485_v30, %v2348_v15 }
 0x3bc   :  { %v2536_v27 = vmax.f32 %v2512_v46, %v2425_v6 }
 0x3bd   :  { %v2537_v32 = vmax.f32 %v2513_v21, %v2428_v26 }
 0x3be   :  { %v2552_v43 = vmax.f32 %v2536_v27, %v2268_v59  ;;  %v2023_v55 = vpop.f32.mrf.mxu3 }
 0x3c0   :  { %v2580_v11 = vmax.f32 %v2552_v43, %v2348_v15 }
 0x3c3   :  { %v1949_v23 = vpop.f32.mrf.mxu2 }
 0x3c4   :  { %v2015_v5 = vadd.f32 %v2014_v1, %v1949_v23  ;;  %v2604_v1 = vmax.f32 %v2580_v11, %v2428_v26 }
 0x3c6   :  { %v2042_v49 = vmax.f32 %v2015_v5, 0.0  ;;  %v2631_v5 = vpop.permute.xlu1 %2630  ;;  %v2668_v12 = vadd.f32 %v2629_v40, %v2604_v1  ;;  %v2635_v1 = vpop.permute.xlu0 %2634 }
 0x3c8   :  { %v2221_v36 = vadd.f32 %v2205_v47, %v2042_v49 }
 0x3ca   :  { %2238 = vst.msk [vmem:[#allocation5 + $0xd1] sm:$0xff] %vm53_vm13, %v2221_v36 }
 0x3cb   :  { %v1952_v54 = vpop.f32.mrf.mxu2 }
 0x3cc   :  { %v2018_v0 = vadd.f32 %v2017_v63, %v1952_v54  ;;  %v2207_v63 = vmax.f32 %v2183_v61, 0.0 }
 0x3ce   :  { %v2043_v51 = vmax.f32 %v2018_v0, 0.0 }
 0x3d0   :  { %v2222_v41 = vadd.f32 %v2206_v28, %v2043_v51 }
 0x3d1   :  { %v2270_v24 = vld [vmem:[#allocation5 + $0xd0] sm:$0xff]  ;;  %v2271_v48 = vld [vmem:[#allocation5 + $0xd8] sm:$0xff] }
 0x3d2   :  { %2239 = vst.msk [vmem:[#allocation5 + $0xe1] sm:$0xff] %vm53_vm13, %v2222_v41  ;;  %v2349_v16 = vrot.slane %v2270_v24, 1  ;;  %v2350_v42 = vrot.slane %v2271_v48, 1  ;;  %v2553_v13 = vmax.f32 %v2537_v32, %v2270_v24  ;;  %v2429_v33 = vrot.slane %v2270_v24, 2 }
 0x3d3   :  { %v2430_v4 = vrot.slane %v2271_v48, 2  ;;  %v2486_v3 = vmax.f32 %v2470_v44, %v2270_v24 }
 0x3d4   :  { %v2351_v58 = vsel %vm264_vm1, %v2349_v16, %v2350_v42 }
 0x3d5   :  { %v2581_v31 = vmax.f32 %v2553_v13, %v2351_v58  ;;  %v2431_v56 = vsel %vm313_vm2, %v2429_v33, %v2430_v4  ;;  %v2391_v23 = vmax.f32 %v2270_v24, %v2351_v58  ;;  %v2514_v22 = vmax.f32 %v2486_v3, %v2351_v58 }
 0x3d7   :  { %v2605_v37 = vmax.f32 %v2581_v31, %v2431_v56  ;;  %v2471_v36 = vmax.f32 %v2391_v23, %v2431_v56  ;;  %v2538_v28 = vmax.f32 %v2514_v22, %v2431_v56 }
 0x3d9   :  { %v2272_v47 = vld [vmem:[#allocation5 + $0xe0] sm:$0xff]  ;;  %v2273_v49 = vld [vmem:[#allocation5 + $0xe8] sm:$0xff]  ;;  %v2669_v18 = vadd.f32 %v2631_v5, %v2605_v37  ;;  %v2633_v37 = vpop.permute.xlu2 %2632 }
 0x3da   :  { %v2352_v25 = vrot.slane %v2272_v47, 1  ;;  %v2353_v57 = vrot.slane %v2273_v49, 1  ;;  %v2487_v0 = vmax.f32 %v2471_v36, %v2272_v47  ;;  %v2432_v50 = vrot.slane %v2272_v47, 2  ;;  %v2026_v36 = vpop.f32.mrf.mxu3 }
 0x3db   :  { %v2680_v52 = vmax.f32 %v2668_v12, %v2669_v18  ;;  %v2433_v41 = vrot.slane %v2273_v49, 2  ;;  %v2554_v20 = vmax.f32 %v2538_v28, %v2272_v47 }
 0x3dc   :  { %v2354_v39 = vsel %vm264_vm1, %v2352_v25, %v2353_v57 }
 0x3dd   :  { %v2704_v59 = vrot.slane %v2680_v52, 2  ;;  %v2515_v17 = vmax.f32 %v2487_v0, %v2354_v39  ;;  %v2705_v7 = vrot.slane %v2680_v52, 4  ;;  %v2434_v45 = vsel %vm313_vm2, %v2432_v50, %v2433_v41 }
 0x3de   :  { %v2582_v46 = vmax.f32 %v2554_v20, %v2354_v39  ;;  %v4048_v21 = vrot.slane %v2680_v52, 9  ;;  %v2706_v42 = vrot.slane %v2680_v52, 6  ;;  %v2392_v33 = vmax.f32 %v2272_v47, %v2354_v39 }
 0x3df   :  { %v4049_v30 = vrot.slane %v2704_v59, 9  ;;  %v2539_v38 = vmax.f32 %v2515_v17, %v2434_v45  ;;  %v4050_v32 = vrot.slane %v2705_v7, 9 }
 0x3e0   :  { %v2606_v19 = vmax.f32 %v2582_v46, %v2434_v45  ;;  %v2852_v31 = vmax.f32 %v2680_v52, %v4048_v21  ;;  %v4051_v44 = vrot.slane %v2706_v42, 9  ;;  %v2472_v5 = vmax.f32 %v2392_v33, %v2434_v45 }
 0x3e1   :  { %v2853_v43 = vmax.f32 %v2704_v59, %v4049_v30  ;;  %v2854_v56 = vmax.f32 %v2705_v7, %v4050_v32 }
 0x3e2   :  { %v2670_v3 = vadd.f32 %v2633_v37, %v2606_v19  ;;  %v2918_v61 = vperm.slane %v2852_v31, 0  ;;  %v2855_v49 = vmax.f32 %v2706_v42, %v4051_v44 }
 0x3e3   :  { %v2919_v23 = vperm.slane %v2853_v43, 0  ;;  %v2920_v40 = vperm.slane %v2854_v56, 0 }
 0x3e4   :  { %v2921_v52 = vperm.slane %v2855_v49, 0 }
 0x3e5   :  { %v2955_v47 = vsel %vm2934_vm7, %v2919_v23, %v2918_v61 }
 0x3e6   :  { %v2956_v0 = vsel %vm2936_vm8, %v2920_v40, %v2955_v47 }
 0x3ea   :  { %v2186_v14 = vpop.f32.mrf.mxu1 }
 0x3eb   :  { %v2208_v6 = vmax.f32 %v2186_v14, 0.0 }
 0x3ec   :  { %v1955_v2 = vpop.f32.mrf.mxu2 }
 0x3ed   :  { %v2021_v53 = vadd.f32 %v2020_v29, %v1955_v2 }
 0x3ef   :  { %v2044_v62 = vmax.f32 %v2021_v53, 0.0 }
 0x3f1   :  { %v2223_v54 = vadd.f32 %v2207_v63, %v2044_v62 }
 0x3f2   :  { %v2189_v28 = vpop.f32.mrf.mxu1 }
 0x3f3   :  { %2240 = vst.msk [vmem:[#allocation5 + $0xf1] sm:$0xff] %vm53_vm13, %v2223_v54 }
 0x3f4   :  { %v1958_v51 = vpop.f32.mrf.mxu2 }
 0x3f5   :  { %v2024_v34 = vadd.f32 %v2023_v55, %v1958_v51 }
 0x3f7   :  { %v2045_v35 = vmax.f32 %v2024_v34, 0.0 }
 0x3f9   :  { %v2224_v60 = vadd.f32 %v2208_v6, %v2045_v35 }
 0x3fa   :  { %v2274_v15 = vld [vmem:[#allocation5 + $0xf0] sm:$0xff]  ;;  %v2275_v8 = vld [vmem:[#allocation5 + $0xf8] sm:$0xff] }
 0x3fb   :  { %2241 = vst.msk [vmem:[#allocation5 + $0x101] sm:$0xff] %vm53_vm13, %v2224_v60  ;;  %v2355_v24 = vrot.slane %v2274_v15, 1  ;;  %v2356_v48 = vrot.slane %v2275_v8, 1  ;;  %v2435_v26 = vrot.slane %v2274_v15, 2  ;;  %v2436_v27 = vrot.slane %v2275_v8, 2 }
 0x3fc   :  { %v2555_v16 = vmax.f32 %v2539_v38, %v2274_v15  ;;  %v2488_v53 = vmax.f32 %v2472_v5, %v2274_v15  ;;  %v2209_v60 = vmax.f32 %v2189_v28, 0.0  ;;  %v2637_v28 = vpop.permute.xlu1 %2636 }
 0x3fd   :  { %v2357_v13 = vsel %vm264_vm1, %v2355_v24, %v2356_v48  ;;  %v6239_v4 = vsel %vm313_vm2, %v2435_v26, %v2436_v27  ;;  %v2029_v26 = vpop.f32.mrf.mxu3 }
 0x3fe   :  { %v2583_v58 = vmax.f32 %v2555_v16, %v2357_v13  ;;  %v2393_v18 = vmax.f32 %v2274_v15, %v2357_v13  ;;  %v2516_v39 = vmax.f32 %v2488_v53, %v2357_v13  ;;  %v2957_v15 = vsel %vm2938_vm9, %v2921_v52, %v2956_v0  ;;  %v2639_v0 = vpop.permute.xlu2 %2638 }
 0x400   :  { %v2607_v11 = vmax.f32 %v2583_v58, %v6239_v4  ;;  %v2473_v59 = vmax.f32 %v2393_v18, %v6239_v4  ;;  %v2540_v16 = vmax.f32 %v2516_v39, %v6239_v4 }
 0x402   :  { %v2671_v29 = vadd.f32 %v2635_v1, %v2607_v11  ;;  %v2276_v22 = vld [vmem:[#allocation5 + $0x100] sm:$0xff]  ;;  %v2277_v57 = vld [vmem:[#allocation5 + $0x108] sm:$0xff] }
 0x403   :  { %v2358_v41 = vrot.slane %v2276_v22, 1  ;;  %v2359_v20 = vrot.slane %v2277_v57, 1  ;;  %v2489_v21 = vmax.f32 %v2473_v59, %v2276_v22  ;;  %v2438_v58 = vrot.slane %v2276_v22, 2 }
 0x404   :  { %v2681_v2 = vmax.f32 %v2670_v3, %v2671_v29  ;;  %v2439_v19 = vrot.slane %v2277_v57, 2  ;;  %v2556_v44 = vmax.f32 %v2540_v16, %v2276_v22 }
 0x405   :  { %v2360_v27 = vsel %vm264_vm1, %v2358_v41, %v2359_v20 }
 0x406   :  { %v2707_v12 = vrot.slane %v2681_v2, 2  ;;  %v2708_v63 = vrot.slane %v2681_v2, 4  ;;  %v2709_v62 = vrot.slane %v2681_v2, 6  ;;  %v4052_v25 = vrot.slane %v2681_v2, 9 }
 0x407   :  { %v2517_v31 = vmax.f32 %v2489_v21, %v2360_v27  ;;  %v2394_v11 = vmax.f32 %v2276_v22, %v2360_v27  ;;  %v2440_v4 = vsel %vm313_vm2, %v2438_v58, %v2439_v19  ;;  %v2584_v29 = vmax.f32 %v2556_v44, %v2360_v27 }
 0x408   :  { %v4053_v54 = vrot.slane %v2707_v12, 9  ;;  %v4054_v14 = vrot.slane %v2708_v63, 9  ;;  %v4055_v51 = vrot.slane %v2709_v62, 9  ;;  %v2856_v34 = vmax.f32 %v2681_v2, %v4052_v25 }
 0x409   :  { %v1961_v55 = vpop.f32.mrf.mxu2  ;;  %v2541_v23 = vmax.f32 %v2517_v31, %v2440_v4  ;;  %v2474_v61 = vmax.f32 %v2394_v11, %v2440_v4 }
 0x40a   :  { %v2027_v50 = vadd.f32 %v2026_v36, %v1961_v55  ;;  %v2857_v17 = vmax.f32 %v2707_v12, %v4053_v54  ;;  %v2858_v6 = vmax.f32 %v2708_v63, %v4054_v14  ;;  %v2859_v35 = vmax.f32 %v2709_v62, %v4055_v51  ;;  %v2282_v55 = vld [vmem:[#allocation5 + $0x130] sm:$0xff]  ;;  %v2283_v51 = vld [vmem:[#allocation5 + $0x138] sm:$0xff] }
 0x40b   :  { %v2922_v7 = vperm.slane %v2856_v34, 0  ;;  %v2608_v36 = vmax.f32 %v2584_v29, %v2440_v4  ;;  %v2592_v21 = vrot.slane %v2283_v51, 2  ;;  %v2641_v4 = vpop.permute.xlu0 %2640 }
 0x40c   :  { %v2046_v45 = vmax.f32 %v2027_v50, 0.0  ;;  %v2923_v30 = vperm.slane %v2857_v17, 0  ;;  %v2924_v8 = vperm.slane %v2858_v6, 0  ;;  %v2925_v24 = vperm.slane %v2859_v35, 0 }
 0x40d   :  { %v2958_v38 = vsel %vm2940_vm10, %v2922_v7, %v2957_v15  ;;  %v2672_v34 = vadd.f32 %v2637_v28, %v2608_v36 }
 0x40e   :  { %v2225_v46 = vadd.f32 %v2209_v60, %v2046_v45  ;;  %v2959_v48 = vsel %vm2942_vm11, %v2923_v30, %v2958_v38  ;;  %v2192_v13 = vpop.f32.mrf.mxu1  ;;  %v2567_v45 = vrot.slane %v2282_v55, 1  ;;  %v2568_v30 = vrot.slane %v2283_v51, 1 }
 0x40f   :  { %v2960_v42 = vsel %vm2944_vm12, %v2924_v8, %v2959_v48  ;;  %v2210_v56 = vmax.f32 %v2192_v13, 0.0 }
 0x410   :  { %2242 = vst.msk [vmem:[#allocation5 + $0x111] sm:$0xff] %vm53_vm13, %v2225_v46  ;;  %v2961_v32 = vsel %vm2946_vm14, %v2925_v24, %v2960_v42  ;;  %v2591_v46 = vrot.slane %v2282_v55, 2  ;;  %v2569_v42 = vsel %vm264_vm1, %v2567_v45, %v2568_v30 }
 0x411   :  { %v1964_v43 = vpop.f32.mrf.mxu2  ;;  %4066 = vmatmul.msk.f32.gmra.mxu3 %vm53_vm13, %v2961_v32 }
 0x412   :  { %v2030_v33 = vadd.f32 %v2029_v26, %v1964_v43  ;;  %v2593_v58 = vsel %vm313_vm2, %v2591_v46, %v2592_v21 }
 0x414   :  { %v2047_v37 = vmax.f32 %v2030_v33, 0.0 }
 0x416   :  { %v2226_v1 = vadd.f32 %v2210_v56, %v2047_v37 }
 0x417   :  { %v2278_v3 = vld [vmem:[#allocation5 + $0x110] sm:$0xff]  ;;  %v2279_v5 = vld [vmem:[#allocation5 + $0x118] sm:$0xff] }
 0x418   :  { %2243 = vst.msk [vmem:[#allocation5 + $0x121] sm:$0xff] %vm53_vm13, %v2226_v1  ;;  %v2557_v2 = vmax.f32 %v2541_v23, %v2278_v3  ;;  %v2361_v49 = vrot.slane %v2278_v3, 1  ;;  %v2362_v40 = vrot.slane %v2279_v5, 1  ;;  %v2441_v53 = vrot.slane %v2278_v3, 2  ;;  %v2643_v1 = vpop.permute.xlu1 %2642 }
 0x419   :  { %v2442_v47 = vrot.slane %v2279_v5, 2  ;;  %v2490_v18 = vmax.f32 %v2474_v61, %v2278_v3 }
 0x41a   :  { %v2363_v12 = vsel %vm264_vm1, %v2361_v49, %v2362_v40 }
 0x41b   :  { %v2395_v22 = vmax.f32 %v2278_v3, %v2363_v12  ;;  %v2518_v63 = vmax.f32 %v2490_v18, %v2363_v12  ;;  %v2585_v62 = vmax.f32 %v2557_v2, %v2363_v12  ;;  %v2443_v25 = vsel %vm313_vm2, %v2441_v53, %v2442_v47 }
 0x41d   :  { %v2475_v57 = vmax.f32 %v2395_v22, %v2443_v25  ;;  %v2542_v54 = vmax.f32 %v2518_v63, %v2443_v25  ;;  %v2609_v52 = vmax.f32 %v2585_v62, %v2443_v25 }
 0x41f   :  { %v2280_v39 = vld [vmem:[#allocation5 + $0x120] sm:$0xff]  ;;  %v2281_v14 = vld [vmem:[#allocation5 + $0x128] sm:$0xff]  ;;  %v2673_v50 = vadd.f32 %v2639_v0, %v2609_v52 }
 0x420   :  { %v2491_v41 = vmax.f32 %v2475_v57, %v2280_v39  ;;  %v2499_v59 = vrot.slane %v2280_v39, 1  ;;  %v2500_v17 = vrot.slane %v2281_v14, 1  ;;  %v2523_v20 = vrot.slane %v2280_v39, 2 }
 0x421   :  { %v2524_v6 = vrot.slane %v2281_v14, 2  ;;  %v2558_v35 = vmax.f32 %v2542_v54, %v2280_v39  ;;  %v2682_v7 = vmax.f32 %v2672_v34, %v2673_v50 }
 0x422   :  { %v2501_v60 = vsel %vm264_vm1, %v2499_v59, %v2500_v17  ;;  %vm3023_vm1 = vcmask 257024  }
 0x423   :  { %v2519_v15 = vmax.f32 %v2491_v41, %v2501_v60  ;;  %v2710_v8 = vrot.slane %v2682_v7, 2  ;;  %v2525_v38 = vsel %vm313_vm2, %v2523_v20, %v2524_v6  ;;  %v2711_v24 = vrot.slane %v2682_v7, 4 }
 0x424   :  { %v2586_v26 = vmax.f32 %v2558_v35, %v2501_v60  ;;  %v4056_v27 = vrot.slane %v2682_v7, 9  ;;  %v2712_v19 = vrot.slane %v2682_v7, 6  ;;  %v3052_v35 = vrot.slane %v4733_v9, 4 }
 0x425   :  { %v2543_v48 = vmax.f32 %v2519_v15, %v2525_v38  ;;  %v4057_v16 = vrot.slane %v2710_v8, 9  ;;  %v4058_v32 = vrot.slane %v2711_v24, 9  ;;  %vm3060_vm2 = vcmask 1046532  }
 0x426   :  { %v2610_v31 = vmax.f32 %v2586_v26, %v2525_v38  ;;  %v2860_v11 = vmax.f32 %v2682_v7, %v4056_v27  ;;  %v4059_v23 = vrot.slane %v2712_v19, 9  ;;  %v3064_v38 = vrot.slane %v3052_v35, 5 }
 0x427   :  { %v2559_v13 = vmax.f32 %v2543_v48, %v2282_v55  ;;  %v2861_v43 = vmax.f32 %v2710_v8, %v4057_v16  ;;  %v2862_v44 = vmax.f32 %v2711_v24, %v4058_v32  ;;  %v4068_v8 = vrot.slane %v4733_v9, 9 }
 0x428   :  { %v2674_v3 = vadd.f32 %v2641_v4, %v2610_v31  ;;  %v2926_v5 = vperm.slane %v2860_v11, 0  ;;  %v2863_v40 = vmax.f32 %v2712_v19, %v4059_v23  ;;  %v4076_v32 = vrot.slane %v4733_v9, 10 }
 0x429   :  { %v2587_v33 = vmax.f32 %v2559_v13, %v2569_v42  ;;  %v2927_v37 = vperm.slane %v2861_v43, 0  ;;  %v2928_v61 = vperm.slane %v2862_v44, 0  ;;  %v3099_v13 = vrot.slane %v3052_v35, 6 }
 0x42a   :  { %v2929_v57 = vperm.slane %v2863_v40, 0 }
 0x42b   :  { %v2611_v56 = vmax.f32 %v2587_v33, %v2593_v58  ;;  %v2962_v49 = vsel %vm2934_vm7, %v2927_v37, %v2926_v5 }
 0x42c   :  { %v2963_v36 = vsel %vm2936_vm8, %v2928_v61, %v2962_v49 }
 0x42d   :  { %v2675_v29 = vadd.f32 %v2643_v1, %v2611_v56  ;;  %v2964_v14 = vsel %vm2938_vm9, %v2929_v57, %v2963_v36 }
 0x42f   :  { %v2683_v2 = vmax.f32 %v2674_v3, %v2675_v29 }
 0x431   :  { %v2713_v53 = vrot.slane %v2683_v2, 2  ;;  %v2714_v47 = vrot.slane %v2683_v2, 4  ;;  %v2715_v18 = vrot.slane %v2683_v2, 6  ;;  %v4060_v12 = vrot.slane %v2683_v2, 9 }
 0x432   :  { %v2994_v54 = vpop.f32.mrf.mxu3 }
 0x433   :  { %v4061_v22 = vrot.slane %v2713_v53, 9  ;;  %v4062_v63 = vrot.slane %v2714_v47, 9  ;;  %v4063_v62 = vrot.slane %v2715_v18, 9  ;;  %v2864_v25 = vmax.f32 %v2683_v2, %v4060_v12 }
 0x434   :  { %v6264_v39 = vmax.f32 %v2994_v54, 0.0 }
 0x435   :  { %v2865_v52 = vmax.f32 %v2713_v53, %v4061_v22  ;;  %v2866_v0 = vmax.f32 %v2714_v47, %v4062_v63  ;;  %v2867_v28 = vmax.f32 %v2715_v18, %v4063_v62  ;;  %v2930_v55 = vperm.slane %v2864_v25, 0 }
 0x436   :  { %v3014_v41 = vrot.slane %v6264_v39, 4  ;;  %3024 = vst.msk [vmem:[#allocation4 + $0x9] sm:$0xf] %vm3023_vm1, %v6264_v39 }
 0x437   :  { %v2931_v51 = vperm.slane %v2865_v52, 0  ;;  %v2932_v34 = vperm.slane %v2866_v0, 0  ;;  %v2965_v50 = vsel %vm2940_vm10, %v2930_v55, %v2964_v14  ;;  %v2933_v59 = vperm.slane %v2867_v28, 0 }
 0x438   :  { %3025 = vst.msk [vmem:[#allocation4 + $0x11] sm:$0xf] %vm3023_vm1, %v3014_v41 }
 0x439   :  { %v2966_v17 = vsel %vm2942_vm11, %v2931_v51, %v2965_v50 }
 0x43a   :  { %v2967_v20 = vsel %vm2944_vm12, %v2932_v34, %v2966_v17  ;;  %v2997_v7 = vpop.f32.mrf.mxu3 }
 0x43b   :  { %v2968_v6 = vsel %vm2946_vm14, %v2933_v59, %v2967_v20  ;;  %v6279_v60 = vmax.f32 %v2997_v7, 0.0  ;;  %v3037_v20 = vld [vmem:[#allocation4 + $0x28] sm:$0xff] }
 0x43c   :  { %4067 = vmatmul.msk.f32.gmra.mxu3 %vm53_vm13, %v2968_v6  ;;  %vm6292_vm13 = vmor %vm966_vm4, %vm3060_vm2  ;;  %v3151_v6 = vrot.slane %v3037_v20, 4  ;;  %v4088_v7 = vrot.slane %v3037_v20, 9 }
 0x43d   :  { %v3033_v45 = vld [vmem:[#allocation4 + $0x8] sm:$0xff]  ;;  %v3015_v15 = vrot.slane %v6279_v60, 4  ;;  %3026 = vst.msk [vmem:[#allocation4 + $0x19] sm:$0xf] %vm3023_vm1, %v6279_v60  ;;  %v3065_v48 = vsel %vm6292_vm13, %v4068_v8, %v3064_v38  ;;  %vm6308_vm4 = vmor %vm3094_vm0, %vm3095_vm6 }
 0x43e   :  { %v3053_v30 = vrot.slane %v3033_v45, 4  ;;  %3171 = vst [vmem:[#allocation1 + $0x1] ss:$2 sm:$0xff] %v3033_v45  ;;  %v4069_v26 = vrot.slane %v3033_v45, 9  ;;  %v3100_v31 = vsel %vm6308_vm4, %v4076_v32, %v3099_v13  ;;  %v4077_v44 = vrot.slane %v3033_v45, 10 }
 0x43f   :  { %v6283_v46 = vld [vmem:[#allocation4 + $0x10] sm:$0xff]  ;;  %3027 = vst.msk [vmem:[#allocation4 + $0x21] sm:$0xf] %vm3023_vm1, %v3015_v15 }
 0x440   :  { %3173 = vst [vmem:[#allocation1 + $0x10] ss:$2 sm:$0xff] %v6283_v46  ;;  %v3068_v24 = vrot.slane %v3053_v30, 5  ;;  %v3054_v43 = vrot.slane %v6283_v46, 4  ;;  %v3103_v33 = vrot.slane %v3053_v30, 6  ;;  %v4070_v9 = vrot.slane %v6283_v46, 9 }
 0x441   :  { %v4078_v2 = vrot.slane %v6283_v46, 10 }
 0x442   :  { %v3069_v16 = vsel %vm6292_vm13, %v4069_v26, %v3068_v24  ;;  %v3072_v11 = vrot.slane %v3054_v43, 5  ;;  %v3104_v4 = vsel %vm6308_vm4, %v4077_v44, %v3103_v33  ;;  %v3107_v5 = vrot.slane %v3054_v43, 6 }
 0x443   :  { %v3163_v24 = vrot.slane %v3151_v6, 6  ;;  %v3056_v33 = vrot.slane %v4738_v10, 4  ;;  %v4072_v44 = vrot.slane %v4738_v10, 9 }
 0x444   :  { %v6302_v42 = vld [vmem:[#allocation4 + $0x18] sm:$0xff]  ;;  %v3073_v3 = vsel %vm6292_vm13, %v4070_v9, %v3072_v11  ;;  %v3108_v53 = vsel %vm6308_vm4, %v4078_v2, %v3107_v5  ;;  %v3459_v5 = vld [vmem:[%s6679_s1 + $0x158] sm:$0xff] }
 0x445   :  { %v6298_v27 = vld.sshfl [vmem:[#allocation1] sm:$0xff pattern:$0x75316420]  ;;  %3175 = vst [vmem:[#allocation1 + $0x11] ss:$2 sm:$0xff] %v6302_v42  ;;  %v3055_v58 = vrot.slane %v6302_v42, 4  ;;  %3488 = vmatpush.msrb.mxu0 %v3459_v5 }
 0x446   :  { %3192 = vst [vmem:[#allocation1] ss:$2 sm:$0xff] %v3065_v48  ;;  %v4071_v1 = vrot.slane %v6302_v42, 9  ;;  %v4079_v40 = vrot.slane %v6302_v42, 10  ;;  %v3036_v22 = vld [vmem:[#allocation4 + $0x20] sm:$0xff]  ;;  %v3115_v2 = vrot.slane %v3056_v33, 6 }
 0x447   :  { %3194 = vst [vmem:[#allocation1 + $0x1] ss:$2 sm:$0xff] %v3069_v16  ;;  %v3076_v56 = vrot.slane %v3055_v58, 5  ;;  %v3111_v61 = vrot.slane %v3055_v58, 6  ;;  %v3131_v25 = vrot.slane %v3036_v22, 4  ;;  %v4084_v52 = vrot.slane %v3036_v22, 9 }
 0x448   :  { %v4086_v34 = vrot.slane %v3036_v22, 10  ;;  %v3475_v5 = vld [vmem:[%s6679_s1 + $0x1d8] sm:$0xff] }
 0x449   :  { %v3077_v29 = vsel %vm6292_vm13, %v4071_v1, %v3076_v56  ;;  %v3112_v18 = vsel %vm6308_vm4, %v4079_v40, %v3111_v61  ;;  %v3135_v57 = vrot.slane %v3131_v25, 5  ;;  %v3143_v14 = vrot.slane %v3131_v25, 6  ;;  %3517 = vmatpush.msrb.mxu2 %v3475_v5 }
 0x44a   :  { %v3080_v56 = vrot.slane %v3056_v33, 5  ;;  %v4080_v61 = vrot.slane %v4738_v10, 10  ;;  %v3456_v10 = vld [vmem:[%s6679_s1 + $0x140] sm:$0xff] }
 0x44b   :  { %v3136_v28 = vsel %vm6292_vm13, %v4084_v52, %v3135_v57  ;;  %v3144_v59 = vsel %vm6308_vm4, %v4086_v34, %v3143_v14  ;;  %v3452_v57 = vld [vmem:[%s6679_s1 + $0x120] sm:$0xff]  ;;  %v3449_v14 = vld [vmem:[%s6679_s1 + $0x108] sm:$0xff] }
 0x44c   :  { %v6318_v23 = vld.sshfl [vmem:[#allocation1 + $0x10] sm:$0xff pattern:$0x75316420]  ;;  %v3081_v1 = vsel %vm6292_vm13, %v4072_v44, %v3080_v56  ;;  %v3444_v33 = vld [vmem:[%s6679_s1 + $0xe0] sm:$0xff] }
 0x44d   :  { %3196 = vst [vmem:[#allocation1 + $0x10] ss:$2 sm:$0xff] %v3073_v3 }
 0x44e   :  { %v3207_v37 = vld.sshfl [vmem:[#allocation1] sm:$0xff pattern:$0x75316420]  ;;  %3198 = vst [vmem:[#allocation1 + $0x11] ss:$2 sm:$0xff] %v3077_v29 }
 0x44f   :  { %3223 = vst [vmem:[#allocation1] ss:$2 sm:$0xff] %v3100_v31 }
 0x450   :  { %3225 = vst [vmem:[#allocation1 + $0x1] ss:$2 sm:$0xff] %v3104_v4 }
 0x455   :  { %v3208_v47 = vld.sshfl [vmem:[#allocation1 + $0x10] sm:$0xff pattern:$0x75316420] }
 0x456   :  { %3227 = vst [vmem:[#allocation1 + $0x10] ss:$2 sm:$0xff] %v3108_v53  ;;  %v4396_v12 = vpack.i.bf16 %v3208_v47, %v3207_v37  ;;  %v3116_v47 = vsel %vm6308_vm4, %v4080_v61, %v3115_v2 }
 0x457   :  { %v3238_v49 = vld.sshfl [vmem:[#allocation1] sm:$0xff pattern:$0x75316420]  ;;  %3229 = vst [vmem:[#allocation1 + $0x11] ss:$2 sm:$0xff] %v3112_v18 }
 0x458   :  { %3254 = vst [vmem:[#allocation1] ss:$2 sm:$0xff] %v3033_v45  ;;  %4397 = vrot.lane.b32.xlu2 %v4396_v12, %s4475_s9  ;;  %v3155_v45 = vrot.slane %v3151_v6, 5  ;;  %v3448_v6 = vld [vmem:[%s6679_s1 + $0x100] sm:$0xff] }
 0x459   :  { %3256 = vst [vmem:[#allocation1 + $0x1] ss:$2 sm:$0xff] %v6283_v46 }
 0x45a   :  { %v3156_v8 = vsel %vm6292_vm13, %v4088_v7, %v3155_v45 }
 0x45e   :  { %v3239_v63 = vld.sshfl [vmem:[#allocation1 + $0x10] sm:$0xff pattern:$0x75316420] }
 0x45f   :  { %3258 = vst [vmem:[#allocation1 + $0x10] ss:$2 sm:$0xff] %v6302_v42  ;;  %v4401_v62 = vpack.i.bf16 %v3239_v63, %v3238_v49  ;;  %v3458_v49 = vld [vmem:[%s6679_s1 + $0x150] sm:$0xff] }
 0x460   :  { %v3269_v36 = vld.sshfl [vmem:[#allocation1] sm:$0xff pattern:$0x75316420]  ;;  %3260 = vst [vmem:[#allocation1 + $0x11] ss:$2 sm:$0xff] %v3036_v22  ;;  %3489 = vmatpush.msrb.mxu0 %v3458_v49  ;;  %v3454_v63 = vld [vmem:[%s6679_s1 + $0x130] sm:$0xff] }
 0x461   :  { %3285 = vst [vmem:[#allocation1] ss:$2 sm:$0xff] %v3069_v16  ;;  %4402 = vrot.lane.b32.xlu0 %v4401_v62, %s4478_s18  ;;  %v3453_v62 = vld [vmem:[%s6679_s1 + $0x128] sm:$0xff] }
 0x462   :  { %3287 = vst [vmem:[#allocation1 + $0x1] ss:$2 sm:$0xff] %v3073_v3 }
 0x467   :  { %v3270_v0 = vld.sshfl [vmem:[#allocation1 + $0x10] sm:$0xff pattern:$0x75316420] }
 0x468   :  { %3289 = vst [vmem:[#allocation1 + $0x10] ss:$2 sm:$0xff] %v3077_v29  ;;  %v4406_v55 = vpack.i.bf16 %v3270_v0, %v3269_v36  ;;  %v3451_v0 = vld [vmem:[%s6679_s1 + $0x118] sm:$0xff] }
 0x469   :  { %v6334_v54 = vld.sshfl [vmem:[#allocation1] sm:$0xff pattern:$0x75316420]  ;;  %3291 = vst [vmem:[#allocation1 + $0x11] ss:$2 sm:$0xff] %v3136_v28 }
 0x46a   :  { %3308 = vst [vmem:[#allocation1] ss:$2 sm:$0xff] %v3104_v4  ;;  %4407 = vrot.lane.b32.xlu1 %v4406_v55, %s4480_s20 }
 0x46b   :  { %3310 = vst [vmem:[#allocation1 + $0x1] ss:$2 sm:$0xff] %v3108_v53 }
 0x470   :  { %v6342_v50 = vld.sshfl [vmem:[#allocation1 + $0x10] sm:$0xff pattern:$0x75316420] }
 0x471   :  { %3312 = vst [vmem:[#allocation1 + $0x10] ss:$2 sm:$0xff] %v3112_v18 }
 0x472   :  { %v6339_v51 = vld.sshfl [vmem:[#allocation1] sm:$0xff pattern:$0x75316420]  ;;  %3314 = vst [vmem:[#allocation1 + $0x11] ss:$2 sm:$0xff] %v3144_v59 }
 0x473   :  { %3341 = vst [vmem:[#allocation1 + $0x1] ss:$2 sm:$0xff] %v6302_v42 }
 0x474   :  { %3339 = vst [vmem:[#allocation1] ss:$2 sm:$0xff] %v6283_v46  ;;  %v4090_v46 = vrot.slane %v3037_v20, 10 }
 0x476   :  { %v3164_v26 = vsel %vm6308_vm4, %v4090_v46, %v3163_v24  ;;  %v3447_v46 = vld [vmem:[%s6679_s1 + $0xf8] sm:$0xff]  ;;  %v3446_v24 = vld [vmem:[%s6679_s1 + $0xf0] sm:$0xff] }
 0x479   :  { %v6349_v35 = vld.sshfl [vmem:[#allocation1 + $0x10] sm:$0xff pattern:$0x75316420] }
 0x47a   :  { %3343 = vst [vmem:[#allocation1 + $0x10] ss:$2 sm:$0xff] %v3036_v22  ;;  %v3455_v22 = vld [vmem:[%s6679_s1 + $0x138] sm:$0xff] }
 0x47b   :  { %v6347_v17 = vld.sshfl [vmem:[#allocation1] sm:$0xff pattern:$0x75316420]  ;;  %3345 = vst [vmem:[#allocation1 + $0x11] ss:$2 sm:$0xff] %v3037_v20 }
 0x47c   :  { %3370 = vst [vmem:[#allocation1] ss:$2 sm:$0xff] %v3073_v3 }
 0x47d   :  { %3372 = vst [vmem:[#allocation1 + $0x1] ss:$2 sm:$0xff] %v3077_v29 }
 0x482   :  { %v6355_v38 = vld.sshfl [vmem:[#allocation1 + $0x10] sm:$0xff pattern:$0x75316420] }
 0x483   :  { %3374 = vst [vmem:[#allocation1 + $0x10] ss:$2 sm:$0xff] %v3136_v28  ;;  %v3450_v28 = vld [vmem:[%s6679_s1 + $0x110] sm:$0xff] }
 0x484   :  { %v6351_v30 = vld.sshfl [vmem:[#allocation1] sm:$0xff pattern:$0x75316420]  ;;  %3376 = vst [vmem:[#allocation1 + $0x11] ss:$2 sm:$0xff] %v3156_v8 }
 0x485   :  { %3401 = vst [vmem:[#allocation1] ss:$2 sm:$0xff] %v3108_v53  ;;  %v3457_v53 = vld [vmem:[%s6679_s1 + $0x148] sm:$0xff] }
 0x486   :  { %3403 = vst [vmem:[#allocation1 + $0x1] ss:$2 sm:$0xff] %v3112_v18  ;;  %3490 = vmatpush.msrb.mxu0 %v3457_v53  ;;  %v3474_v53 = vld [vmem:[%s6679_s1 + $0x1d0] sm:$0xff] }
 0x487   :  { %3518 = vmatpush.msrb.mxu2 %v3474_v53  ;;  %v3469_v53 = vld [vmem:[%s6679_s1 + $0x1a8] sm:$0xff] }
 0x488   :  { %3491 = vmatpush.msrb.mxu0 %v3456_v10 }
 0x48a   :  { %3492 = vmatpush.msrb.mxu0 %v3455_v22 }
 0x48b   :  { %v6362_v16 = vld.sshfl [vmem:[#allocation1 + $0x10] sm:$0xff pattern:$0x75316420] }
 0x48c   :  { %3405 = vst [vmem:[#allocation1 + $0x10] ss:$2 sm:$0xff] %v3144_v59  ;;  %3493 = vmatpush.msrb.mxu0 %v3454_v63 }
 0x48d   :  { %v6357_v48 = vld.sshfl [vmem:[#allocation1] sm:$0xff pattern:$0x75316420]  ;;  %3407 = vst [vmem:[#allocation1 + $0x11] ss:$2 sm:$0xff] %v3164_v26  ;;  %v3445_v26 = vld [vmem:[%s6679_s1 + $0xe8] sm:$0xff] }
 0x48e   :  { %3809 = vst [vmem:[#allocation1] ss:$2 sm:$0xff] %v6264_v39  ;;  %3494 = vmatpush.msrb.mxu0 %v3453_v62 }
 0x490   :  { %3495 = vmatpush.msrb.mxu0 %v3452_v57 }
 0x492   :  { %3496 = vmatpush.msrb.mxu0 %v3451_v0  ;;  %v3473_v0 = vld [vmem:[%s6679_s1 + $0x1c8] sm:$0xff] }
 0x493   :  { %3519 = vmatpush.msrb.mxu2 %v3473_v0  ;;  %v3463_v0 = vld [vmem:[%s6679_s1 + $0x178] sm:$0xff] }
 0x494   :  { %v3000_v42 = vpop.f32.mrf.mxu3  ;;  %v6373_v58 = vld.sshfl [vmem:[#allocation1 + $0x10] sm:$0xff pattern:$0x75316420]  ;;  %3497 = vmatpush.msrb.mxu0 %v3450_v28 }
 0x495   :  { %v6364_v32 = vmax.f32 %v3000_v42, 0.0  ;;  %v6369_v43 = vld.sshfl [vmem:[#allocation1] sm:$0xff pattern:$0x75316420]  ;;  %3812 = vst [vmem:[#allocation1 + $0x10] ss:$2 sm:$0xff] %v3014_v41 }
 0x496   :  { %3498 = vmatpush.msrb.mxu0 %v3449_v14 }
 0x497   :  { %v3016_v13 = vrot.slane %v6364_v32, 4  ;;  %3028 = vst.msk [vmem:[#allocation4 + $0x39] sm:$0xf] %vm3023_vm1, %v6364_v32 }
 0x498   :  { %3820 = vst [vmem:[#allocation1] ss:$2 sm:$0xff] %v6364_v32  ;;  %3499 = vmatpush.msrb.mxu0 %v3448_v6 }
 0x499   :  { %3029 = vst.msk [vmem:[#allocation4 + $0x41] sm:$0xf] %vm3023_vm1, %v3016_v13 }
 0x49a   :  { %3500 = vmatpush.msrb.mxu0 %v3447_v46 }
 0x49c   :  { %v6382_v37 = vld.sshfl [vmem:[#allocation1 + $0x10] sm:$0xff pattern:$0x75316420]  ;;  %3501 = vmatpush.msrb.mxu0 %v3446_v24 }
 0x49d   :  { %3822 = vst [vmem:[#allocation1 + $0x10] ss:$2 sm:$0xff] %v3016_v13  ;;  %v4426_v13 = vpack.i.bf16 %v6355_v38, %v6347_v17 }
 0x49e   :  { %v3039_v31 = vld [vmem:[#allocation4 + $0x38] sm:$0xff]  ;;  %3502 = vmatpush.msrb.mxu0 %v3445_v26 }
 0x49f   :  { %v3057_v11 = vrot.slane %v3039_v31, 4  ;;  %3179 = vst [vmem:[#allocation1 + $0x21] ss:$2 sm:$0xff] %v3039_v31  ;;  %v4073_v41 = vrot.slane %v3039_v31, 9  ;;  %v4081_v18 = vrot.slane %v3039_v31, 10 }
 0x4a0   :  { %v6379_v9 = vld [vmem:[#allocation4 + $0x40] sm:$0xff]  ;;  %3503 = vmatpush.msrb.mxu0 %v3444_v33 }
 0x4a1   :  { %3181 = vst [vmem:[#allocation1 + $0x30] ss:$2 sm:$0xff] %v6379_v9  ;;  %v3084_v4 = vrot.slane %v3057_v11, 5  ;;  %v3119_v40 = vrot.slane %v3057_v11, 6  ;;  %v3058_v52 = vrot.slane %v6379_v9, 4  ;;  %v4074_v59 = vrot.slane %v6379_v9, 9 }
 0x4a2   :  { %v3478_v11 = vld [vmem:[%s6679_s1 + $0x1f0] sm:$0xff]  ;;  %v4082_v44 = vrot.slane %v6379_v9, 10 }
 0x4a3   :  { %v3085_v29 = vsel %vm6292_vm13, %v4073_v41, %v3084_v4  ;;  %v3120_v36 = vsel %vm6308_vm4, %v4081_v18, %v3119_v40  ;;  %v3088_v55 = vrot.slane %v3058_v52, 5  ;;  %v3123_v42 = vrot.slane %v3058_v52, 6  ;;  %v3476_v41 = vld [vmem:[%s6679_s1 + $0x1e0] sm:$0xff] }
 0x4a5   :  { %v6442_v45 = vsel %vm6292_vm13, %v4074_v59, %v3088_v55  ;;  %v3124_v17 = vsel %vm6308_vm4, %v4082_v44, %v3123_v42 }
 0x4a6   :  { %v6386_v3 = vld.sshfl [vmem:[#allocation1 + $0x20] sm:$0xff pattern:$0x75316420] }
 0x4a7   :  { %3200 = vst [vmem:[#allocation1 + $0x20] ss:$2 sm:$0xff] %v3081_v1  ;;  %v3477_v1 = vld [vmem:[%s6679_s1 + $0x1e8] sm:$0xff] }
 0x4a8   :  { %3202 = vst [vmem:[#allocation1 + $0x21] ss:$2 sm:$0xff] %v3085_v29 }
 0x4af   :  { %v6405_v12 = vld.sshfl [vmem:[#allocation1 + $0x20] sm:$0xff pattern:$0x75316420] }
 0x4b0   :  { %3231 = vst [vmem:[#allocation1 + $0x20] ss:$2 sm:$0xff] %v3116_v47 }
 0x4b1   :  { %3233 = vst [vmem:[#allocation1 + $0x21] ss:$2 sm:$0xff] %v3120_v36 }
 0x4b2   :  { %v4398_v18 = vpop.permute.xlu2 %4397 }
 0x4b3   :  { %v4399_v57 = vunpack.i.l.bf16 %v4398_v18 }
 0x4b5   :  { %v3420_v14 = vsel %vm94_vm3, %v6298_v27, %v4399_v57  ;;  %v3823_v57 = vld.sshfl [vmem:[#allocation1 + $0x10] sm:$0xff pattern:$0x75316420] }
 0x4b8   :  { %v6418_v25 = vld.sshfl [vmem:[#allocation1 + $0x20] sm:$0xff pattern:$0x75316420] }
 0x4b9   :  { %3262 = vst [vmem:[#allocation1 + $0x20] ss:$2 sm:$0xff] %v3039_v31  ;;  %v3479_v31 = vld [vmem:[%s6679_s1 + $0x1f8] sm:$0xff] }
 0x4ba   :  { %3264 = vst [vmem:[#allocation1 + $0x21] ss:$2 sm:$0xff] %v6379_v9  ;;  %4103 = vmatpush.msrb.mxu3 %v3479_v31  ;;  %3558 = vmatpush.msra.mxu0 %v3479_v31  ;;  %v3472_v31 = vld [vmem:[%s6679_s1 + $0x1c0] sm:$0xff] }
 0x4bb   :  { %3520 = vmatpush.msrb.mxu2 %v3472_v31 }
 0x4bc   :  { %4104 = vmatpush.msrb.mxu3 %v3478_v11  ;;  %3559 = vmatpush.msra.mxu0 %v3478_v11 }
 0x4be   :  { %4105 = vmatpush.msrb.mxu3 %v3477_v1  ;;  %3560 = vmatpush.msra.mxu0 %v3477_v1  ;;  %v3471_v1 = vld [vmem:[%s6679_s1 + $0x1b8] sm:$0xff] }
 0x4bf   :  { %v3003_v34 = vpop.f32.mrf.mxu3  ;;  %3521 = vmatpush.msrb.mxu2 %v3471_v1 }
 0x4c0   :  { %v6435_v20 = vmax.f32 %v3003_v34, 0.0  ;;  %4106 = vmatpush.msrb.mxu3 %v3476_v41  ;;  %3561 = vmatpush.msra.mxu0 %v3476_v41 }
 0x4c1   :  { %v3271_v7 = vld.sshfl [vmem:[#allocation1 + $0x20] sm:$0xff pattern:$0x75316420] }
 0x4c2   :  { %3293 = vst [vmem:[#allocation1 + $0x20] ss:$2 sm:$0xff] %v3085_v29  ;;  %3277 = vrot.lane.b32.xlu1 %v3271_v7, %s4480_s20  ;;  %v3017_v8 = vrot.slane %v6435_v20, 4  ;;  %v4400_v7 = vunpack.i.h.bf16 %v4398_v18 }
 0x4c3   :  { %3295 = vst [vmem:[#allocation1 + $0x21] ss:$2 sm:$0xff] %v6442_v45 }
 0x4c4   :  { %3030 = vst.msk [vmem:[#allocation4 + $0x49] sm:$0xf] %vm3023_vm1, %v6435_v20  ;;  %v3421_v27 = vsel %vm94_vm3, %v6318_v23, %v4400_v7 }
 0x4c5   :  { %3031 = vst.msk [vmem:[#allocation4 + $0x51] sm:$0xf] %vm3023_vm1, %v3017_v8 }
 0x4ca   :  { %v6473_v56 = vld.sshfl [vmem:[#allocation1 + $0x20] sm:$0xff pattern:$0x75316420]  ;;  %4427 = vrot.lane.b32.xlu1 %v4426_v13, %s4478_s18 }
 0x4cb   :  { %3316 = vst [vmem:[#allocation1 + $0x20] ss:$2 sm:$0xff] %v3120_v36  ;;  %v3041_v38 = vld [vmem:[#allocation4 + $0x48] sm:$0xff] }
 0x4cc   :  { %3318 = vst [vmem:[#allocation1 + $0x21] ss:$2 sm:$0xff] %v3124_v17  ;;  %v3059_v4 = vrot.slane %v3041_v38, 4  ;;  %v4075_v61 = vrot.slane %v3041_v38, 9  ;;  %v4083_v10 = vrot.slane %v3041_v38, 10  ;;  %v3042_v34 = vld [vmem:[#allocation4 + $0x50] sm:$0xff] }
 0x4cd   :  { %3183 = vst [vmem:[#allocation1 + $0x31] ss:$2 sm:$0xff] %v3041_v38  ;;  %v3132_v46 = vrot.slane %v3042_v34, 4  ;;  %v4085_v11 = vrot.slane %v3042_v34, 9 }
 0x4ce   :  { %v3092_v29 = vrot.slane %v3059_v4, 5  ;;  %v3127_v47 = vrot.slane %v3059_v4, 6 }
 0x4cf   :  { %v3139_v13 = vrot.slane %v3132_v46, 5  ;;  %v3147_v4 = vrot.slane %v3132_v46, 6 }
 0x4d0   :  { %v3093_v40 = vsel %vm6292_vm13, %v4075_v61, %v3092_v29  ;;  %v3128_v22 = vsel %vm6308_vm4, %v4083_v10, %v3127_v47  ;;  %v3468_v10 = vld [vmem:[%s6679_s1 + $0x1a0] sm:$0xff] }
 0x4d3   :  { %v3325_v2 = vld.sshfl [vmem:[#allocation1 + $0x20] sm:$0xff pattern:$0x75316420] }
 0x4d4   :  { %v6487_v49 = vld.sshfl [vmem:[#allocation1 + $0x30] sm:$0xff pattern:$0x75316420]  ;;  %3331 = vrot.lane.b32.xlu1 %v3325_v2, %s4475_s9  ;;  %3347 = vst [vmem:[#allocation1 + $0x20] ss:$2 sm:$0xff] %v6379_v9  ;;  %v4403_v9 = vpop.permute.xlu0 %4402 }
 0x4d5   :  { %3204 = vst [vmem:[#allocation1 + $0x30] ss:$2 sm:$0xff] %v6442_v45  ;;  %v4404_v52 = vunpack.i.l.bf16 %v4403_v9  ;;  %v4405_v24 = vunpack.i.h.bf16 %v4403_v9 }
 0x4d6   :  { %3206 = vst [vmem:[#allocation1 + $0x31] ss:$2 sm:$0xff] %v3093_v40 }
 0x4d7   :  { %3349 = vst [vmem:[#allocation1 + $0x21] ss:$2 sm:$0xff] %v3041_v38  ;;  %v3425_v33 = vsel %vm1784_vm15, %v3421_v27, %v4405_v24 }
 0x4dc   :  { %3597 = vrot.lane.b32.xlu1 %v6279_v60, %s4480_s20  ;;  %v4408_v28 = vpop.permute.xlu1 %4407 }
 0x4dd   :  { %v3210_v36 = vld.sshfl [vmem:[#allocation1 + $0x30] sm:$0xff pattern:$0x75316420]  ;;  %v4409_v55 = vunpack.i.l.bf16 %v4408_v28  ;;  %v4410_v42 = vunpack.i.h.bf16 %v4408_v28  ;;  %v3460_v28 = vld [vmem:[%s6679_s1 + $0x160] sm:$0xff] }
 0x4de   :  { %3235 = vst [vmem:[#allocation1 + $0x30] ss:$2 sm:$0xff] %v3124_v17  ;;  %v3356_v63 = vld.sshfl [vmem:[#allocation1 + $0x20] sm:$0xff pattern:$0x75316420]  ;;  %v4411_v62 = vpack.i.bf16 %v3210_v36, %v6405_v12  ;;  %v3424_v12 = vsel %vm1784_vm15, %v3420_v14, %v4404_v52  ;;  %v3467_v36 = vld [vmem:[%s6679_s1 + $0x198] sm:$0xff] }
 0x4df   :  { %3237 = vst [vmem:[#allocation1 + $0x31] ss:$2 sm:$0xff] %v3128_v22  ;;  %v3428_v59 = vsel %vm1818_vm5, %v3424_v12, %v4409_v55  ;;  %v3594_v14 = vld [vmem:[%s6679_s1 + $0x218] sm:$0xff]  ;;  %v3593_v12 = vld [vmem:[%s6679_s1 + $0x210] sm:$0xff] }
 0x4e0   :  { %3378 = vst [vmem:[#allocation1 + $0x20] ss:$2 sm:$0xff] %v6442_v45  ;;  %4412 = vrot.lane.b32.xlu2 %v4411_v62, %s4475_s9  ;;  %3504 = vmatmul.f32.vlgmr.msrb.gmra.mxu0 %v3428_v59  ;;  %v3821_v62 = vld.sshfl [vmem:[#allocation1] sm:$0xff pattern:$0x75316420]  ;;  %v3592_v59 = vld [vmem:[%s6679_s1 + $0x208] sm:$0xff] }
 0x4e1   :  { %3380 = vst [vmem:[#allocation1 + $0x21] ss:$2 sm:$0xff] %v3093_v40  ;;  %3623 = vmatpush.msrb.mxu0 %v3594_v14 }
 0x4e3   :  { %3624 = vmatpush.msrb.mxu0 %v3593_v12 }
 0x4e5   :  { %3625 = vmatpush.msrb.mxu0 %v3592_v59 }
 0x4e6   :  { %v3241_v6 = vld.sshfl [vmem:[#allocation1 + $0x30] sm:$0xff pattern:$0x75316420] }
 0x4e7   :  { %3266 = vst [vmem:[#allocation1 + $0x30] ss:$2 sm:$0xff] %v3041_v38  ;;  %v4416_v45 = vpack.i.bf16 %v3241_v6, %v6418_v25  ;;  %v3429_v25 = vsel %vm1818_vm5, %v3425_v33, %v4410_v42  ;;  %v3140_v38 = vsel %vm6292_vm13, %v4085_v11, %v3139_v13  ;;  %v3591_v42 = vld [vmem:[%s6679_s1 + $0x200] sm:$0xff] }
 0x4e8   :  { %3268 = vst [vmem:[#allocation1 + $0x31] ss:$2 sm:$0xff] %v3042_v34  ;;  %v3387_v26 = vld.sshfl [vmem:[#allocation1 + $0x20] sm:$0xff pattern:$0x75316420]  ;;  %3507 = vmatmul.f32.gmra.mxu0 %v3429_v25 }
 0x4e9   :  { %4417 = vrot.lane.b32.xlu0 %v4416_v45, %s4478_s18  ;;  %3409 = vst [vmem:[#allocation1 + $0x20] ss:$2 sm:$0xff] %v3124_v17  ;;  %v4421_v17 = vpack.i.bf16 %v6349_v35, %v6339_v51  ;;  %v4431_v51 = vpack.i.bf16 %v6362_v16, %v6351_v30  ;;  %v4087_v35 = vrot.slane %v3042_v34, 10  ;;  %v3470_v30 = vld [vmem:[%s6679_s1 + $0x1b0] sm:$0xff]  ;;  %v3043_v16 = vld [vmem:[#allocation4 + $0x58] sm:$0xff]  ;;  %3626 = vmatpush.msrb.mxu0 %v3591_v42 }
 0x4ea   :  { %3411 = vst [vmem:[#allocation1 + $0x21] ss:$2 sm:$0xff] %v3128_v22  ;;  %3522 = vmatpush.msrb.mxu2 %v3470_v30  ;;  %v3152_v61 = vrot.slane %v3043_v16, 4  ;;  %v4091_v9 = vrot.slane %v3043_v16, 10 }
 0x4eb   :  { %v3148_v29 = vsel %vm6308_vm4, %v4087_v35, %v3147_v4 }
 0x4ec   :  { %3523 = vmatpush.msrb.mxu2 %v3469_v53 }
 0x4ee   :  { %3524 = vmatpush.msrb.mxu2 %v3468_v10 }
 0x4ef   :  { %v3272_v44 = vld.sshfl [vmem:[#allocation1 + $0x30] sm:$0xff pattern:$0x75316420] }
 0x4f0   :  { %3279 = vrot.lane.b32.xlu2 %v3272_v44, %s4480_s20  ;;  %3297 = vst [vmem:[#allocation1 + $0x30] ss:$2 sm:$0xff] %v3093_v40  ;;  %v3159_v40 = vrot.slane %v3152_v61, 5  ;;  %3525 = vmatpush.msrb.mxu2 %v3467_v36 }
 0x4f1   :  { %v3418_v23 = vld.sshfl [vmem:[#allocation1 + $0x20] sm:$0xff pattern:$0x75316420]  ;;  %3299 = vst [vmem:[#allocation1 + $0x31] ss:$2 sm:$0xff] %v3140_v38  ;;  %4422 = vrot.lane.b32.xlu0 %v4421_v17, %s4475_s9 }
 0x4f2   :  { %4094 = vmatmul.msk.f32.vlgmr.msrb.gmra.mxu3 %vm94_vm3, %v3418_v23  ;;  %3815 = vst [vmem:[#allocation1 + $0x20] ss:$2 sm:$0xff] %v6279_v60  ;;  %v3464_v60 = vld [vmem:[%s6679_s1 + $0x180] sm:$0xff] }
 0x4f8   :  { %4432 = vrot.lane.b32.xlu2 %v4431_v51, %s4480_s20  ;;  %v6534_v41 = vld.sshfl [vmem:[#allocation1 + $0x30] sm:$0xff pattern:$0x75316420] }
 0x4f9   :  { %3595 = vrot.lane.b32.xlu0 %v6264_v39, %s4480_s20  ;;  %3320 = vst [vmem:[#allocation1 + $0x30] ss:$2 sm:$0xff] %v3128_v22  ;;  %v3816_v5 = vld.sshfl [vmem:[#allocation1 + $0x20] sm:$0xff pattern:$0x75316420]  ;;  %v4089_v39 = vrot.slane %v3043_v16, 9 }
 0x4fa   :  { %3322 = vst [vmem:[#allocation1 + $0x31] ss:$2 sm:$0xff] %v3148_v29  ;;  %v3167_v22 = vrot.slane %v3152_v61, 6 }
 0x4fb   :  { %3824 = vst [vmem:[#allocation1 + $0x20] ss:$2 sm:$0xff] %v6435_v20  ;;  %v3160_v47 = vsel %vm6292_vm13, %v4089_v39, %v3159_v40 }
 0x4fc   :  { %v3168_v21 = vsel %vm6308_vm4, %v4091_v9, %v3167_v22 }
 0x500   :  { %3362 = vrot.lane.b32.xlu2 %v3356_v63, %s4478_s18 }
 0x501   :  { %3393 = vrot.lane.b32.xlu0 %v3387_v26, %s4480_s20  ;;  %v3326_v2 = vld.sshfl [vmem:[#allocation1 + $0x30] sm:$0xff pattern:$0x75316420] }
 0x502   :  { %3351 = vst [vmem:[#allocation1 + $0x30] ss:$2 sm:$0xff] %v3042_v34 }
 0x503   :  { %3353 = vst [vmem:[#allocation1 + $0x31] ss:$2 sm:$0xff] %v3043_v16 }
 0x508   :  { %3333 = vrot.lane.b32.xlu2 %v3326_v2, %s4475_s9 }
 0x50a   :  { %v3357_v18 = vld.sshfl [vmem:[#allocation1 + $0x30] sm:$0xff pattern:$0x75316420] }
 0x50b   :  { %3364 = vrot.lane.b32.xlu0 %v3357_v18, %s4478_s18  ;;  %3382 = vst [vmem:[#allocation1 + $0x30] ss:$2 sm:$0xff] %v3140_v38 }
 0x50c   :  { %3384 = vst [vmem:[#allocation1 + $0x31] ss:$2 sm:$0xff] %v3160_v47 }
 0x510   :  { %3599 = vrot.lane.b32.xlu2 %v6364_v32, %s4480_s20  ;;  %v3466_v32 = vld [vmem:[%s6679_s1 + $0x190] sm:$0xff] }
 0x511   :  { %3526 = vmatpush.msrb.mxu2 %v3466_v32 }
 0x513   :  { %v3388_v63 = vld.sshfl [vmem:[#allocation1 + $0x30] sm:$0xff pattern:$0x75316420]  ;;  %3601 = vrot.lane.b32.xlu0 %v6435_v20, %s4480_s20 }
 0x514   :  { %3395 = vrot.lane.b32.xlu1 %v3388_v63, %s4480_s20  ;;  %3413 = vst [vmem:[#allocation1 + $0x30] ss:$2 sm:$0xff] %v3148_v29  ;;  %v3462_v20 = vld [vmem:[%s6679_s1 + $0x170] sm:$0xff] }
 0x515   :  { %3415 = vst [vmem:[#allocation1 + $0x31] ss:$2 sm:$0xff] %v3168_v21 }
 0x518   :  { %3830 = vrot.lane.b32.xlu2 %v6382_v37, %s4478_s18  ;;  %v3465_v37 = vld [vmem:[%s6679_s1 + $0x188] sm:$0xff] }
 0x519   :  { %3527 = vmatpush.msrb.mxu2 %v3465_v37 }
 0x51b   :  { %3832 = vrot.lane.b32.xlu0 %v3816_v5, %s4478_s18  ;;  %3528 = vmatpush.msrb.mxu2 %v3464_v60 }
 0x51c   :  { %3828 = vrot.lane.b32.xlu1 %v6369_v43, %s4478_s18  ;;  %v3419_v19 = vld.sshfl [vmem:[#allocation1 + $0x30] sm:$0xff pattern:$0x75316420] }
 0x51d   :  { %4095 = vmatmul.msk.f32.gmra.mxu3 %vm94_vm3, %v3419_v19  ;;  %3818 = vst [vmem:[#allocation1 + $0x30] ss:$2 sm:$0xff] %v3015_v15  ;;  %v3825_v15 = vld.sshfl [vmem:[#allocation1 + $0x20] sm:$0xff pattern:$0x75316420]  ;;  %3529 = vmatpush.msrb.mxu2 %v3463_v0 }
 0x51f   :  { %3530 = vmatpush.msrb.mxu2 %v3462_v20 }
 0x520   :  { %3836 = vrot.lane.b32.xlu2 %v3821_v62, %s4478_s18 }
 0x523   :  { %3838 = vrot.lane.b32.xlu0 %v3823_v57, %s4478_s18 }
 0x524   :  { %v3819_v52 = vld.sshfl [vmem:[#allocation1 + $0x30] sm:$0xff pattern:$0x75316420] }
 0x525   :  { %3834 = vrot.lane.b32.xlu1 %v3819_v52, %s4478_s18  ;;  %3826 = vst [vmem:[#allocation1 + $0x30] ss:$2 sm:$0xff] %v3017_v8  ;;  %v3461_v8 = vld [vmem:[%s6679_s1 + $0x168] sm:$0xff] }
 0x526   :  { %3531 = vmatpush.msrb.mxu2 %v3461_v8 }
 0x528   :  { %3532 = vmatpush.msrb.mxu2 %v3460_v28 }
 0x52c   :  { %v3827_v43 = vld.sshfl [vmem:[#allocation1 + $0x30] sm:$0xff pattern:$0x75316420] }
 0x52d   :  { %3840 = vrot.lane.b32.xlu1 %v3825_v15, %s4478_s18  ;;  %3842 = vrot.lane.b32.xlu2 %v3827_v43, %s4478_s18  ;;  %v3673_v43 = vld [vmem:[#allocation6] sm:$0xff] }
 0x534   :  { %v3278_v34 = vpop.permute.xlu1 %3277 }
 0x53a   :  { %v4413_v55 = vpop.permute.xlu2 %4412 }
 0x53b   :  { %v4414_v6 = vunpack.i.l.bf16 %v4413_v55  ;;  %v4415_v27 = vunpack.i.h.bf16 %v4413_v55  ;;  %v3693_v55 = vrot.slane %v3673_v43, 1 }
 0x53c   :  { %v4428_v31 = vpop.permute.xlu1 %4427 }
 0x53d   :  { %v3422_v24 = vsel %vm94_vm3, %v6386_v3, %v4414_v6  ;;  %v3423_v44 = vsel %vm94_vm3, %v6487_v49, %v4415_v27  ;;  %v4429_v38 = vunpack.i.l.bf16 %v4428_v31  ;;  %v4430_v5 = vunpack.i.h.bf16 %v4428_v31 }
 0x546   :  { %v3332_v2 = vpop.permute.xlu1 %3331 }
 0x547   :  { %v3434_v53 = vsel %vm94_vm3, %v6473_v56, %v3332_v2 }
 0x54a   :  { %v3280_v7 = vpop.permute.xlu2 %3279 }
 0x54e   :  { %v3598_v18 = vpop.permute.xlu1 %3597 }
 0x552   :  { %v4433_v25 = vpop.permute.xlu2 %4432 }
 0x553   :  { %v4434_v23 = vunpack.i.l.bf16 %v4433_v25  ;;  %v4435_v61 = vunpack.i.h.bf16 %v4433_v25 }
 0x55a   :  { %v3363_v39 = vpop.permute.xlu2 %3362 }
 0x55b   :  { %v4418_v45 = vpop.permute.xlu0 %4417  ;;  %v3438_v47 = vsel %vm1784_vm15, %v3434_v53, %v3363_v39 }
 0x55c   :  { %v4419_v46 = vunpack.i.l.bf16 %v4418_v45  ;;  %v4420_v33 = vunpack.i.h.bf16 %v4418_v45  ;;  %v3709_v45 = vmax.f32 %v3673_v43, %v3693_v55 }
 0x55d   :  { %v3505_v63 = vpop.f32.mrf.mxu0 }
 0x55e   :  { %v3426_v26 = vsel %vm1784_vm15, %v3422_v24, %v4419_v46  ;;  %v3427_v3 = vsel %vm1784_vm15, %v3423_v44, %v4420_v33  ;;  %v3717_v46 = vrot.slane %v3673_v43, 2 }
 0x55f   :  { %v3430_v13 = vsel %vm1818_vm5, %v3426_v26, %v3278_v34  ;;  %v3431_v51 = vsel %vm1818_vm5, %v3427_v3, %v3280_v7 }
 0x560   :  { %3510 = vmatmul.f32.gmra.mxu0 %v3430_v13  ;;  %v3733_v13 = vmax.f32 %v3709_v45, %v3717_v46 }
 0x563   :  { %v4423_v11 = vpop.permute.xlu0 %4422 }
 0x564   :  { %v4424_v17 = vunpack.i.l.bf16 %v4423_v11  ;;  %v4425_v4 = vunpack.i.h.bf16 %v4423_v11 }
 0x565   :  { %v3508_v32 = vpop.f32.mrf.mxu0 }
 0x566   :  { %v3432_v1 = vsel %vm94_vm3, %v6334_v54, %v4424_v17  ;;  %v3433_v49 = vsel %vm94_vm3, %v6342_v50, %v4425_v4  ;;  %v3679_v4 = vld [vmem:[#allocation6 + $0x30] sm:$0xff] }
 0x567   :  { %v3436_v35 = vsel %vm1784_vm15, %v3432_v1, %v4429_v38  ;;  %v3437_v16 = vsel %vm1784_vm15, %v3433_v49, %v4430_v5  ;;  %v3697_v2 = vrot.slane %v3679_v4, 1 }
 0x568   :  { %3513 = vmatmul.f32.gmra.mxu0 %v3431_v51  ;;  %v3440_v29 = vsel %vm1818_vm5, %v3436_v35, %v4434_v23  ;;  %v3441_v54 = vsel %vm1818_vm5, %v3437_v16, %v4435_v61 }
 0x569   :  { %3533 = vmatmul.f32.vlgmr.msrb.gmra.mxu2 %v3440_v29 }
 0x56b   :  { %v3596_v30 = vpop.permute.xlu0 %3595 }
 0x570   :  { %4092 = vmatmul.msk.f32.vlgmr.msra.gmra.mxu0 %vm94_vm3, %v6357_v48  ;;  %v3334_v48 = vpop.permute.xlu2 %3333 }
 0x571   :  { %3536 = vmatmul.f32.gmra.mxu2 %v3441_v54  ;;  %v3435_v36 = vsel %vm94_vm3, %v6534_v41, %v3334_v48 }
 0x573   :  { %v3394_v40 = vpop.permute.xlu0 %3393 }
 0x574   :  { %v3442_v50 = vsel %vm1818_vm5, %v3438_v47, %v3394_v40 }
 0x575   :  { %v3569_v27 = vpop.f32.mrf.mxu3 }
 0x578   :  { %4093 = vmatmul.msk.f32.gmra.mxu0 %vm94_vm3, %v6373_v58  ;;  %v3600_v58 = vpop.permute.xlu2 %3599 }
 0x579   :  { %3539 = vmatmul.f32.gmra.mxu2 %v3442_v50 }
 0x57d   :  { %v3365_v10 = vpop.permute.xlu0 %3364 }
 0x57e   :  { %v3439_v9 = vsel %vm1784_vm15, %v3435_v36, %v3365_v10 }
 0x580   :  { %4096 = vmatmul.msk.f32.vlgmr.msrb.gmra.mxu0 %vm94_vm3, %v3596_v30 }
 0x585   :  { %v3602_v21 = vpop.permute.xlu0 %3601 }
 0x586   :  { %v3396_v22 = vpop.permute.xlu1 %3395 }
 0x587   :  { %v3443_v56 = vsel %vm1818_vm5, %v3439_v9, %v3396_v22  ;;  %vm3949_vm5 = vcmask 74752  }
 0x588   :  { %3542 = vmatmul.f32.gmra.mxu2 %v3443_v56  ;;  %4097 = vmatmul.msk.f32.gmra.mxu0 %vm94_vm3, %v3598_v18 }
 0x58e   :  { %v3829_v43 = vpop.permute.xlu1 %3828 }
 0x590   :  { %4098 = vmatmul.msk.f32.gmra.mxu0 %vm94_vm3, %v3600_v58 }
 0x598   :  { %4099 = vmatmul.msk.f32.gmra.mxu0 %vm94_vm3, %v3602_v21 }
 0x5a0   :  { %v3572_v39 = vpop.f32.mrf.mxu3 }
 0x5dd   :  { %v3511_v19 = vpop.f32.mrf.mxu0 }
 0x5e5   :  { %v3514_v37 = vpop.f32.mrf.mxu0 }
 0x5ec   :  { %v3534_v41 = vpop.f32.mrf.mxu2 }
 0x5ed   :  { %v3563_v62 = vpop.f32.mrf.mxu0  ;;  %v3535_v57 = vadd.f32 %v3534_v41, %v3505_v63 }
 0x5ef   :  { %v3564_v60 = vadd.f32 %v3563_v62, %v3535_v57  ;;  %v3721_v57 = vrot.slane %v3679_v4, 2 }
 0x5f1   :  { %v3575_v0 = vmax.f32 %v3564_v60, 0.0 }
 0x5f3   :  { %v3583_v14 = vrot.slane %v3575_v0, 4 }
 0x5f4   :  { %v3537_v15 = vpop.f32.mrf.mxu2 }
 0x5f5   :  { %v3566_v52 = vpop.f32.mrf.mxu0  ;;  %v3538_v20 = vadd.f32 %v3537_v15, %v3508_v32 }
 0x5f7   :  { %v3567_v12 = vadd.f32 %v3566_v52, %v3538_v20 }
 0x5f9   :  { %v3576_v24 = vmax.f32 %v3567_v12, 0.0 }
 0x5fb   :  { %v3584_v31 = vrot.slane %v3576_v24, 4 }
 0x5fc   :  { %v3540_v6 = vpop.f32.mrf.mxu2 }
 0x5fd   :  { %v3628_v8 = vpop.f32.mrf.mxu0  ;;  %v3541_v26 = vadd.f32 %v3540_v6, %v3511_v19  ;;  %v3713_v19 = vmax.f32 %v3679_v4, %v3697_v2 }
 0x5fe   :  { %v3640_v28 = vmax.f32 %v3628_v8, 0.0 }
 0x5ff   :  { %v3570_v44 = vadd.f32 %v3569_v27, %v3541_v26  ;;  %v3737_v46 = vmax.f32 %v3713_v19, %v3721_v57  ;;  %v3835_v19 = vpop.permute.xlu1 %3834 }
 0x600   :  { %v3648_v34 = vrot.slane %v3640_v28, 4  ;;  %v3656_v59 = vadd.f32 %v3640_v28, %v3575_v0 }
 0x601   :  { %v3577_v30 = vmax.f32 %v3570_v44, 0.0 }
 0x602   :  { %v3657_v7 = vadd.f32 %v3648_v34, %v3583_v14  ;;  %3665 = vst.msk [vmem:[#allocation6 + $0x9] sm:$0xf] %vm3023_vm1, %v3656_v59  ;;  %v3921_v34 = vld [vmem:[%s6679_s1 + $0x238] sm:$0xff]  ;;  %v3920_v59 = vld [vmem:[%s6679_s1 + $0x230] sm:$0xff] }
 0x603   :  { %v3585_v22 = vrot.slane %v3577_v30, 4  ;;  %3941 = vmatpush.msra.mxu2 %v3921_v34 }
 0x604   :  { %3666 = vst.msk [vmem:[#allocation6 + $0x11] sm:$0xf] %vm3023_vm1, %v3657_v7 }
 0x605   :  { %v3631_v42 = vpop.f32.mrf.mxu0  ;;  %3942 = vmatpush.msra.mxu2 %v3920_v59 }
 0x606   :  { %v3641_v33 = vmax.f32 %v3631_v42, 0.0 }
 0x608   :  { %v3649_v25 = vrot.slane %v3641_v33, 4  ;;  %v3658_v11 = vadd.f32 %v3641_v33, %v3576_v24  ;;  %v3678_v33 = vld [vmem:[#allocation6 + $0x28] sm:$0xff] }
 0x609   :  { %v3674_v17 = vld [vmem:[#allocation6 + $0x8] sm:$0xff] }
 0x60a   :  { %v3694_v3 = vrot.slane %v3674_v17, 1  ;;  %v3741_v38 = vmax.f32 %v3733_v13, %v3674_v17  ;;  %v3659_v23 = vadd.f32 %v3649_v25, %v3584_v31  ;;  %3667 = vst.msk [vmem:[#allocation6 + $0x19] sm:$0xf] %vm3023_vm1, %v3658_v11  ;;  %v3718_v49 = vrot.slane %v3674_v17, 2  ;;  %v3919_v13 = vld [vmem:[%s6679_s1 + $0x228] sm:$0xff] }
 0x60b   :  { %v3675_v1 = vld [vmem:[#allocation6 + $0x10] sm:$0xff]  ;;  %v3543_v51 = vpop.f32.mrf.mxu2  ;;  %3943 = vmatpush.msra.mxu2 %v3919_v13 }
 0x60c   :  { %v3695_v35 = vrot.slane %v3675_v1, 1  ;;  %v3710_v29 = vmax.f32 %v3674_v17, %v3694_v3  ;;  %v3755_v5 = vmax.f32 %v3741_v38, %v3694_v3  ;;  %3668 = vst.msk [vmem:[#allocation6 + $0x21] sm:$0xf] %vm3023_vm1, %v3659_v23  ;;  %v3719_v16 = vrot.slane %v3675_v1, 2  ;;  %v3918_v38 = vld [vmem:[%s6679_s1 + $0x220] sm:$0xff] }
 0x60d   :  { %v3544_v61 = vadd.f32 %v3543_v51, %v3514_v37  ;;  %v3634_v54 = vpop.f32.mrf.mxu0  ;;  %v3831_v51 = vpop.permute.xlu2 %3830  ;;  %3944 = vmatpush.msra.mxu2 %v3918_v38 }
 0x60e   :  { %v3711_v40 = vmax.f32 %v3675_v1, %v3695_v35  ;;  %v3734_v53 = vmax.f32 %v3710_v29, %v3718_v49  ;;  %v3767_v47 = vmax.f32 %v3755_v5, %v3718_v49  ;;  %v3642_v50 = vmax.f32 %v3634_v54, 0.0 }
 0x60f   :  { %v3573_v18 = vadd.f32 %v3572_v39, %v3544_v61  ;;  %v3785_v29 = vrot.slane %v3678_v33, 1  ;;  %v3833_v39 = vpop.permute.xlu0 %3832 }
 0x610   :  { %v3742_v48 = vmax.f32 %v3734_v53, %v3675_v1  ;;  %v3775_v10 = vmax.f32 %v3767_v47, %v3675_v1  ;;  %v3735_v36 = vmax.f32 %v3711_v40, %v3719_v16  ;;  %v3650_v9 = vrot.slane %v3642_v50, 4 }
 0x611   :  { %v3676_v56 = vld [vmem:[#allocation6 + $0x18] sm:$0xff]  ;;  %v3660_v58 = vadd.f32 %v3642_v50, %v3577_v30  ;;  %v3578_v62 = vmax.f32 %v3573_v18, 0.0  ;;  %v3797_v53 = vrot.slane %v3678_v33, 2 }
 0x612   :  { %v3756_v21 = vmax.f32 %v3742_v48, %v3695_v35  ;;  %v3789_v63 = vmax.f32 %v3775_v10, %v3695_v35  ;;  %v3696_v32 = vrot.slane %v3676_v56, 1  ;;  %v3743_v37 = vmax.f32 %v3735_v36, %v3676_v56 }
 0x613   :  { %v3661_v41 = vadd.f32 %v3650_v9, %v3585_v22  ;;  %3669 = vst.msk [vmem:[#allocation6 + $0x39] sm:$0xf] %vm3023_vm1, %v3660_v58  ;;  %v3720_v15 = vrot.slane %v3676_v56, 2  ;;  %v3677_v0 = vld [vmem:[#allocation6 + $0x20] sm:$0xff]  ;;  %v3586_v45 = vrot.slane %v3578_v62, 4 }
 0x614   :  { %v3801_v52 = vmax.f32 %v3789_v63, %v3719_v16  ;;  %v3712_v60 = vmax.f32 %v3676_v56, %v3696_v32  ;;  %v3757_v20 = vmax.f32 %v3743_v37, %v3696_v32  ;;  %v3768_v8 = vmax.f32 %v3756_v21, %v3719_v16 }
 0x615   :  { %3670 = vst.msk [vmem:[#allocation6 + $0x41] sm:$0xf] %vm3023_vm1, %v3661_v41  ;;  %v3637_v28 = vpop.f32.mrf.mxu0  ;;  %v3751_v26 = vrot.slane %v3677_v0, 1  ;;  %v3763_v44 = vrot.slane %v3677_v0, 2 }
 0x616   :  { %v3852_v55 = vadd.f32 %v3829_v43, %v3801_v52  ;;  %v3736_v14 = vmax.f32 %v3712_v60, %v3720_v15  ;;  %v3643_v12 = vmax.f32 %v3637_v28, 0.0  ;;  %v3769_v6 = vmax.f32 %v3757_v20, %v3720_v15  ;;  %v3837_v28 = vpop.permute.xlu2 %3836 }
 0x617   :  { %v3776_v7 = vmax.f32 %v3768_v8, %v3676_v56 }
 0x618   :  { %3868 = vst [vmem:[#allocation1] ss:$2 sm:$0xff] %v3852_v55  ;;  %v3744_v24 = vmax.f32 %v3736_v14, %v3677_v0  ;;  %v3651_v42 = vrot.slane %v3643_v12, 4  ;;  %v3662_v27 = vadd.f32 %v3643_v12, %v3578_v62  ;;  %v3777_v31 = vmax.f32 %v3769_v6, %v3677_v0  ;;  %v3684_v6 = vld [vmem:[#allocation6 + $0x58] sm:$0xff] }
 0x619   :  { %v3790_v25 = vmax.f32 %v3776_v7, %v3696_v32  ;;  %v3798_v38 = vrot.slane %v3684_v6, 2 }
 0x61a   :  { %v3758_v11 = vmax.f32 %v3744_v24, %v3751_v26  ;;  %v3680_v17 = vld [vmem:[#allocation6 + $0x38] sm:$0xff]  ;;  %v3663_v3 = vadd.f32 %v3651_v42, %v3586_v45  ;;  %3671 = vst.msk [vmem:[#allocation6 + $0x49] sm:$0xf] %vm3023_vm1, %v3662_v27  ;;  %v3791_v23 = vmax.f32 %v3777_v31, %v3751_v26  ;;  %v3839_v27 = vpop.permute.xlu0 %3838 }
 0x61b   :  { %v3802_v4 = vmax.f32 %v3790_v25, %v3720_v15  ;;  %v3698_v1 = vrot.slane %v3680_v17, 1  ;;  %v3722_v5 = vrot.slane %v3680_v17, 2  ;;  %v3745_v30 = vmax.f32 %v3737_v46, %v3680_v17 }
 0x61c   :  { %v3770_v35 = vmax.f32 %v3758_v11, %v3763_v44  ;;  %v3681_v49 = vld [vmem:[#allocation6 + $0x40] sm:$0xff]  ;;  %3672 = vst.msk [vmem:[#allocation6 + $0x51] sm:$0xf] %vm3023_vm1, %v3663_v3  ;;  %v3803_v16 = vmax.f32 %v3791_v23, %v3763_v44 }
 0x61d   :  { %v3853_v61 = vadd.f32 %v3831_v51, %v3802_v4  ;;  %v3699_v54 = vrot.slane %v3681_v49, 1  ;;  %v3714_v2 = vmax.f32 %v3680_v17, %v3698_v1  ;;  %v3759_v47 = vmax.f32 %v3745_v30, %v3698_v1  ;;  %v3841_v17 = vpop.permute.xlu1 %3840 }
 0x61e   :  { %v3778_v40 = vmax.f32 %v3770_v35, %v3678_v33  ;;  %v3854_v50 = vadd.f32 %v3833_v39, %v3803_v16  ;;  %v3723_v48 = vrot.slane %v3681_v49, 2  ;;  %v3786_v33 = vrot.slane %v3684_v6, 1 }
 0x61f   :  { %3870 = vst [vmem:[#allocation1 + $0x1] ss:$2 sm:$0xff] %v3853_v61  ;;  %v3715_v18 = vmax.f32 %v3681_v49, %v3699_v54  ;;  %v3738_v10 = vmax.f32 %v3714_v2, %v3722_v5  ;;  %v3771_v9 = vmax.f32 %v3759_v47, %v3722_v5  ;;  %v3843_v5 = vpop.permute.xlu2 %3842 }
 0x620   :  { %v3792_v36 = vmax.f32 %v3778_v40, %v3785_v29  ;;  %3872 = vst [vmem:[#allocation1 + $0x10] ss:$2 sm:$0xff] %v3854_v50  ;;  %v4482_v29 = vmov 16.0  }
 0x621   :  { %v3746_v22 = vmax.f32 %v3738_v10, %v3681_v49  ;;  %v3682_v56 = vld [vmem:[#allocation6 + $0x48] sm:$0xff]  ;;  %v3739_v58 = vmax.f32 %v3715_v18, %v3723_v48  ;;  %v3779_v63 = vmax.f32 %v3771_v9, %v3681_v49  ;;  %4437 = vrcp.f32 %v4482_v29 }
 0x622   :  { %v3804_v21 = vmax.f32 %v3792_v36, %v3797_v53  ;;  %v3700_v32 = vrot.slane %v3682_v56, 1  ;;  %v3724_v60 = vrot.slane %v3682_v56, 2 }
 0x623   :  { %v3747_v37 = vmax.f32 %v3739_v58, %v3682_v56  ;;  %v3760_v62 = vmax.f32 %v3746_v22, %v3699_v54  ;;  %v3793_v57 = vmax.f32 %v3779_v63, %v3699_v54  ;;  %v3683_v15 = vld [vmem:[#allocation6 + $0x50] sm:$0xff] }
 0x624   :  { %v3855_v41 = vadd.f32 %v3835_v19, %v3804_v21  ;;  %v3716_v52 = vmax.f32 %v3682_v56, %v3700_v32  ;;  %v3752_v59 = vrot.slane %v3683_v15, 1  ;;  %v3764_v24 = vrot.slane %v3683_v15, 2 }
 0x625   :  { %v3761_v43 = vmax.f32 %v3747_v37, %v3700_v32  ;;  %v3772_v0 = vmax.f32 %v3760_v62, %v3723_v48  ;;  %v3805_v20 = vmax.f32 %v3793_v57, %v3723_v48 }
 0x626   :  { %3874 = vst [vmem:[#allocation1 + $0x11] ss:$2 sm:$0xff] %v3855_v41  ;;  %v3740_v8 = vmax.f32 %v3716_v52, %v3724_v60  ;;  %v3875_v11 = vld.sshfl [vmem:[#allocation1] sm:$0xff pattern:$0x75316420] }
 0x627   :  { %v3773_v55 = vmax.f32 %v3761_v43, %v3724_v60  ;;  %v3780_v14 = vmax.f32 %v3772_v0, %v3682_v56  ;;  %v3856_v12 = vadd.f32 %v3837_v28, %v3805_v20  ;;  %v3891_v51 = vsel %vm94_vm3, %v3875_v11, 0.0  ;;  %v4438_v61 = vpop.eup %4437 }
 0x628   :  { %v3748_v34 = vmax.f32 %v3740_v8, %v3683_v15  ;;  %v3910_v2 = vmul.f32 16.0, %v4438_v61  ;;  %vm3914_vm15 = vweird.f32 %v4438_v61 }
 0x629   :  { %v3781_v7 = vmax.f32 %v3773_v55, %v3683_v15  ;;  %v3794_v45 = vmax.f32 %v3780_v14, %v3700_v32  ;;  %3878 = vst [vmem:[#allocation1 + $0x20] ss:$2 sm:$0xff] %v3856_v12 }
 0x62a   :  { %v3762_v46 = vmax.f32 %v3748_v34, %v3752_v59  ;;  %v3911_v18 = vsub.f32 1.0, %v3910_v2 }
 0x62b   :  { %v3795_v26 = vmax.f32 %v3781_v7, %v3752_v59  ;;  %v3806_v42 = vmax.f32 %v3794_v45, %v3724_v60  ;;  %v4436_v60 = vld [vmem:[%s6679_s1 + $0x240] ss:$0 sm:$0xff] }
 0x62c   :  { %v3774_v13 = vmax.f32 %v3762_v46, %v3764_v24  ;;  %v3912_v9 = vmul.f32 %v4438_v61, %v3911_v18 }
 0x62d   :  { %v3807_v31 = vmax.f32 %v3795_v26, %v3764_v24  ;;  %v3857_v25 = vadd.f32 %v3839_v27, %v3806_v42  ;;  %v3876_v44 = vld.sshfl [vmem:[#allocation1 + $0x10] sm:$0xff pattern:$0x75316420] }
 0x62e   :  { %v3782_v3 = vmax.f32 %v3774_v13, %v3684_v6  ;;  %v3892_v23 = vsel %vm94_vm3, %v3876_v44, 0.0  ;;  %v3913_v21 = vadd.f32 %v4438_v61, %v3912_v9 }
 0x62f   :  { %v3858_v4 = vadd.f32 %v3841_v17, %v3807_v31  ;;  %3880 = vst [vmem:[#allocation1 + $0x21] ss:$2 sm:$0xff] %v3857_v25  ;;  %v3893_v35 = vadd.f32 %v3892_v23, %v3891_v51 }
 0x630   :  { %v3796_v1 = vmax.f32 %v3782_v3, %v3786_v33  ;;  %v3915_v37 = vsel %vm3914_vm15, %v4438_v61, %v3913_v21 }
 0x631   :  { %3882 = vst [vmem:[#allocation1 + $0x30] ss:$2 sm:$0xff] %v3858_v4  ;;  %v3894_v16 = vrot.slane %v3893_v35, 4 }
 0x632   :  { %v3808_v49 = vmax.f32 %v3796_v1, %v3798_v38 }
 0x633   :  { %v3895_v54 = vadd.f32 %v3894_v16, %v3893_v35 }
 0x634   :  { %v3859_v30 = vadd.f32 %v3843_v5, %v3808_v49 }
 0x635   :  { %v3896_v53 = vrot.slane %v3895_v54, 2 }
 0x636   :  { %3884 = vst [vmem:[#allocation1 + $0x31] ss:$2 sm:$0xff] %v3859_v30  ;;  %v3885_v39 = vld.sshfl [vmem:[#allocation1 + $0x20] sm:$0xff pattern:$0x75316420] }
 0x637   :  { %v3900_v47 = vsel %vm94_vm3, %v3885_v39, 0.0  ;;  %v3897_v10 = vadd.f32 %v3896_v53, %v3895_v54 }
 0x639   :  { %v3898_v56 = vrot.slane %v3897_v10, 1 }
 0x63b   :  { %v3899_v32 = vadd.f32 %v3898_v56, %v3897_v10 }
 0x63d   :  { %v3886_v40 = vld.sshfl [vmem:[#allocation1 + $0x30] sm:$0xff pattern:$0x75316420]  ;;  %v3916_v41 = vmul.f32 %v3915_v37, %v3899_v32 }
 0x63e   :  { %v3901_v50 = vsel %vm94_vm3, %v3886_v40, 0.0 }
 0x63f   :  { %v3902_v48 = vadd.f32 %v3901_v50, %v3900_v47 }
 0x641   :  { %v3903_v36 = vrot.slane %v3902_v48, 4 }
 0x643   :  { %v3904_v22 = vadd.f32 %v3903_v36, %v3902_v48 }
 0x645   :  { %v3905_v58 = vrot.slane %v3904_v22, 2 }
 0x647   :  { %v3906_v63 = vadd.f32 %v3905_v58, %v3904_v22 }
 0x649   :  { %v3907_v19 = vrot.slane %v3906_v63, 1 }
 0x64b   :  { %v3908_v62 = vadd.f32 %v3907_v19, %v3906_v63 }
 0x64d   :  { %v3917_v57 = vmul.f32 %v3915_v37, %v3908_v62 }
 0x64f   :  { %v3926_v52 = vsel %vm2934_vm7, %v3917_v57, %v3916_v41 }
 0x650   :  { %4100 = vmatmul.msk.f32.vlgmr.msra.gmra.mxu2 %vm94_vm3, %v3926_v52 }
 0x6d3   :  { %v3946_v15 = vpop.f32.mrf.mxu2 }
 0x6d4   :  { %v3947_v43 = vadd.f32 %v4436_v60, %v3946_v15 }
 0x6d6   :  { %3950 = vst.msk [vmem:[#allocation7] sm:$0x3] %vm3949_vm5, %v3947_v43 }
 0x6d7   :  { %3961 = dma.vmem_to_hbm [thread:$0]  %s3957_s22, 32, %s3959_s26, [#allocation8]  }
 0x6d8   :  { %4463 = dma.done.wait [#allocation8], 32  }
 0x6d9   :  { %4464 = vsyncadd [#allocation8], 4294967264 }
 0x6da   :  { %3966 = vsyncpa [#allocation8], 1 }

</bundles_post_ra>
